<compile_context>
chip_gen: v6e
topology: v6e:2x2x1
jax: 0.10.0
libtpu: 0.0.40
codegen_flags: <defaults>
</compile_context>

<pallas_src>
import functools

import jax
import jax.numpy as jnp
import numpy as np
from jax.experimental import pallas as pl
from jax.experimental.pallas import tpu as pltpu


# Matmul-operand dtype hook.  f32 matches the PyTorch module at these tiny
# shapes; at realistic mesh sizes set to jnp.bfloat16 on v6e/v7x (native MXU
# rate, half the VMEM/DMA bytes).  Accumulation is always f32
# (preferred_element_type); bias/ELU stay f32 on the VPU/EUP.
MATMUL_DTYPE = jnp.float32


def _mm(a, b):
    return jnp.dot(a.astype(MATMUL_DTYPE), b.astype(MATMUL_DTYPE),
                   preferred_element_type=jnp.float32)


def _elu(x):
    """ELU (alpha=1), matching torch.nn.functional.elu.

    Negative branch is expm1(x): computed from exp (guaranteed Mosaic lowering)
    with a 2-term Taylor patch near 0 so small-|x| accuracy matches expm1.
    """
    xn = jnp.minimum(x, 0.0)
    em1 = jnp.where(xn > -1e-3, xn * (1.0 + 0.5 * xn), jnp.exp(xn) - 1.0)
    return jnp.where(x > 0, x, em1)


# ------------------------------------------------------------------ kernel

def _fused_encoder_kernel(dilations, x_ref, *refs):
    """Whole SpiralEncoder forward for one batch element (one grid step).

    refs = (w_0, b_0, t_0, ..., w_{L-1}, b_{L-1}, t_{L-1}, wp, bp, z_ref)
      w_l : (S_l, C_l, H_l)      SpiralConv weight, spiral-step major
      b_l : (1, H_l)             SpiralConv bias
      t_l : (Vd_l, V_l)          dense down-transform (SpiralPool)
      wp  : (Vd_last, H_last, L) latent projector weight
      bp  : (1, L)               latent projector bias
      z_ref : (1, 1, L)          output block
    All intermediates stay in VMEM/vregs; only z is written back.
    """
    z_ref = refs[-1]
    wp_ref, bp_ref = refs[-3], refs[-2]
    layer_refs = refs[:-3]
    n_layers = len(layer_refs) // 3

    x = x_ref[0]                                    # (V0, C0)
    for l in range(n_layers):
        w_ref, b_ref, t_ref = layer_refs[3 * l: 3 * l + 3]
        V = x.shape[0]
        S = w_ref.shape[0]
        d = dilations[l]

        # SpiralConv: for the circulant template indices ((v + s*d) % V) the
        # spiral gather is a circular shift, so the gathered-feature matmul is
        #   h = b + sum_s roll(x, -s*d, axis=vertex) @ W_s
        # The gather never touches HBM; rolls run on the XLU, dots on the MXU.
        # TODO(synk): arbitrary (non-circulant) spiral indices from a real mesh
        # template need a scalar-prefetched index table + in-kernel gather/DMA
        # here instead of pltpu.roll.
        acc = None
        for s in range(S):
            xs = x if s == 0 else pltpu.roll(x, (-s * d) % V, 0)
            p = _mm(xs, w_ref[s])                   # (V, H_l)
            acc = p if acc is None else acc + p
        h = _elu(acc + b_ref[...])                  # bias + ELU in f32

        # SpiralPool: dense down-transform matmul (kept general, matching the
        # module's arbitrary transform).
        # TODO(synk): for realistic meshes apply the transform as a sparse
        # gather/segment-sum (or tile it with a reduction grid axis) instead of
        # a dense (Vd, V) matmul.
        x = _mm(t_ref[...], h)                      # (Vd_l, H_l)

    # Latent projector: z = flatten(x) @ Wp^T + bp.  Wp is pre-reshaped to
    # (Vd, H, L) so the flatten becomes a short sum of per-vertex matmuls
    # (avoids an in-kernel (Vd, H) -> (1, Vd*H) relayout).
    z = bp_ref[...]                                 # (1, L)
    for v in range(x.shape[0]):
        z = z + _mm(x[v:v + 1, :], wp_ref[v])
    z_ref[0] = z                                    # latent_activation = identity


# ------------------------------------------------------------------ wrappers

def prepare_encoder_params(layer_params, proj_params, seq_lengths, n_verts):
    """One-time re-layout of PyTorch-convention parameters into kernel layout
    (hoisted out of the forward pass: no per-call transposes/reshapes)."""
    kernel_layers = []
    for (w, b), S in zip(layer_params, seq_lengths):
        H, SC = w.shape
        C = SC // S
        w3 = jnp.asarray(w, jnp.float32).T.reshape(S, C, H)      # (S, C, H)
        kernel_layers.append((w3, jnp.asarray(b, jnp.float32).reshape(1, H)))
    wp, bp = proj_params
    L, F = wp.shape
    H_last = F // n_verts
    wp3 = jnp.asarray(wp, jnp.float32).T.reshape(n_verts, H_last, L)
    bp2 = jnp.asarray(bp, jnp.float32).reshape(1, L)
    return kernel_layers, (wp3, bp2)


def spiral_encoder_forward(x, kernel_layers, proj_kernel_params,
                           down_transforms, dilations):
    """Fused SpiralEncoder forward: ONE pallas_call for all conv+ELU+pool
    blocks plus the latent projection."""
    B, V0, C0 = x.shape
    wp3, bp2 = proj_kernel_params
    L = bp2.shape[-1]

    operands = [x]
    in_specs = [pl.BlockSpec((1, V0, C0), lambda i: (i, 0, 0))]

    def whole_array_spec(arr):
        nd = arr.ndim
        return pl.BlockSpec(arr.shape, lambda i, _nd=nd: (0,) * _nd)

    for (w3, b2), t in zip(kernel_layers, down_transforms):
        for arr in (w3, b2, jnp.asarray(t, jnp.float32)):
            operands.append(arr)
            in_specs.append(whole_array_spec(arr))
    for arr in (wp3, bp2):
        operands.append(arr)
        in_specs.append(whole_array_spec(arr))

    kernel = functools.partial(_fused_encoder_kernel, tuple(dilations))
    out = pl.pallas_call(
        kernel,
        out_shape=jax.ShapeDtypeStruct((B, 1, L), jnp.float32),
        grid=(B,),
        in_specs=in_specs,
        out_specs=pl.BlockSpec((1, 1, L), lambda i: (i, 0, 0)),
        compiler_params=pltpu.CompilerParams(
            # batch-parallel grid -> both TensorCores used on v7x
            dimension_semantics=("parallel",)),
    )(*operands)
    return out.reshape(B, L)


# -------------------------------------------------- synthetic "template" data
# TODO(synk): the real preprocess_template() loads a mesh template from disk
# and computes spiral indices / quadric-decimation down-transforms; we
# synthesize deterministic equivalents with identical shapes/semantics.

def make_spiral_indices(n_verts, seq_length, dilation=1):
    v = jnp.arange(n_verts)[:, None]
    s = jnp.arange(seq_length)[None, :]
    return (v + s * dilation) % n_verts                  # [V, S], int32


def make_down_transform(v_in, factor):
    v_out = v_in // factor
    t = jnp.zeros((v_out, v_in), jnp.float32)
    rows = jnp.repeat(jnp.arange(v_out), factor)
    cols = jnp.arange(v_in)
    return t.at[rows, cols].set(1.0 / factor)            # [V_out, V_in]


def xavier_uniform(key, out_f, in_f):
    limit = (6.0 / (in_f + out_f)) ** 0.5
    return jax.random.uniform(key, (out_f, in_f), jnp.float32, -limit, limit)


# -------------------------------------------------------------- pure-JAX ref

def reference_forward(x, layer_params, proj_params, spiral_indices,
                      down_transforms):
    """Gather-based reference, mirroring the PyTorch forward exactly."""
    B = x.shape[0]
    for (w, b), idx, t in zip(layer_params, spiral_indices, down_transforms):
        V, S = idx.shape
        C = x.shape[-1]
        xg = x[:, idx.reshape(-1), :].reshape(B, V, S * C)   # index_select+view
        h = jax.nn.elu(xg @ w.T + b)                          # SpiralConv + ELU
        x = jnp.einsum('uv,bvh->buh', t, h)                   # SpiralPool
    xf = x.reshape(B, -1)
    wp, bp = proj_params
    return xf @ wp.T + bp                                     # latent (identity)


# --------------------------------------------------------------------- main

if __name__ == "__main__":
    key = jax.random.PRNGKey(0)

    # Config (small but shape-consistent with the module defaults)
    B = 2
    in_channels = 3
    hidden_channels = (16, 16, 32)
    latent_channels = 8
    seq_lengths = (9, 9, 9)
    dilations = (1, 1, 1)
    ds_factors = (4, 4, 4)
    V0 = 256                                   # template vertex count

    # "preprocess_template"
    vert_counts = [V0]
    for f in ds_factors:
        vert_counts.append(vert_counts[-1] // f)              # 256->64->16->4
    spiral_indices = [
        make_spiral_indices(vert_counts[i], seq_lengths[i], dilations[i])
        for i in range(len(ds_factors))
    ]
    down_transforms = [
        make_down_transform(vert_counts[i], ds_factors[i])
        for i in range(len(ds_factors))
    ]
    n_verts = down_transforms[-1].shape[0]                    # 4

    # Parameters (xavier_uniform weights, zero biases), PyTorch layout
    inp_list = (in_channels,) + hidden_channels[:-1]
    out_list = hidden_channels
    keys = jax.random.split(key, len(out_list) + 2)
    layer_params = []
    for i, (cin, cout) in enumerate(zip(inp_list, out_list)):
        w = xavier_uniform(keys[i], cout, seq_lengths[i] * cin)  # (out, S*in)
        b = jnp.zeros((cout,), jnp.float32)
        layer_params.append((w, b))
    wp = xavier_uniform(keys[-2], latent_channels, n_verts * hidden_channels[-1])
    bp = jnp.zeros((latent_channels,), jnp.float32)

    # Input: [B, V0, in_channels]
    x = jax.random.normal(keys[-1], (B, V0, in_channels), jnp.float32)

    # One-time parameter re-layout (hoisted out of the forward pass).
    kernel_layers, proj_kernel = prepare_encoder_params(
        layer_params, (wp, bp), seq_lengths, n_verts)

    z = spiral_encoder_forward(x, kernel_layers, proj_kernel,
                               down_transforms, dilations)
    z = jax.block_until_ready(z)
    assert z.shape == (B, latent_channels)

    # Correctness check against the gather-based pure-JAX reference.  Loose
    # tolerance covers TPU default matmul precision (f32 dots may run at
    # bf16-pass precision); structural errors would be O(1).
    z_ref = reference_forward(x, layer_params, (wp, bp),
                              spiral_indices, down_transforms)
    np.testing.assert_allclose(np.asarray(z), np.asarray(jax.block_until_ready(z_ref)),
                               rtol=5e-2, atol=5e-2)

    print("KERNEL_OK")
</pallas_src>

<mosaic_0001>
module attributes {stable_mosaic.version = 11 : i64} {
  func.func @_fused_encoder_kernel(%arg0: i32, %arg1: memref<1x256x3xf32, #tpu.memory_space<vmem>>, %arg2: memref<9x3x16xf32, #tpu.memory_space<vmem>>, %arg3: memref<1x16xf32, #tpu.memory_space<vmem>>, %arg4: memref<64x256xf32, #tpu.memory_space<vmem>>, %arg5: memref<9x16x16xf32, #tpu.memory_space<vmem>>, %arg6: memref<1x16xf32, #tpu.memory_space<vmem>>, %arg7: memref<16x64xf32, #tpu.memory_space<vmem>>, %arg8: memref<9x16x32xf32, #tpu.memory_space<vmem>>, %arg9: memref<1x32xf32, #tpu.memory_space<vmem>>, %arg10: memref<4x16xf32, #tpu.memory_space<vmem>>, %arg11: memref<4x32x8xf32, #tpu.memory_space<vmem>>, %arg12: memref<1x8xf32, #tpu.memory_space<vmem>>, %arg13: memref<1x1x8xf32, #tpu.memory_space<vmem>>) attributes {dimension_semantics = [#tpu.dimension_semantics<parallel>], iteration_bounds = array<i64: 2>, scalar_prefetch = 0 : i64, scratch_operands = 0 : i64, tpu.core_type = #tpu.core_type<tc>, window_params = [{transform_indices = @transform_0, window_bounds = array<i64: 1, 256, 3>}, {pipeline_mode = #tpu.pipeline_mode<synchronous>, transform_indices = @transform_1, window_bounds = array<i64: 9, 3, 16>}, {pipeline_mode = #tpu.pipeline_mode<synchronous>, transform_indices = @transform_2, window_bounds = array<i64: 1, 16>}, {pipeline_mode = #tpu.pipeline_mode<synchronous>, transform_indices = @transform_3, window_bounds = array<i64: 64, 256>}, {pipeline_mode = #tpu.pipeline_mode<synchronous>, transform_indices = @transform_4, window_bounds = array<i64: 9, 16, 16>}, {pipeline_mode = #tpu.pipeline_mode<synchronous>, transform_indices = @transform_5, window_bounds = array<i64: 1, 16>}, {pipeline_mode = #tpu.pipeline_mode<synchronous>, transform_indices = @transform_6, window_bounds = array<i64: 16, 64>}, {pipeline_mode = #tpu.pipeline_mode<synchronous>, transform_indices = @transform_7, window_bounds = array<i64: 9, 16, 32>}, {pipeline_mode = #tpu.pipeline_mode<synchronous>, transform_indices = @transform_8, window_bounds = array<i64: 1, 32>}, {pipeline_mode = #tpu.pipeline_mode<synchronous>, transform_indices = @transform_9, window_bounds = array<i64: 4, 16>}, {pipeline_mode = #tpu.pipeline_mode<synchronous>, transform_indices = @transform_10, window_bounds = array<i64: 4, 32, 8>}, {pipeline_mode = #tpu.pipeline_mode<synchronous>, transform_indices = @transform_11, window_bounds = array<i64: 1, 8>}, {transform_indices = @transform_12, window_bounds = array<i64: 1, 1, 8>}]} {
    %c0 = arith.constant 0 : index
    %c0_0 = arith.constant 0 : index
    %c0_1 = arith.constant 0 : index
    %0 = vector.load %arg1[%c0, %c0_0, %c0_1] : memref<1x256x3xf32, #tpu.memory_space<vmem>>, vector<1x256x3xf32>
    %1 = vector.shape_cast %0 : vector<1x256x3xf32> to vector<256x3xf32>
    %c0_2 = arith.constant 0 : index
    %c0_3 = arith.constant 0 : index
    %c0_4 = arith.constant 0 : index
    %2 = vector.load %arg2[%c0_2, %c0_3, %c0_4] : memref<9x3x16xf32, #tpu.memory_space<vmem>>, vector<1x3x16xf32>
    %3 = vector.shape_cast %2 : vector<1x3x16xf32> to vector<3x16xf32>
    %cst = arith.constant dense<0.000000e+00> : vector<256x16xf32>
    %4 = tpu.matmul %1, %3, %cst {dimension_numbers = #tpu.dot_dimension_numbers<[1], [0], [0], [1], [0, 0, 1, 1], [], []>} : vector<256x3xf32>, vector<3x16xf32>, vector<256x16xf32> -> vector<256x16xf32>
    %c255_i32 = arith.constant 255 : i32
    %5 = tpu.dynamic_rotate %1 by %c255_i32 dim 0 : vector<256x3xf32>, i32 -> vector<256x3xf32>
    %c1 = arith.constant 1 : index
    %c0_5 = arith.constant 0 : index
    %c0_6 = arith.constant 0 : index
    %6 = vector.load %arg2[%c1, %c0_5, %c0_6] : memref<9x3x16xf32, #tpu.memory_space<vmem>>, vector<1x3x16xf32>
    %7 = vector.shape_cast %6 : vector<1x3x16xf32> to vector<3x16xf32>
    %cst_7 = arith.constant dense<0.000000e+00> : vector<256x16xf32>
    %8 = tpu.matmul %5, %7, %cst_7 {dimension_numbers = #tpu.dot_dimension_numbers<[1], [0], [0], [1], [0, 0, 1, 1], [], []>} : vector<256x3xf32>, vector<3x16xf32>, vector<256x16xf32> -> vector<256x16xf32>
    %9 = arith.addf %4, %8 : vector<256x16xf32>
    %c254_i32 = arith.constant 254 : i32
    %10 = tpu.dynamic_rotate %1 by %c254_i32 dim 0 : vector<256x3xf32>, i32 -> vector<256x3xf32>
    %c2 = arith.constant 2 : index
    %c0_8 = arith.constant 0 : index
    %c0_9 = arith.constant 0 : index
    %11 = vector.load %arg2[%c2, %c0_8, %c0_9] : memref<9x3x16xf32, #tpu.memory_space<vmem>>, vector<1x3x16xf32>
    %12 = vector.shape_cast %11 : vector<1x3x16xf32> to vector<3x16xf32>
    %cst_10 = arith.constant dense<0.000000e+00> : vector<256x16xf32>
    %13 = tpu.matmul %10, %12, %cst_10 {dimension_numbers = #tpu.dot_dimension_numbers<[1], [0], [0], [1], [0, 0, 1, 1], [], []>} : vector<256x3xf32>, vector<3x16xf32>, vector<256x16xf32> -> vector<256x16xf32>
    %14 = arith.addf %9, %13 : vector<256x16xf32>
    %c253_i32 = arith.constant 253 : i32
    %15 = tpu.dynamic_rotate %1 by %c253_i32 dim 0 : vector<256x3xf32>, i32 -> vector<256x3xf32>
    %c3 = arith.constant 3 : index
    %c0_11 = arith.constant 0 : index
    %c0_12 = arith.constant 0 : index
    %16 = vector.load %arg2[%c3, %c0_11, %c0_12] : memref<9x3x16xf32, #tpu.memory_space<vmem>>, vector<1x3x16xf32>
    %17 = vector.shape_cast %16 : vector<1x3x16xf32> to vector<3x16xf32>
    %cst_13 = arith.constant dense<0.000000e+00> : vector<256x16xf32>
    %18 = tpu.matmul %15, %17, %cst_13 {dimension_numbers = #tpu.dot_dimension_numbers<[1], [0], [0], [1], [0, 0, 1, 1], [], []>} : vector<256x3xf32>, vector<3x16xf32>, vector<256x16xf32> -> vector<256x16xf32>
    %19 = arith.addf %14, %18 : vector<256x16xf32>
    %c252_i32 = arith.constant 252 : i32
    %20 = tpu.dynamic_rotate %1 by %c252_i32 dim 0 : vector<256x3xf32>, i32 -> vector<256x3xf32>
    %c4 = arith.constant 4 : index
    %c0_14 = arith.constant 0 : index
    %c0_15 = arith.constant 0 : index
    %21 = vector.load %arg2[%c4, %c0_14, %c0_15] : memref<9x3x16xf32, #tpu.memory_space<vmem>>, vector<1x3x16xf32>
    %22 = vector.shape_cast %21 : vector<1x3x16xf32> to vector<3x16xf32>
    %cst_16 = arith.constant dense<0.000000e+00> : vector<256x16xf32>
    %23 = tpu.matmul %20, %22, %cst_16 {dimension_numbers = #tpu.dot_dimension_numbers<[1], [0], [0], [1], [0, 0, 1, 1], [], []>} : vector<256x3xf32>, vector<3x16xf32>, vector<256x16xf32> -> vector<256x16xf32>
    %24 = arith.addf %19, %23 : vector<256x16xf32>
    %c251_i32 = arith.constant 251 : i32
    %25 = tpu.dynamic_rotate %1 by %c251_i32 dim 0 : vector<256x3xf32>, i32 -> vector<256x3xf32>
    %c5 = arith.constant 5 : index
    %c0_17 = arith.constant 0 : index
    %c0_18 = arith.constant 0 : index
    %26 = vector.load %arg2[%c5, %c0_17, %c0_18] : memref<9x3x16xf32, #tpu.memory_space<vmem>>, vector<1x3x16xf32>
    %27 = vector.shape_cast %26 : vector<1x3x16xf32> to vector<3x16xf32>
    %cst_19 = arith.constant dense<0.000000e+00> : vector<256x16xf32>
    %28 = tpu.matmul %25, %27, %cst_19 {dimension_numbers = #tpu.dot_dimension_numbers<[1], [0], [0], [1], [0, 0, 1, 1], [], []>} : vector<256x3xf32>, vector<3x16xf32>, vector<256x16xf32> -> vector<256x16xf32>
    %29 = arith.addf %24, %28 : vector<256x16xf32>
    %c250_i32 = arith.constant 250 : i32
    %30 = tpu.dynamic_rotate %1 by %c250_i32 dim 0 : vector<256x3xf32>, i32 -> vector<256x3xf32>
    %c6 = arith.constant 6 : index
    %c0_20 = arith.constant 0 : index
    %c0_21 = arith.constant 0 : index
    %31 = vector.load %arg2[%c6, %c0_20, %c0_21] : memref<9x3x16xf32, #tpu.memory_space<vmem>>, vector<1x3x16xf32>
    %32 = vector.shape_cast %31 : vector<1x3x16xf32> to vector<3x16xf32>
    %cst_22 = arith.constant dense<0.000000e+00> : vector<256x16xf32>
    %33 = tpu.matmul %30, %32, %cst_22 {dimension_numbers = #tpu.dot_dimension_numbers<[1], [0], [0], [1], [0, 0, 1, 1], [], []>} : vector<256x3xf32>, vector<3x16xf32>, vector<256x16xf32> -> vector<256x16xf32>
    %34 = arith.addf %29, %33 : vector<256x16xf32>
    %c249_i32 = arith.constant 249 : i32
    %35 = tpu.dynamic_rotate %1 by %c249_i32 dim 0 : vector<256x3xf32>, i32 -> vector<256x3xf32>
    %c7 = arith.constant 7 : index
    %c0_23 = arith.constant 0 : index
    %c0_24 = arith.constant 0 : index
    %36 = vector.load %arg2[%c7, %c0_23, %c0_24] : memref<9x3x16xf32, #tpu.memory_space<vmem>>, vector<1x3x16xf32>
    %37 = vector.shape_cast %36 : vector<1x3x16xf32> to vector<3x16xf32>
    %cst_25 = arith.constant dense<0.000000e+00> : vector<256x16xf32>
    %38 = tpu.matmul %35, %37, %cst_25 {dimension_numbers = #tpu.dot_dimension_numbers<[1], [0], [0], [1], [0, 0, 1, 1], [], []>} : vector<256x3xf32>, vector<3x16xf32>, vector<256x16xf32> -> vector<256x16xf32>
    %39 = arith.addf %34, %38 : vector<256x16xf32>
    %c248_i32 = arith.constant 248 : i32
    %40 = tpu.dynamic_rotate %1 by %c248_i32 dim 0 : vector<256x3xf32>, i32 -> vector<256x3xf32>
    %c8 = arith.constant 8 : index
    %c0_26 = arith.constant 0 : index
    %c0_27 = arith.constant 0 : index
    %41 = vector.load %arg2[%c8, %c0_26, %c0_27] : memref<9x3x16xf32, #tpu.memory_space<vmem>>, vector<1x3x16xf32>
    %42 = vector.shape_cast %41 : vector<1x3x16xf32> to vector<3x16xf32>
    %cst_28 = arith.constant dense<0.000000e+00> : vector<256x16xf32>
    %43 = tpu.matmul %40, %42, %cst_28 {dimension_numbers = #tpu.dot_dimension_numbers<[1], [0], [0], [1], [0, 0, 1, 1], [], []>} : vector<256x3xf32>, vector<3x16xf32>, vector<256x16xf32> -> vector<256x16xf32>
    %44 = arith.addf %39, %43 : vector<256x16xf32>
    %c0_29 = arith.constant 0 : index
    %c0_30 = arith.constant 0 : index
    %45 = vector.load %arg3[%c0_29, %c0_30] : memref<1x16xf32, #tpu.memory_space<vmem>>, vector<1x16xf32>
    %46 = vector.broadcast %45 : vector<1x16xf32> to vector<256x16xf32>
    %47 = arith.addf %44, %46 : vector<256x16xf32>
    %cst_31 = arith.constant 0.000000e+00 : f32
    %48 = vector.broadcast %cst_31 : f32 to vector<256x16xf32>
    %49 = arith.minimumf %47, %48 : vector<256x16xf32>
    %cst_32 = arith.constant -1.000000e-03 : f32
    %50 = vector.broadcast %cst_32 : f32 to vector<256x16xf32>
    %51 = arith.cmpf ogt, %49, %50 : vector<256x16xf32>
    %cst_33 = arith.constant 5.000000e-01 : f32
    %52 = vector.broadcast %cst_33 : f32 to vector<256x16xf32>
    %53 = arith.mulf %52, %49 : vector<256x16xf32>
    %cst_34 = arith.constant 1.000000e+00 : f32
    %54 = vector.broadcast %cst_34 : f32 to vector<256x16xf32>
    %55 = arith.addf %54, %53 : vector<256x16xf32>
    %56 = arith.mulf %49, %55 : vector<256x16xf32>
    %57 = math.exp %49 : vector<256x16xf32>
    %cst_35 = arith.constant 1.000000e+00 : f32
    %58 = vector.broadcast %cst_35 : f32 to vector<256x16xf32>
    %59 = arith.subf %57, %58 : vector<256x16xf32>
    %60 = arith.select %51, %56, %59 : vector<256x16xi1>, vector<256x16xf32>
    %cst_36 = arith.constant 0.000000e+00 : f32
    %61 = vector.broadcast %cst_36 : f32 to vector<256x16xf32>
    %62 = arith.cmpf ogt, %47, %61 : vector<256x16xf32>
    %63 = arith.select %62, %47, %60 : vector<256x16xi1>, vector<256x16xf32>
    %c0_37 = arith.constant 0 : index
    %c0_38 = arith.constant 0 : index
    %64 = vector.load %arg4[%c0_37, %c0_38] : memref<64x256xf32, #tpu.memory_space<vmem>>, vector<64x256xf32>
    %cst_39 = arith.constant dense<0.000000e+00> : vector<64x16xf32>
    %65 = tpu.matmul %64, %63, %cst_39 {dimension_numbers = #tpu.dot_dimension_numbers<[1], [0], [0], [1], [0, 0, 1, 1], [], []>} : vector<64x256xf32>, vector<256x16xf32>, vector<64x16xf32> -> vector<64x16xf32>
    %c0_40 = arith.constant 0 : index
    %c0_41 = arith.constant 0 : index
    %c0_42 = arith.constant 0 : index
    %66 = vector.load %arg5[%c0_40, %c0_41, %c0_42] : memref<9x16x16xf32, #tpu.memory_space<vmem>>, vector<1x16x16xf32>
    %67 = vector.shape_cast %66 : vector<1x16x16xf32> to vector<16x16xf32>
    %cst_43 = arith.constant dense<0.000000e+00> : vector<64x16xf32>
    %68 = tpu.matmul %65, %67, %cst_43 {dimension_numbers = #tpu.dot_dimension_numbers<[1], [0], [0], [1], [0, 0, 1, 1], [], []>} : vector<64x16xf32>, vector<16x16xf32>, vector<64x16xf32> -> vector<64x16xf32>
    %c63_i32 = arith.constant 63 : i32
    %69 = tpu.dynamic_rotate %65 by %c63_i32 dim 0 : vector<64x16xf32>, i32 -> vector<64x16xf32>
    %c1_44 = arith.constant 1 : index
    %c0_45 = arith.constant 0 : index
    %c0_46 = arith.constant 0 : index
    %70 = vector.load %arg5[%c1_44, %c0_45, %c0_46] : memref<9x16x16xf32, #tpu.memory_space<vmem>>, vector<1x16x16xf32>
    %71 = vector.shape_cast %70 : vector<1x16x16xf32> to vector<16x16xf32>
    %cst_47 = arith.constant dense<0.000000e+00> : vector<64x16xf32>
    %72 = tpu.matmul %69, %71, %cst_47 {dimension_numbers = #tpu.dot_dimension_numbers<[1], [0], [0], [1], [0, 0, 1, 1], [], []>} : vector<64x16xf32>, vector<16x16xf32>, vector<64x16xf32> -> vector<64x16xf32>
    %73 = arith.addf %68, %72 : vector<64x16xf32>
    %c62_i32 = arith.constant 62 : i32
    %74 = tpu.dynamic_rotate %65 by %c62_i32 dim 0 : vector<64x16xf32>, i32 -> vector<64x16xf32>
    %c2_48 = arith.constant 2 : index
    %c0_49 = arith.constant 0 : index
    %c0_50 = arith.constant 0 : index
    %75 = vector.load %arg5[%c2_48, %c0_49, %c0_50] : memref<9x16x16xf32, #tpu.memory_space<vmem>>, vector<1x16x16xf32>
    %76 = vector.shape_cast %75 : vector<1x16x16xf32> to vector<16x16xf32>
    %cst_51 = arith.constant dense<0.000000e+00> : vector<64x16xf32>
    %77 = tpu.matmul %74, %76, %cst_51 {dimension_numbers = #tpu.dot_dimension_numbers<[1], [0], [0], [1], [0, 0, 1, 1], [], []>} : vector<64x16xf32>, vector<16x16xf32>, vector<64x16xf32> -> vector<64x16xf32>
    %78 = arith.addf %73, %77 : vector<64x16xf32>
    %c61_i32 = arith.constant 61 : i32
    %79 = tpu.dynamic_rotate %65 by %c61_i32 dim 0 : vector<64x16xf32>, i32 -> vector<64x16xf32>
    %c3_52 = arith.constant 3 : index
    %c0_53 = arith.constant 0 : index
    %c0_54 = arith.constant 0 : index
    %80 = vector.load %arg5[%c3_52, %c0_53, %c0_54] : memref<9x16x16xf32, #tpu.memory_space<vmem>>, vector<1x16x16xf32>
    %81 = vector.shape_cast %80 : vector<1x16x16xf32> to vector<16x16xf32>
    %cst_55 = arith.constant dense<0.000000e+00> : vector<64x16xf32>
    %82 = tpu.matmul %79, %81, %cst_55 {dimension_numbers = #tpu.dot_dimension_numbers<[1], [0], [0], [1], [0, 0, 1, 1], [], []>} : vector<64x16xf32>, vector<16x16xf32>, vector<64x16xf32> -> vector<64x16xf32>
    %83 = arith.addf %78, %82 : vector<64x16xf32>
    %c60_i32 = arith.constant 60 : i32
    %84 = tpu.dynamic_rotate %65 by %c60_i32 dim 0 : vector<64x16xf32>, i32 -> vector<64x16xf32>
    %c4_56 = arith.constant 4 : index
    %c0_57 = arith.constant 0 : index
    %c0_58 = arith.constant 0 : index
    %85 = vector.load %arg5[%c4_56, %c0_57, %c0_58] : memref<9x16x16xf32, #tpu.memory_space<vmem>>, vector<1x16x16xf32>
    %86 = vector.shape_cast %85 : vector<1x16x16xf32> to vector<16x16xf32>
    %cst_59 = arith.constant dense<0.000000e+00> : vector<64x16xf32>
    %87 = tpu.matmul %84, %86, %cst_59 {dimension_numbers = #tpu.dot_dimension_numbers<[1], [0], [0], [1], [0, 0, 1, 1], [], []>} : vector<64x16xf32>, vector<16x16xf32>, vector<64x16xf32> -> vector<64x16xf32>
    %88 = arith.addf %83, %87 : vector<64x16xf32>
    %c59_i32 = arith.constant 59 : i32
    %89 = tpu.dynamic_rotate %65 by %c59_i32 dim 0 : vector<64x16xf32>, i32 -> vector<64x16xf32>
    %c5_60 = arith.constant 5 : index
    %c0_61 = arith.constant 0 : index
    %c0_62 = arith.constant 0 : index
    %90 = vector.load %arg5[%c5_60, %c0_61, %c0_62] : memref<9x16x16xf32, #tpu.memory_space<vmem>>, vector<1x16x16xf32>
    %91 = vector.shape_cast %90 : vector<1x16x16xf32> to vector<16x16xf32>
    %cst_63 = arith.constant dense<0.000000e+00> : vector<64x16xf32>
    %92 = tpu.matmul %89, %91, %cst_63 {dimension_numbers = #tpu.dot_dimension_numbers<[1], [0], [0], [1], [0, 0, 1, 1], [], []>} : vector<64x16xf32>, vector<16x16xf32>, vector<64x16xf32> -> vector<64x16xf32>
    %93 = arith.addf %88, %92 : vector<64x16xf32>
    %c58_i32 = arith.constant 58 : i32
    %94 = tpu.dynamic_rotate %65 by %c58_i32 dim 0 : vector<64x16xf32>, i32 -> vector<64x16xf32>
    %c6_64 = arith.constant 6 : index
    %c0_65 = arith.constant 0 : index
    %c0_66 = arith.constant 0 : index
    %95 = vector.load %arg5[%c6_64, %c0_65, %c0_66] : memref<9x16x16xf32, #tpu.memory_space<vmem>>, vector<1x16x16xf32>
    %96 = vector.shape_cast %95 : vector<1x16x16xf32> to vector<16x16xf32>
    %cst_67 = arith.constant dense<0.000000e+00> : vector<64x16xf32>
    %97 = tpu.matmul %94, %96, %cst_67 {dimension_numbers = #tpu.dot_dimension_numbers<[1], [0], [0], [1], [0, 0, 1, 1], [], []>} : vector<64x16xf32>, vector<16x16xf32>, vector<64x16xf32> -> vector<64x16xf32>
    %98 = arith.addf %93, %97 : vector<64x16xf32>
    %c57_i32 = arith.constant 57 : i32
    %99 = tpu.dynamic_rotate %65 by %c57_i32 dim 0 : vector<64x16xf32>, i32 -> vector<64x16xf32>
    %c7_68 = arith.constant 7 : index
    %c0_69 = arith.constant 0 : index
    %c0_70 = arith.constant 0 : index
    %100 = vector.load %arg5[%c7_68, %c0_69, %c0_70] : memref<9x16x16xf32, #tpu.memory_space<vmem>>, vector<1x16x16xf32>
    %101 = vector.shape_cast %100 : vector<1x16x16xf32> to vector<16x16xf32>
    %cst_71 = arith.constant dense<0.000000e+00> : vector<64x16xf32>
    %102 = tpu.matmul %99, %101, %cst_71 {dimension_numbers = #tpu.dot_dimension_numbers<[1], [0], [0], [1], [0, 0, 1, 1], [], []>} : vector<64x16xf32>, vector<16x16xf32>, vector<64x16xf32> -> vector<64x16xf32>
    %103 = arith.addf %98, %102 : vector<64x16xf32>
    %c56_i32 = arith.constant 56 : i32
    %104 = tpu.dynamic_rotate %65 by %c56_i32 dim 0 : vector<64x16xf32>, i32 -> vector<64x16xf32>
    %c8_72 = arith.constant 8 : index
    %c0_73 = arith.constant 0 : index
    %c0_74 = arith.constant 0 : index
    %105 = vector.load %arg5[%c8_72, %c0_73, %c0_74] : memref<9x16x16xf32, #tpu.memory_space<vmem>>, vector<1x16x16xf32>
    %106 = vector.shape_cast %105 : vector<1x16x16xf32> to vector<16x16xf32>
    %cst_75 = arith.constant dense<0.000000e+00> : vector<64x16xf32>
    %107 = tpu.matmul %104, %106, %cst_75 {dimension_numbers = #tpu.dot_dimension_numbers<[1], [0], [0], [1], [0, 0, 1, 1], [], []>} : vector<64x16xf32>, vector<16x16xf32>, vector<64x16xf32> -> vector<64x16xf32>
    %108 = arith.addf %103, %107 : vector<64x16xf32>
    %c0_76 = arith.constant 0 : index
    %c0_77 = arith.constant 0 : index
    %109 = vector.load %arg6[%c0_76, %c0_77] : memref<1x16xf32, #tpu.memory_space<vmem>>, vector<1x16xf32>
    %110 = vector.broadcast %109 : vector<1x16xf32> to vector<64x16xf32>
    %111 = arith.addf %108, %110 : vector<64x16xf32>
    %cst_78 = arith.constant 0.000000e+00 : f32
    %112 = vector.broadcast %cst_78 : f32 to vector<64x16xf32>
    %113 = arith.minimumf %111, %112 : vector<64x16xf32>
    %cst_79 = arith.constant -1.000000e-03 : f32
    %114 = vector.broadcast %cst_79 : f32 to vector<64x16xf32>
    %115 = arith.cmpf ogt, %113, %114 : vector<64x16xf32>
    %cst_80 = arith.constant 5.000000e-01 : f32
    %116 = vector.broadcast %cst_80 : f32 to vector<64x16xf32>
    %117 = arith.mulf %116, %113 : vector<64x16xf32>
    %cst_81 = arith.constant 1.000000e+00 : f32
    %118 = vector.broadcast %cst_81 : f32 to vector<64x16xf32>
    %119 = arith.addf %118, %117 : vector<64x16xf32>
    %120 = arith.mulf %113, %119 : vector<64x16xf32>
    %121 = math.exp %113 : vector<64x16xf32>
    %cst_82 = arith.constant 1.000000e+00 : f32
    %122 = vector.broadcast %cst_82 : f32 to vector<64x16xf32>
    %123 = arith.subf %121, %122 : vector<64x16xf32>
    %124 = arith.select %115, %120, %123 : vector<64x16xi1>, vector<64x16xf32>
    %cst_83 = arith.constant 0.000000e+00 : f32
    %125 = vector.broadcast %cst_83 : f32 to vector<64x16xf32>
    %126 = arith.cmpf ogt, %111, %125 : vector<64x16xf32>
    %127 = arith.select %126, %111, %124 : vector<64x16xi1>, vector<64x16xf32>
    %c0_84 = arith.constant 0 : index
    %c0_85 = arith.constant 0 : index
    %128 = vector.load %arg7[%c0_84, %c0_85] : memref<16x64xf32, #tpu.memory_space<vmem>>, vector<16x64xf32>
    %cst_86 = arith.constant dense<0.000000e+00> : vector<16x16xf32>
    %129 = tpu.matmul %128, %127, %cst_86 {dimension_numbers = #tpu.dot_dimension_numbers<[1], [0], [0], [1], [0, 0, 1, 1], [], []>} : vector<16x64xf32>, vector<64x16xf32>, vector<16x16xf32> -> vector<16x16xf32>
    %c0_87 = arith.constant 0 : index
    %c0_88 = arith.constant 0 : index
    %c0_89 = arith.constant 0 : index
    %130 = vector.load %arg8[%c0_87, %c0_88, %c0_89] : memref<9x16x32xf32, #tpu.memory_space<vmem>>, vector<1x16x32xf32>
    %131 = vector.shape_cast %130 : vector<1x16x32xf32> to vector<16x32xf32>
    %cst_90 = arith.constant dense<0.000000e+00> : vector<16x32xf32>
    %132 = tpu.matmul %129, %131, %cst_90 {dimension_numbers = #tpu.dot_dimension_numbers<[1], [0], [0], [1], [0, 0, 1, 1], [], []>} : vector<16x16xf32>, vector<16x32xf32>, vector<16x32xf32> -> vector<16x32xf32>
    %c15_i32 = arith.constant 15 : i32
    %133 = tpu.dynamic_rotate %129 by %c15_i32 dim 0 : vector<16x16xf32>, i32 -> vector<16x16xf32>
    %c1_91 = arith.constant 1 : index
    %c0_92 = arith.constant 0 : index
    %c0_93 = arith.constant 0 : index
    %134 = vector.load %arg8[%c1_91, %c0_92, %c0_93] : memref<9x16x32xf32, #tpu.memory_space<vmem>>, vector<1x16x32xf32>
    %135 = vector.shape_cast %134 : vector<1x16x32xf32> to vector<16x32xf32>
    %cst_94 = arith.constant dense<0.000000e+00> : vector<16x32xf32>
    %136 = tpu.matmul %133, %135, %cst_94 {dimension_numbers = #tpu.dot_dimension_numbers<[1], [0], [0], [1], [0, 0, 1, 1], [], []>} : vector<16x16xf32>, vector<16x32xf32>, vector<16x32xf32> -> vector<16x32xf32>
    %137 = arith.addf %132, %136 : vector<16x32xf32>
    %c14_i32 = arith.constant 14 : i32
    %138 = tpu.dynamic_rotate %129 by %c14_i32 dim 0 : vector<16x16xf32>, i32 -> vector<16x16xf32>
    %c2_95 = arith.constant 2 : index
    %c0_96 = arith.constant 0 : index
    %c0_97 = arith.constant 0 : index
    %139 = vector.load %arg8[%c2_95, %c0_96, %c0_97] : memref<9x16x32xf32, #tpu.memory_space<vmem>>, vector<1x16x32xf32>
    %140 = vector.shape_cast %139 : vector<1x16x32xf32> to vector<16x32xf32>
    %cst_98 = arith.constant dense<0.000000e+00> : vector<16x32xf32>
    %141 = tpu.matmul %138, %140, %cst_98 {dimension_numbers = #tpu.dot_dimension_numbers<[1], [0], [0], [1], [0, 0, 1, 1], [], []>} : vector<16x16xf32>, vector<16x32xf32>, vector<16x32xf32> -> vector<16x32xf32>
    %142 = arith.addf %137, %141 : vector<16x32xf32>
    %c13_i32 = arith.constant 13 : i32
    %143 = tpu.dynamic_rotate %129 by %c13_i32 dim 0 : vector<16x16xf32>, i32 -> vector<16x16xf32>
    %c3_99 = arith.constant 3 : index
    %c0_100 = arith.constant 0 : index
    %c0_101 = arith.constant 0 : index
    %144 = vector.load %arg8[%c3_99, %c0_100, %c0_101] : memref<9x16x32xf32, #tpu.memory_space<vmem>>, vector<1x16x32xf32>
    %145 = vector.shape_cast %144 : vector<1x16x32xf32> to vector<16x32xf32>
    %cst_102 = arith.constant dense<0.000000e+00> : vector<16x32xf32>
    %146 = tpu.matmul %143, %145, %cst_102 {dimension_numbers = #tpu.dot_dimension_numbers<[1], [0], [0], [1], [0, 0, 1, 1], [], []>} : vector<16x16xf32>, vector<16x32xf32>, vector<16x32xf32> -> vector<16x32xf32>
    %147 = arith.addf %142, %146 : vector<16x32xf32>
    %c12_i32 = arith.constant 12 : i32
    %148 = tpu.dynamic_rotate %129 by %c12_i32 dim 0 : vector<16x16xf32>, i32 -> vector<16x16xf32>
    %c4_103 = arith.constant 4 : index
    %c0_104 = arith.constant 0 : index
    %c0_105 = arith.constant 0 : index
    %149 = vector.load %arg8[%c4_103, %c0_104, %c0_105] : memref<9x16x32xf32, #tpu.memory_space<vmem>>, vector<1x16x32xf32>
    %150 = vector.shape_cast %149 : vector<1x16x32xf32> to vector<16x32xf32>
    %cst_106 = arith.constant dense<0.000000e+00> : vector<16x32xf32>
    %151 = tpu.matmul %148, %150, %cst_106 {dimension_numbers = #tpu.dot_dimension_numbers<[1], [0], [0], [1], [0, 0, 1, 1], [], []>} : vector<16x16xf32>, vector<16x32xf32>, vector<16x32xf32> -> vector<16x32xf32>
    %152 = arith.addf %147, %151 : vector<16x32xf32>
    %c11_i32 = arith.constant 11 : i32
    %153 = tpu.dynamic_rotate %129 by %c11_i32 dim 0 : vector<16x16xf32>, i32 -> vector<16x16xf32>
    %c5_107 = arith.constant 5 : index
    %c0_108 = arith.constant 0 : index
    %c0_109 = arith.constant 0 : index
    %154 = vector.load %arg8[%c5_107, %c0_108, %c0_109] : memref<9x16x32xf32, #tpu.memory_space<vmem>>, vector<1x16x32xf32>
    %155 = vector.shape_cast %154 : vector<1x16x32xf32> to vector<16x32xf32>
    %cst_110 = arith.constant dense<0.000000e+00> : vector<16x32xf32>
    %156 = tpu.matmul %153, %155, %cst_110 {dimension_numbers = #tpu.dot_dimension_numbers<[1], [0], [0], [1], [0, 0, 1, 1], [], []>} : vector<16x16xf32>, vector<16x32xf32>, vector<16x32xf32> -> vector<16x32xf32>
    %157 = arith.addf %152, %156 : vector<16x32xf32>
    %c10_i32 = arith.constant 10 : i32
    %158 = tpu.dynamic_rotate %129 by %c10_i32 dim 0 : vector<16x16xf32>, i32 -> vector<16x16xf32>
    %c6_111 = arith.constant 6 : index
    %c0_112 = arith.constant 0 : index
    %c0_113 = arith.constant 0 : index
    %159 = vector.load %arg8[%c6_111, %c0_112, %c0_113] : memref<9x16x32xf32, #tpu.memory_space<vmem>>, vector<1x16x32xf32>
    %160 = vector.shape_cast %159 : vector<1x16x32xf32> to vector<16x32xf32>
    %cst_114 = arith.constant dense<0.000000e+00> : vector<16x32xf32>
    %161 = tpu.matmul %158, %160, %cst_114 {dimension_numbers = #tpu.dot_dimension_numbers<[1], [0], [0], [1], [0, 0, 1, 1], [], []>} : vector<16x16xf32>, vector<16x32xf32>, vector<16x32xf32> -> vector<16x32xf32>
    %162 = arith.addf %157, %161 : vector<16x32xf32>
    %c9_i32 = arith.constant 9 : i32
    %163 = tpu.dynamic_rotate %129 by %c9_i32 dim 0 : vector<16x16xf32>, i32 -> vector<16x16xf32>
    %c7_115 = arith.constant 7 : index
    %c0_116 = arith.constant 0 : index
    %c0_117 = arith.constant 0 : index
    %164 = vector.load %arg8[%c7_115, %c0_116, %c0_117] : memref<9x16x32xf32, #tpu.memory_space<vmem>>, vector<1x16x32xf32>
    %165 = vector.shape_cast %164 : vector<1x16x32xf32> to vector<16x32xf32>
    %cst_118 = arith.constant dense<0.000000e+00> : vector<16x32xf32>
    %166 = tpu.matmul %163, %165, %cst_118 {dimension_numbers = #tpu.dot_dimension_numbers<[1], [0], [0], [1], [0, 0, 1, 1], [], []>} : vector<16x16xf32>, vector<16x32xf32>, vector<16x32xf32> -> vector<16x32xf32>
    %167 = arith.addf %162, %166 : vector<16x32xf32>
    %c8_i32 = arith.constant 8 : i32
    %168 = tpu.dynamic_rotate %129 by %c8_i32 dim 0 : vector<16x16xf32>, i32 -> vector<16x16xf32>
    %c8_119 = arith.constant 8 : index
    %c0_120 = arith.constant 0 : index
    %c0_121 = arith.constant 0 : index
    %169 = vector.load %arg8[%c8_119, %c0_120, %c0_121] : memref<9x16x32xf32, #tpu.memory_space<vmem>>, vector<1x16x32xf32>
    %170 = vector.shape_cast %169 : vector<1x16x32xf32> to vector<16x32xf32>
    %cst_122 = arith.constant dense<0.000000e+00> : vector<16x32xf32>
    %171 = tpu.matmul %168, %170, %cst_122 {dimension_numbers = #tpu.dot_dimension_numbers<[1], [0], [0], [1], [0, 0, 1, 1], [], []>} : vector<16x16xf32>, vector<16x32xf32>, vector<16x32xf32> -> vector<16x32xf32>
    %172 = arith.addf %167, %171 : vector<16x32xf32>
    %c0_123 = arith.constant 0 : index
    %c0_124 = arith.constant 0 : index
    %173 = vector.load %arg9[%c0_123, %c0_124] : memref<1x32xf32, #tpu.memory_space<vmem>>, vector<1x32xf32>
    %174 = vector.broadcast %173 : vector<1x32xf32> to vector<16x32xf32>
    %175 = arith.addf %172, %174 : vector<16x32xf32>
    %cst_125 = arith.constant 0.000000e+00 : f32
    %176 = vector.broadcast %cst_125 : f32 to vector<16x32xf32>
    %177 = arith.minimumf %175, %176 : vector<16x32xf32>
    %cst_126 = arith.constant -1.000000e-03 : f32
    %178 = vector.broadcast %cst_126 : f32 to vector<16x32xf32>
    %179 = arith.cmpf ogt, %177, %178 : vector<16x32xf32>
    %cst_127 = arith.constant 5.000000e-01 : f32
    %180 = vector.broadcast %cst_127 : f32 to vector<16x32xf32>
    %181 = arith.mulf %180, %177 : vector<16x32xf32>
    %cst_128 = arith.constant 1.000000e+00 : f32
    %182 = vector.broadcast %cst_128 : f32 to vector<16x32xf32>
    %183 = arith.addf %182, %181 : vector<16x32xf32>
    %184 = arith.mulf %177, %183 : vector<16x32xf32>
    %185 = math.exp %177 : vector<16x32xf32>
    %cst_129 = arith.constant 1.000000e+00 : f32
    %186 = vector.broadcast %cst_129 : f32 to vector<16x32xf32>
    %187 = arith.subf %185, %186 : vector<16x32xf32>
    %188 = arith.select %179, %184, %187 : vector<16x32xi1>, vector<16x32xf32>
    %cst_130 = arith.constant 0.000000e+00 : f32
    %189 = vector.broadcast %cst_130 : f32 to vector<16x32xf32>
    %190 = arith.cmpf ogt, %175, %189 : vector<16x32xf32>
    %191 = arith.select %190, %175, %188 : vector<16x32xi1>, vector<16x32xf32>
    %c0_131 = arith.constant 0 : index
    %c0_132 = arith.constant 0 : index
    %192 = vector.load %arg10[%c0_131, %c0_132] : memref<4x16xf32, #tpu.memory_space<vmem>>, vector<4x16xf32>
    %cst_133 = arith.constant dense<0.000000e+00> : vector<4x32xf32>
    %193 = tpu.matmul %192, %191, %cst_133 {dimension_numbers = #tpu.dot_dimension_numbers<[1], [0], [0], [1], [0, 0, 1, 1], [], []>} : vector<4x16xf32>, vector<16x32xf32>, vector<4x32xf32> -> vector<4x32xf32>
    %c0_134 = arith.constant 0 : index
    %c0_135 = arith.constant 0 : index
    %194 = vector.load %arg12[%c0_134, %c0_135] : memref<1x8xf32, #tpu.memory_space<vmem>>, vector<1x8xf32>
    %195 = vector.extract_strided_slice %193 {offsets = [0, 0], sizes = [1, 32], strides = [1, 1]} : vector<4x32xf32> to vector<1x32xf32>
    %c0_136 = arith.constant 0 : index
    %c0_137 = arith.constant 0 : index
    %c0_138 = arith.constant 0 : index
    %196 = vector.load %arg11[%c0_136, %c0_137, %c0_138] : memref<4x32x8xf32, #tpu.memory_space<vmem>>, vector<1x32x8xf32>
    %197 = vector.shape_cast %196 : vector<1x32x8xf32> to vector<32x8xf32>
    %cst_139 = arith.constant dense<0.000000e+00> : vector<1x8xf32>
    %198 = tpu.matmul %195, %197, %cst_139 {dimension_numbers = #tpu.dot_dimension_numbers<[1], [0], [0], [1], [0, 0, 1, 1], [], []>} : vector<1x32xf32>, vector<32x8xf32>, vector<1x8xf32> -> vector<1x8xf32>
    %199 = arith.addf %194, %198 : vector<1x8xf32>
    %200 = vector.extract_strided_slice %193 {offsets = [1, 0], sizes = [1, 32], strides = [1, 1]} : vector<4x32xf32> to vector<1x32xf32>
    %c1_140 = arith.constant 1 : index
    %c0_141 = arith.constant 0 : index
    %c0_142 = arith.constant 0 : index
    %201 = vector.load %arg11[%c1_140, %c0_141, %c0_142] : memref<4x32x8xf32, #tpu.memory_space<vmem>>, vector<1x32x8xf32>
    %202 = vector.shape_cast %201 : vector<1x32x8xf32> to vector<32x8xf32>
    %cst_143 = arith.constant dense<0.000000e+00> : vector<1x8xf32>
    %203 = tpu.matmul %200, %202, %cst_143 {dimension_numbers = #tpu.dot_dimension_numbers<[1], [0], [0], [1], [0, 0, 1, 1], [], []>} : vector<1x32xf32>, vector<32x8xf32>, vector<1x8xf32> -> vector<1x8xf32>
    %204 = arith.addf %199, %203 : vector<1x8xf32>
    %205 = vector.extract_strided_slice %193 {offsets = [2, 0], sizes = [1, 32], strides = [1, 1]} : vector<4x32xf32> to vector<1x32xf32>
    %c2_144 = arith.constant 2 : index
    %c0_145 = arith.constant 0 : index
    %c0_146 = arith.constant 0 : index
    %206 = vector.load %arg11[%c2_144, %c0_145, %c0_146] : memref<4x32x8xf32, #tpu.memory_space<vmem>>, vector<1x32x8xf32>
    %207 = vector.shape_cast %206 : vector<1x32x8xf32> to vector<32x8xf32>
    %cst_147 = arith.constant dense<0.000000e+00> : vector<1x8xf32>
    %208 = tpu.matmul %205, %207, %cst_147 {dimension_numbers = #tpu.dot_dimension_numbers<[1], [0], [0], [1], [0, 0, 1, 1], [], []>} : vector<1x32xf32>, vector<32x8xf32>, vector<1x8xf32> -> vector<1x8xf32>
    %209 = arith.addf %204, %208 : vector<1x8xf32>
    %210 = vector.extract_strided_slice %193 {offsets = [3, 0], sizes = [1, 32], strides = [1, 1]} : vector<4x32xf32> to vector<1x32xf32>
    %c3_148 = arith.constant 3 : index
    %c0_149 = arith.constant 0 : index
    %c0_150 = arith.constant 0 : index
    %211 = vector.load %arg11[%c3_148, %c0_149, %c0_150] : memref<4x32x8xf32, #tpu.memory_space<vmem>>, vector<1x32x8xf32>
    %212 = vector.shape_cast %211 : vector<1x32x8xf32> to vector<32x8xf32>
    %cst_151 = arith.constant dense<0.000000e+00> : vector<1x8xf32>
    %213 = tpu.matmul %210, %212, %cst_151 {dimension_numbers = #tpu.dot_dimension_numbers<[1], [0], [0], [1], [0, 0, 1, 1], [], []>} : vector<1x32xf32>, vector<32x8xf32>, vector<1x8xf32> -> vector<1x8xf32>
    %214 = arith.addf %209, %213 : vector<1x8xf32>
    %c0_152 = arith.constant 0 : index
    %c0_153 = arith.constant 0 : index
    %c0_154 = arith.constant 0 : index
    %215 = vector.load %arg13[%c0_152, %c0_153, %c0_154] : memref<1x1x8xf32, #tpu.memory_space<vmem>>, vector<1x1x8xf32>
    %216 = vector.shape_cast %215 : vector<1x1x8xf32> to vector<1x8xf32>
    %217 = vector.shape_cast %214 : vector<1x8xf32> to vector<1x1x8xf32>
    tpu.vector_store %arg13[%c0_152, %c0_153, %c0_154], %217 {strides = array<i32>} : memref<1x1x8xf32, #tpu.memory_space<vmem>>, vector<1x1x8xf32>,
    return
  }
  func.func @transform_0(%arg0: i32) -> (i32, i32, i32) {
    %c0_i32 = arith.constant 0 : i32
    %c0_i32_0 = arith.constant 0 : i32
    %c0_i32_1 = arith.constant 0 : i32
    return %arg0, %c0_i32, %c0_i32_0 : i32, i32, i32
  }
  func.func @transform_1(%arg0: i32) -> (i32, i32, i32) {
    %c0_i32 = arith.constant 0 : i32
    %c0_i32_0 = arith.constant 0 : i32
    %c0_i32_1 = arith.constant 0 : i32
    %c0_i32_2 = arith.constant 0 : i32
    return %c0_i32, %c0_i32_0, %c0_i32_1 : i32, i32, i32
  }
  func.func @transform_2(%arg0: i32) -> (i32, i32) {
    %c0_i32 = arith.constant 0 : i32
    %c0_i32_0 = arith.constant 0 : i32
    %c0_i32_1 = arith.constant 0 : i32
    return %c0_i32, %c0_i32_0 : i32, i32
  }
  func.func @transform_3(%arg0: i32) -> (i32, i32) {
    %c0_i32 = arith.constant 0 : i32
    %c0_i32_0 = arith.constant 0 : i32
    %c0_i32_1 = arith.constant 0 : i32
    return %c0_i32, %c0_i32_0 : i32, i32
  }
  func.func @transform_4(%arg0: i32) -> (i32, i32, i32) {
    %c0_i32 = arith.constant 0 : i32
    %c0_i32_0 = arith.constant 0 : i32
    %c0_i32_1 = arith.constant 0 : i32
    %c0_i32_2 = arith.constant 0 : i32
    return %c0_i32, %c0_i32_0, %c0_i32_1 : i32, i32, i32
  }
  func.func @transform_5(%arg0: i32) -> (i32, i32) {
    %c0_i32 = arith.constant 0 : i32
    %c0_i32_0 = arith.constant 0 : i32
    %c0_i32_1 = arith.constant 0 : i32
    return %c0_i32, %c0_i32_0 : i32, i32
  }
  func.func @transform_6(%arg0: i32) -> (i32, i32) {
    %c0_i32 = arith.constant 0 : i32
    %c0_i32_0 = arith.constant 0 : i32
    %c0_i32_1 = arith.constant 0 : i32
    return %c0_i32, %c0_i32_0 : i32, i32
  }
  func.func @transform_7(%arg0: i32) -> (i32, i32, i32) {
    %c0_i32 = arith.constant 0 : i32
    %c0_i32_0 = arith.constant 0 : i32
    %c0_i32_1 = arith.constant 0 : i32
    %c0_i32_2 = arith.constant 0 : i32
    return %c0_i32, %c0_i32_0, %c0_i32_1 : i32, i32, i32
  }
  func.func @transform_8(%arg0: i32) -> (i32, i32) {
    %c0_i32 = arith.constant 0 : i32
    %c0_i32_0 = arith.constant 0 : i32
    %c0_i32_1 = arith.constant 0 : i32
    return %c0_i32, %c0_i32_0 : i32, i32
  }
  func.func @transform_9(%arg0: i32) -> (i32, i32) {
    %c0_i32 = arith.constant 0 : i32
    %c0_i32_0 = arith.constant 0 : i32
    %c0_i32_1 = arith.constant 0 : i32
    return %c0_i32, %c0_i32_0 : i32, i32
  }
  func.func @transform_10(%arg0: i32) -> (i32, i32, i32) {
    %c0_i32 = arith.constant 0 : i32
    %c0_i32_0 = arith.constant 0 : i32
    %c0_i32_1 = arith.constant 0 : i32
    %c0_i32_2 = arith.constant 0 : i32
    return %c0_i32, %c0_i32_0, %c0_i32_1 : i32, i32, i32
  }
  func.func @transform_11(%arg0: i32) -> (i32, i32) {
    %c0_i32 = arith.constant 0 : i32
    %c0_i32_0 = arith.constant 0 : i32
    %c0_i32_1 = arith.constant 0 : i32
    return %c0_i32, %c0_i32_0 : i32, i32
  }
  func.func @transform_12(%arg0: i32) -> (i32, i32, i32) {
    %c0_i32 = arith.constant 0 : i32
    %c0_i32_0 = arith.constant 0 : i32
    %c0_i32_1 = arith.constant 0 : i32
    return %arg0, %c0_i32, %c0_i32_0 : i32, i32, i32
  }
}

</mosaic_0001>

<bundles_post_ra>
// kernel: tpu_custom_call.1
= control target key start
LH: loop header
LB: loop body
LE: loop exit
PB: predicated region body
PF: predicated region fallthrough
CT: control target
= control target key end

     0   :  { %s12655_s0 = inlined_call_operand.vmem [shape: f32[2,256,3], index: 0, kind: input, shape index: {}]   ;;  %s12656_s1 = inlined_call_operand.vmem [shape: f32[9,3,16], index: 1, kind: input, shape index: {}]   ;;  %s12657_s2 = inlined_call_operand.vmem [shape: f32[1,16], index: 2, kind: input, shape index: {}]   ;;  %s12658_s3 = inlined_call_operand.vmem [shape: f32[64,256], index: 3, kind: input, shape index: {}]   ;;  %s12659_s4 = inlined_call_operand.vmem [shape: f32[9,16,16], index: 4, kind: input, shape index: {}]   ;;  %s12660_s5 = inlined_call_operand.vmem [shape: f32[1,16], index: 5, kind: input, shape index: {}]   ;;  %s12661_s6 = inlined_call_operand.vmem [shape: f32[16,64], index: 6, kind: input, shape index: {}]   ;;  %s12662_s7 = inlined_call_operand.vmem [shape: f32[9,16,32], index: 7, kind: input, shape index: {}]   ;;  %s12663_s8 = inlined_call_operand.vmem [shape: f32[1,32], index: 8, kind: input, shape index: {}]   ;;  %s12664_s9 = inlined_call_operand.vmem [shape: f32[4,16], index: 9, kind: input, shape index: {}]   ;;  %s12665_s10 = inlined_call_operand.vmem [shape: f32[4,32,8], index: 10, kind: input, shape index: {}]   ;;  %s12666_s11 = inlined_call_operand.vmem [shape: f32[1,8], index: 11, kind: input, shape index: {}]   ;;  %s12667_s12 = inlined_call_operand.hbm [shape: f32[2,1,8], index: 12, kind: output, shape index: {}]  }
   0x1   :  { %12726 = sst [smem:[#allocation45_spill]] %s12655_s0 }
   0x2   :  { %12727 = sst [smem:[#allocation46_spill]] %s12656_s1 }
   0x3   :  { %12728 = sst [smem:[#allocation47_spill]] %s12657_s2 }
   0x4   :  { %17 = vsyncpa [#allocation3], 0 }
   0x5   :  { %19 = vsyncpa [#allocation3 + $0x1], 0  ;;  %s9304_s21 = smov 0   ;;  %s9306_s22 = smov 0  }
   0x6   :  { %s9308_s23 = smov 0   ;;  %s9310_s24 = smov 0  }
   0x7 LB: > { %s9325_s25 = sadd.s32 4294967295, %s9234_s24   ;;  %s7277_s26 = sadd.s32 4294967294, %s9234_s24   ;;  %s9234_s24 = sphi %s9310_s24, %s12986_s24   ;;  %s9230_s23 = sphi %s9308_s23, %s12985_s23   ;;  %s9226_s22 = sphi %s9306_s22, %s12984_s22   ;;  %s9222_s21 = sphi %s9304_s21, %s12983_s21  }
   0x8   : > { %s9329_s27 = sadd.s32 1, %s9234_s24   ;;  %s289_s28 = sadd.s32 1, %s9230_s23 }
   0x9   : > { %s286_s29 = ssub.s32 %s9234_s24, %s9329_s27  ;;  %p299_p0 = scmp.ne.s32.totalorder %s9230_s23, %s9226_s22 }
   0xa   : > { %p287_p1 = scmp.eq.s32.totalorder %s286_s29, 0  ;;  %p300_p2 = scmp.eq.s32.totalorder %s9325_s25, 1 }
   0xb   : > { %p305_p3 = scmp.ne.s32.totalorder %s9226_s22, %s9222_s21  ;;  %p306_p4 = scmp.eq.s32.totalorder %s7277_s26, 1 }
   0xc   : > { %s9340_s30 = scalar_select %p287_p1, %s9230_s23, %s289_s28  }
   0xd   : > { %p9342_p5 = por %p300_p2, %p299_p0  ;;  %p9346_p6 = por %p306_p4, %p305_p3 }
   0xe   : > { %p7280_p7 = scmp.ge.s32.totalorder %s9234_s24, 1  ;;  %p365_p8 = scmp.lt.s32.totalorder %s9234_s24, 3 }
  0x10   : > { %p366_p9 = pnand %p7280_p7, %p365_p8 }
  0x12   : > { %369 = sbr.rel (%p366_p9) target bundleno = 1998 (0x7ce), region = 68 }
  0x17   : > { %s12731_s1 = sld [smem:[#allocation46_spill]]  ;;  %vm610_vm0 = vcmask 1042432   ;;  %p406_p10 = scmp.lt.s32.totalorder %s9325_s25, 1  ;;  %v476_v2 = vlaneseq  ;;  %vm513_vm1 = vcmask 23552  }
  0x18   : > { %s12733_s0 = sld [smem:[#allocation45_spill]]  ;;  %s404_s26 = sand.u32 1, %s9226_s22  }
  0x19   : > { %s407_s29 = scalar_select %p406_p10, %s9325_s25, 1  ;;  %v9369_v5 = vshrl.u32 %v476_v2, 7 }
  0x1a   : > { %s12833_s2 = sld [smem:[#allocation47_spill]]  ;;  %s7774_s28 = sshll.u32 %s9325_s25, 4 }
  0x1b   : > { %12732 = vst [vmem:[#allocation5_spill] sm:$0xff] %v9369_v5  ;;  %s7777_s15 = sshll.u32 %s407_s29, 8  ;;  %vm12724_vm2 = vcmp.lt.s32.totalorder %v9369_v5, 7  ;;  %vm12720_vm3 = vcmp.lt.s32.totalorder %v9369_v5, 5  ;;  %vm12723_vm4 = vcmp.lt.s32.totalorder %v9369_v5, 6  ;;  %vm12718_vm5 = vcmp.lt.s32.totalorder %v9369_v5, 3 }
  0x1c   : > { %vm12721_vm6 = vcmp.lt.s32.totalorder %v9369_v5, 4  ;;  %vm12722_vm7 = vcmp.lt.s32.totalorder %v9369_v5, 1  ;;  %vm12719_vm8 = vcmp.lt.s32.totalorder %v9369_v5, 2  ;;  %s405_s29 = scalar_lea.vmem [#allocation2], %s404_s26  ;;  %s7210_s19 = scalar_lea.sflag [#allocation3], %s404_s26 }
  0x1d   : > { %v7283_v0 = vld [vmem:[%s12731_s1 + $0x4] sm:$0x7]  ;;  %v443_v1 = vld [vmem:[%s12731_s1] sm:$0x7]  ;;  %v7350_v3 = vld [vmem:[%s12731_s1 + $0x8] sm:$0x7] }
  0x1e   : > { %8290 = vmatprep.subr.msk.mxu0 %vm610_vm0, %v7283_v0  ;;  %8340 = vmatprep.subr.msk.mxu1 %vm610_vm0, %v443_v1  ;;  %v7384_v4 = vld [vmem:[%s12731_s1 + $0xc] sm:$0x7]  ;;  %s9377_s18 = scalar_lea.vmem %s12733_s0, %s7777_s15  ;;  %v9430_v23 = vld [vmem:[%s12731_s1 + $0x10] sm:$0x7]  ;;  %v9470_v35 = vld [vmem:[%s12731_s1 + $0x14] sm:$0x7]  ;;  %s7220_s0 = scalar_lea.hbm %s12667_s12, %s7774_s28 }
  0x1f   : > { %8291 = vmatpush3.msk.msra.mxu0 %vm610_vm0, %v7283_v0  ;;  %8341 = vmatpush3.msk.msra.mxu1 %vm610_vm0, %v443_v1  ;;  %v9380_v6 = vld [vmem:[%s9377_s18] sm:$0xff]  ;;  %v9383_v7 = vld [vmem:[%s9377_s18 + $0x8] sm:$0xff]  ;;  %v9387_v8 = vld [vmem:[%s9377_s18 + $0x10] sm:$0xff]  ;;  %s7222_s15 = sshll.u32 %s405_s29, 4  ;;  %s9238_s25 = smov [#allocation2]   ;;  %s7223_s15 = int_to_ptr.vmem [resolvable:$true] %s7222_s15 }
  0x20   : > { %8390 = vmatprep.subr.msk.mxu0 %vm610_vm0, %v7350_v3  ;;  %8440 = vmatprep.subr.msk.mxu1 %vm610_vm0, %v7384_v4  ;;  %v444_v9 = vrot.slane %v9380_v6, 1  ;;  %v445_v10 = vrot.slane %v9383_v7, 1  ;;  %v446_v11 = vrot.slane %v9387_v8, 1  ;;  %v9395_v12 = vld [vmem:[%s9377_s18 + $0x18] sm:$0xff]  ;;  %v9398_v13 = vld [vmem:[%s9377_s18 + $0x20] sm:$0xff]  ;;  %v9401_v14 = vld [vmem:[%s9377_s18 + $0x28] sm:$0xff] }
  0x21   : > { %8342 = vmatprep.mubr.msk.f32.mxu1 %vm513_vm1, %v9380_v6  ;;  %v447_v15 = vrot.slane %v9395_v12, 1  ;;  %v448_v16 = vrot.slane %v9398_v13, 1  ;;  %v449_v19 = vrot.slane %v9401_v14, 1  ;;  %v9417_v20 = vld [vmem:[%s9377_s18 + $0x30] sm:$0xff]  ;;  %v9424_v22 = vld [vmem:[%s9377_s18 + $0x38] sm:$0xff]  ;;  %v9444_v28 = vld [vmem:[%s9377_s18 + $0x40] sm:$0xff] }
  0x22   : > { %8343 = vmatmul.mubr.msk.f32.vlgmr.msra.gmra.mxu1 %vm513_vm1, %v9383_v7  ;;  %v509_v17 = vsel %vm12724_vm2, %v444_v9, %v445_v10  ;;  %v508_v18 = vsel %vm12724_vm2, %v445_v10, %v446_v11  ;;  %v450_v25 = vrot.slane %v9417_v20, 1  ;;  %v451_v27 = vrot.slane %v9424_v22, 1  ;;  %v9448_v29 = vld [vmem:[%s9377_s18 + $0x48] sm:$0xff]  ;;  %v9465_v34 = vld [vmem:[%s9377_s18 + $0x50] sm:$0xff]  ;;  %v9473_v36 = vld [vmem:[%s9377_s18 + $0x58] sm:$0xff]  ;;  %s9174_s20 = scalar_lea.vmem %s7223_s15, 16 }
  0x23   : > { %8345 = vmatprep.mubr.msk.f32.mxu1 %vm513_vm1, %v9387_v8  ;;  %8441 = vmatpush3.msk.msra.mxu1 %vm610_vm0, %v7384_v4  ;;  %v507_v21 = vsel %vm12724_vm2, %v446_v11, %v447_v15  ;;  %v506_v24 = vsel %vm12724_vm2, %v447_v15, %v448_v16  ;;  %v505_v26 = vsel %vm12724_vm2, %v448_v16, %v449_v19  ;;  %v452_v31 = vrot.slane %v9444_v28, 1  ;;  %v9490_v41 = vld [vmem:[%s9377_s18 + $0x60] sm:$0xff]  ;;  %v9493_v42 = vld [vmem:[%s9377_s18 + $0x68] sm:$0xff]  ;;  %v9508_v47 = vld [vmem:[%s9377_s18 + $0x70] sm:$0xff]  ;;  %p9175_p11 = scmp.ne.s32.totalorder %s7223_s15, %s9174_s20 }
  0x24   : > { %8292 = vmatprep.mubr.msk.f32.mxu0 %vm513_vm1, %v509_v17  ;;  %v504_v30 = vsel %vm12724_vm2, %v449_v19, %v450_v25  ;;  %v503_v32 = vsel %vm12724_vm2, %v450_v25, %v451_v27  ;;  %v453_v33 = vrot.slane %v9448_v29, 1  ;;  %8540 = vmatprep.subr.msk.mxu1 %vm610_vm0, %v9470_v35  ;;  %v454_v38 = vrot.slane %v9465_v34, 1  ;;  %v9511_v48 = vld [vmem:[%s9377_s18 + $0x78] sm:$0xff]  ;;  %v9526_v53 = vld [vmem:[%s9377_s18 + $0x80] sm:$0xff]  ;;  %v9529_v54 = vld [vmem:[%s9377_s18 + $0x88] sm:$0xff] }
  0x25   : > { %8293 = vmatmul.mubr.msk.f32.vlgmr.msra.gmra.mxu0 %vm513_vm1, %v508_v18  ;;  %v502_v37 = vsel %vm12724_vm2, %v451_v27, %v452_v31  ;;  %v455_v40 = vrot.slane %v9473_v36, 1  ;;  %v456_v44 = vrot.slane %v9490_v41, 1  ;;  %v457_v46 = vrot.slane %v9493_v42, 1  ;;  %v9544_v59 = vld [vmem:[%s9377_s18 + $0x90] sm:$0xff]  ;;  %v9547_v60 = vld [vmem:[%s9377_s18 + $0x98] sm:$0xff]  ;;  %v9562_v1 = vld [vmem:[%s9377_s18 + $0xa0] sm:$0xff]  ;;  %p9176_p12 = pnand %p9175_p11, %p9342_p5 }
  0x26   : > { %8295 = vmatprep.mubr.msk.f32.mxu0 %vm513_vm1, %v507_v21  ;;  %8346 = vmatmul.mubr.msk.f32.gmra.mxu1 %vm513_vm1, %v9395_v12  ;;  %v501_v39 = vsel %vm12724_vm2, %v452_v31, %v453_v33  ;;  %v500_v43 = vsel %vm12724_vm2, %v453_v33, %v454_v38  ;;  %v458_v50 = vrot.slane %v9508_v47, 1  ;;  %v459_v52 = vrot.slane %v9511_v48, 1  ;;  %v9565_v2 = vld [vmem:[%s9377_s18 + $0xa8] sm:$0xff]  ;;  %v9580_v15 = vld [vmem:[%s9377_s18 + $0xb0] sm:$0xff]  ;;  %v9583_v16 = vld [vmem:[%s9377_s18 + $0xb8] sm:$0xff] }
  0x27   : > { %8348 = vmatprep.mubr.msk.f32.mxu1 %vm513_vm1, %v9398_v13  ;;  %8391 = vmatpush3.msk.msra.mxu0 %vm610_vm0, %v7350_v3  ;;  %v499_v45 = vsel %vm12724_vm2, %v454_v38, %v455_v40  ;;  %v498_v49 = vsel %vm12724_vm2, %v455_v40, %v456_v44  ;;  %v497_v51 = vsel %vm12724_vm2, %v456_v44, %v457_v46  ;;  %v460_v56 = vrot.slane %v9526_v53, 1  ;;  %v9601_v25 = vld [vmem:[%s9377_s18 + $0xc8] sm:$0xff]  ;;  %v9619_v33 = vld [vmem:[%s9377_s18 + $0xd8] sm:$0xff]  ;;  %p9177_p13 = pneg %p9176_p12 }
  0x28   : > { %8490 = vmatprep.subr.msk.mxu0 %vm610_vm0, %v9430_v23  ;;  %v496_v55 = vsel %vm12724_vm2, %v457_v46, %v458_v50  ;;  %v495_v57 = vsel %vm12724_vm2, %v458_v50, %v459_v52  ;;  %v461_v58 = vrot.slane %v9529_v54, 1  ;;  %v462_v62 = vrot.slane %v9544_v59, 1  ;;  %v9637_v44 = vld [vmem:[%s9377_s18 + $0xe8] sm:$0xff] }
  0x29   : > { %8296 = vmatmul.mubr.msk.f32.gmra.mxu0 %vm513_vm1, %v506_v24  ;;  %v494_v61 = vsel %vm12724_vm2, %v459_v52, %v460_v56  ;;  %v463_v0 = vrot.slane %v9547_v60, 1  ;;  %v464_v4 = vrot.slane %v9562_v1, 1  ;;  %v465_v11 = vrot.slane %v9565_v2, 1  ;;  %v9598_v24 = vld [vmem:[%s9377_s18 + $0xc0] sm:$0xff]  ;;  %v9655_v52 = vld [vmem:[%s9377_s18 + $0xf8] sm:$0xff] }
  0x2a   : > { %8298 = vmatprep.mubr.msk.f32.mxu0 %vm513_vm1, %v505_v26  ;;  %8349 = vmatmul.mubr.msk.f32.gmra.mxu1 %vm513_vm1, %v9401_v14  ;;  %v493_v63 = vsel %vm12724_vm2, %v460_v56, %v461_v58  ;;  %v492_v3 = vsel %vm12724_vm2, %v461_v58, %v462_v62  ;;  %v466_v18 = vrot.slane %v9580_v15, 1  ;;  %v467_v21 = vrot.slane %v9583_v16, 1 }
  0x2b   : > { %8351 = vmatprep.mubr.msk.f32.mxu1 %vm513_vm1, %v9417_v20  ;;  %v491_v10 = vsel %vm12724_vm2, %v462_v62, %v463_v0  ;;  %v490_v17 = vsel %vm12724_vm2, %v463_v0, %v464_v4  ;;  %v489_v19 = vsel %vm12724_vm2, %v464_v4, %v465_v11  ;;  %v468_v27 = vrot.slane %v9598_v24, 1 }
  0x2c   : > { %v488_v26 = vsel %vm12724_vm2, %v465_v11, %v466_v18  ;;  %v469_v31 = vrot.slane %v9601_v25, 1  ;;  %v471_v40 = vrot.slane %v9619_v33, 1  ;;  %v473_v50 = vrot.slane %v9637_v44, 1 }
  0x2d   : > { %8299 = vmatmul.mubr.msk.f32.gmra.mxu0 %vm513_vm1, %v504_v30  ;;  %v487_v30 = vsel %vm12724_vm2, %v466_v18, %v467_v21  ;;  %v475_v58 = vrot.slane %v9655_v52, 1  ;;  %v1587_v62 = vrot.slane %v9383_v7, 3  ;;  %v1164_v4 = vrot.slane %v9383_v7, 2 }
  0x2e   : > { %8301 = vmatprep.mubr.msk.f32.mxu0 %vm513_vm1, %v503_v32  ;;  %8352 = vmatmul.mubr.msk.f32.gmra.mxu1 %vm513_vm1, %v9424_v22  ;;  %v9616_v32 = vld [vmem:[%s9377_s18 + $0xd0] sm:$0xff] }
  0x2f   : > { %8354 = vmatprep.mubr.msk.f32.mxu1 %vm513_vm1, %v9444_v28  ;;  %v470_v38 = vrot.slane %v9616_v32, 1  ;;  %v510_v18 = vsel %vm12724_vm2, %v475_v58, %v444_v9 }
  0x31   : > { %8302 = vmatmul.mubr.msk.f32.gmra.mxu0 %vm513_vm1, %v502_v37  ;;  %v486_v37 = vsel %vm12724_vm2, %v467_v21, %v468_v27 }
  0x32   : > { %8304 = vmatprep.mubr.msk.f32.mxu0 %vm513_vm1, %v501_v39  ;;  %8355 = vmatmul.mubr.msk.f32.gmra.mxu1 %vm513_vm1, %v9448_v29  ;;  %v485_v39 = vsel %vm12724_vm2, %v468_v27, %v469_v31  ;;  %v1166_v27 = vrot.slane %v9395_v12, 2 }
  0x33   : > { %8357 = vmatprep.mubr.msk.f32.mxu1 %vm513_vm1, %v9465_v34 }
  0x35   : > { %8305 = vmatmul.mubr.msk.f32.gmra.mxu0 %vm513_vm1, %v500_v43  ;;  %v9634_v43 = vld [vmem:[%s9377_s18 + $0xe0] sm:$0xff] }
  0x36   : > { %8307 = vmatprep.mubr.msk.f32.mxu0 %vm513_vm1, %v499_v45  ;;  %8358 = vmatmul.mubr.msk.f32.gmra.mxu1 %vm513_vm1, %v9473_v36  ;;  %v484_v45 = vsel %vm12724_vm2, %v469_v31, %v470_v38  ;;  %v472_v46 = vrot.slane %v9634_v43, 1  ;;  %v1591_v31 = vrot.slane %v9401_v14, 3 }
  0x37   : > { %8360 = vmatprep.mubr.msk.f32.mxu1 %vm513_vm1, %v9490_v41 }
  0x39   : > { %8308 = vmatmul.mubr.msk.f32.gmra.mxu0 %vm513_vm1, %v498_v49  ;;  %v483_v49 = vsel %vm12724_vm2, %v470_v38, %v471_v40  ;;  %v1167_v38 = vrot.slane %v9398_v13, 2 }
  0x3a   : > { %8310 = vmatprep.mubr.msk.f32.mxu0 %vm513_vm1, %v497_v51  ;;  %8361 = vmatmul.mubr.msk.f32.gmra.mxu1 %vm513_vm1, %v9493_v42  ;;  %v9652_v51 = vld [vmem:[%s9377_s18 + $0xf0] sm:$0xff] }
  0x3b   : > { %8363 = vmatprep.mubr.msk.f32.mxu1 %vm513_vm1, %v9508_v47  ;;  %v474_v56 = vrot.slane %v9652_v51, 1 }
  0x3d   : > { %8311 = vmatmul.mubr.msk.f32.gmra.mxu0 %vm513_vm1, %v496_v55  ;;  %v482_v55 = vsel %vm12724_vm2, %v471_v40, %v472_v46  ;;  %v479_v0 = vsel %vm12724_vm2, %v474_v56, %v475_v58 }
  0x3e   : > { %8313 = vmatprep.mubr.msk.f32.mxu0 %vm513_vm1, %v495_v57  ;;  %8364 = vmatmul.mubr.msk.f32.gmra.mxu1 %vm513_vm1, %v9511_v48  ;;  %v481_v57 = vsel %vm12724_vm2, %v472_v46, %v473_v50  ;;  %v1592_v46 = vrot.slane %v9417_v20, 3 }
  0x3f   : > { %8366 = vmatprep.mubr.msk.f32.mxu1 %vm513_vm1, %v9526_v53 }
  0x41   : > { %8314 = vmatmul.mubr.msk.f32.gmra.mxu0 %vm513_vm1, %v494_v61  ;;  %v1586_v61 = vrot.slane %v9380_v6, 3 }
  0x42   : > { %8316 = vmatprep.mubr.msk.f32.mxu0 %vm513_vm1, %v493_v63  ;;  %8367 = vmatmul.mubr.msk.f32.gmra.mxu1 %vm513_vm1, %v9529_v54  ;;  %v480_v63 = vsel %vm12724_vm2, %v473_v50, %v474_v56  ;;  %v1593_v50 = vrot.slane %v9424_v22, 3  ;;  %v9739_v56 = vld [vmem:[%s12731_s1 + $0x18] sm:$0x7] }
  0x43   : > { %8369 = vmatprep.mubr.msk.f32.mxu1 %vm513_vm1, %v9544_v59  ;;  %v1649_v11 = vsel %vm12720_vm3, %v1586_v61, %v1587_v62 }
  0x45   : > { %8317 = vmatmul.mubr.msk.f32.gmra.mxu0 %vm513_vm1, %v492_v3  ;;  %v1163_v3 = vrot.slane %v9380_v6, 2 }
  0x46   : > { %8319 = vmatprep.mubr.msk.f32.mxu0 %vm513_vm1, %v491_v10  ;;  %8370 = vmatmul.mubr.msk.f32.gmra.mxu1 %vm513_vm1, %v9547_v60  ;;  %v1588_v10 = vrot.slane %v9387_v8, 3 }
  0x47   : > { %8372 = vmatprep.mubr.msk.f32.mxu1 %vm513_vm1, %v9562_v1  ;;  %v1226_v21 = vsel %vm12723_vm4, %v1163_v3, %v1164_v4 }
  0x49   : > { %8320 = vmatmul.mubr.msk.f32.gmra.mxu0 %vm513_vm1, %v490_v17  ;;  %v1589_v17 = vrot.slane %v9395_v12, 3 }
  0x4a   : > { %8322 = vmatprep.mubr.msk.f32.mxu0 %vm513_vm1, %v489_v19  ;;  %8373 = vmatmul.mubr.msk.f32.gmra.mxu1 %vm513_vm1, %v9565_v2  ;;  %v1165_v19 = vrot.slane %v9387_v8, 2 }
  0x4b   : > { %8375 = vmatprep.mubr.msk.f32.mxu1 %vm513_vm1, %v9580_v15  ;;  %v1647_v9 = vsel %vm12720_vm3, %v1588_v10, %v1589_v17 }
  0x4d   : > { %8323 = vmatmul.mubr.msk.f32.gmra.mxu0 %vm513_vm1, %v488_v26  ;;  %v1648_v26 = vsel %vm12720_vm3, %v1587_v62, %v1588_v10  ;;  %v1644_v62 = vsel %vm12720_vm3, %v1591_v31, %v1592_v46  ;;  %v1595_v10 = vrot.slane %v9448_v29, 3 }
  0x4e   : > { %8325 = vmatprep.mubr.msk.f32.mxu0 %vm513_vm1, %v487_v30  ;;  %8376 = vmatmul.mubr.msk.f32.gmra.mxu1 %vm513_vm1, %v9583_v16  ;;  %v1590_v30 = vrot.slane %v9398_v13, 3 }
  0x4f   : > { %8378 = vmatprep.mubr.msk.f32.mxu1 %vm513_vm1, %v9598_v24 }
  0x50   : > { %v1646_v40 = vsel %vm12720_vm3, %v1589_v17, %v1590_v30  ;;  %v1171_v17 = vrot.slane %v9444_v28, 2 }
  0x51   : > { %8326 = vmatmul.mubr.msk.f32.gmra.mxu0 %vm513_vm1, %v486_v37  ;;  %v1225_v37 = vsel %vm12723_vm4, %v1164_v4, %v1165_v19  ;;  %v1643_v4 = vsel %vm12720_vm3, %v1592_v46, %v1593_v50 }
  0x52   : > { %8328 = vmatprep.mubr.msk.f32.mxu0 %vm513_vm1, %v485_v39  ;;  %8379 = vmatmul.mubr.msk.f32.gmra.mxu1 %vm513_vm1, %v9601_v25  ;;  %v1224_v39 = vsel %vm12723_vm4, %v1165_v19, %v1166_v27  ;;  %v1172_v19 = vrot.slane %v9448_v29, 2 }
  0x53   : > { %8381 = vmatprep.mubr.msk.f32.mxu1 %vm513_vm1, %v9616_v32 }
  0x55   : > { %8329 = vmatmul.mubr.msk.f32.gmra.mxu0 %vm513_vm1, %v484_v45  ;;  %v1168_v45 = vrot.slane %v9401_v14, 2 }
  0x56   : > { %8331 = vmatprep.mubr.msk.f32.mxu0 %vm513_vm1, %v483_v49  ;;  %8382 = vmatmul.mubr.msk.f32.gmra.mxu1 %vm513_vm1, %v9619_v33  ;;  %v1645_v49 = vsel %vm12720_vm3, %v1590_v30, %v1591_v31  ;;  %v1218_v31 = vsel %vm12723_vm4, %v1171_v17, %v1172_v19 }
  0x57   : > { %8384 = vmatprep.mubr.msk.f32.mxu1 %vm513_vm1, %v9634_v43  ;;  %v1222_v58 = vsel %vm12723_vm4, %v1167_v38, %v1168_v45 }
  0x59   : > { %8332 = vmatmul.mubr.msk.f32.gmra.mxu0 %vm513_vm1, %v482_v55  ;;  %v9733_v55 = vld [vmem:[%s12731_s1 + $0x1c] sm:$0x7] }
  0x5a   : > { %8334 = vmatprep.mubr.msk.f32.mxu0 %vm513_vm1, %v481_v57  ;;  %8385 = vmatmul.mubr.msk.f32.gmra.mxu1 %vm513_vm1, %v9637_v44  ;;  %v1169_v57 = vrot.slane %v9417_v20, 2 }
  0x5b   : > { %8387 = vmatprep.mubr.msk.f32.mxu1 %vm513_vm1, %v9652_v51 }
  0x5d   : > { %8335 = vmatmul.mubr.msk.f32.gmra.mxu0 %vm513_vm1, %v480_v63  ;;  %v1170_v63 = vrot.slane %v9424_v22, 2 }
  0x5e   : > { %8337 = vmatprep.mubr.msk.f32.mxu0 %vm513_vm1, %v479_v0  ;;  %8388 = vmatmul.mubr.msk.f32.gmra.mxu1 %vm513_vm1, %v9655_v52  ;;  %v1594_v0 = vrot.slane %v9444_v28, 3 }
  0x5f   : > { %8442 = vmatprep.mubr.msk.f32.mxu1 %vm513_vm1, %v1649_v11  ;;  %v1221_v11 = vsel %vm12723_vm4, %v1168_v45, %v1169_v57  ;;  %v1219_v30 = vsel %vm12723_vm4, %v1170_v63, %v1171_v17  ;;  %v1599_v45 = vrot.slane %v9493_v42, 3  ;;  %v1178_v17 = vrot.slane %v9511_v48, 2 }
  0x61   : > { %8338 = vmatmul.mubr.msk.f32.gmra.mxu0 %vm513_vm1, %v510_v18  ;;  %v1642_v18 = vsel %vm12720_vm3, %v1593_v50, %v1594_v0 }
  0x62   : > { %8392 = vmatprep.mubr.msk.f32.mxu0 %vm513_vm1, %v1226_v21  ;;  %8443 = vmatmul.mubr.msk.f32.vlgmr.msra.gmra.mxu1 %vm513_vm1, %v1648_v26  ;;  %v1596_v21 = vrot.slane %v9465_v34, 3  ;;  %v1641_v26 = vsel %vm12720_vm3, %v1594_v0, %v1595_v10 }
  0x63   : > { %8445 = vmatprep.mubr.msk.f32.mxu1 %vm513_vm1, %v1647_v9  ;;  %8541 = vmatpush3.msk.msra.mxu1 %vm610_vm0, %v9470_v35  ;;  %v1223_v35 = vsel %vm12723_vm4, %v1166_v27, %v1167_v38  ;;  %v1597_v27 = vrot.slane %v9473_v36, 3  ;;  %v1173_v9 = vrot.slane %v9465_v34, 2  ;;  %v1174_v38 = vrot.slane %v9473_v36, 2 }
  0x64   : > { %8640 = vmatprep.subr.msk.mxu1 %vm610_vm0, %v9733_v55 }
  0x65   : > { %8393 = vmatmul.mubr.msk.f32.vlgmr.msra.gmra.mxu0 %vm513_vm1, %v1225_v37  ;;  %v1640_v37 = vsel %vm12720_vm3, %v1595_v10, %v1596_v21  ;;  %v1217_v46 = vsel %vm12723_vm4, %v1172_v19, %v1173_v9  ;;  %v1216_v50 = vsel %vm12723_vm4, %v1173_v9, %v1174_v38  ;;  %v1603_v19 = vrot.slane %v9529_v54, 3 }
  0x66   : > { %8395 = vmatprep.mubr.msk.f32.mxu0 %vm513_vm1, %v1224_v39  ;;  %8446 = vmatmul.mubr.msk.f32.gmra.mxu1 %vm513_vm1, %v1646_v40  ;;  %v1598_v39 = vrot.slane %v9490_v41, 3  ;;  %v1639_v40 = vsel %vm12720_vm3, %v1596_v21, %v1597_v27  ;;  %v1180_v9 = vrot.slane %v9529_v54, 2 }
  0x67   : > { %8448 = vmatprep.mubr.msk.f32.mxu1 %vm513_vm1, %v1645_v49  ;;  %8491 = vmatpush3.msk.msra.mxu0 %vm610_vm0, %v9430_v23  ;;  %v1220_v23 = vsel %vm12723_vm4, %v1169_v57, %v1170_v63  ;;  %v1175_v49 = vrot.slane %v9490_v41, 2  ;;  %v1176_v57 = vrot.slane %v9493_v42, 2  ;;  %v1601_v63 = vrot.slane %v9511_v48, 3 }
  0x68   : > { %8590 = vmatprep.subr.msk.mxu0 %vm610_vm0, %v9739_v56 }
  0x69   : > { %8396 = vmatmul.mubr.msk.f32.gmra.mxu0 %vm513_vm1, %v1223_v35  ;;  %v1638_v35 = vsel %vm12720_vm3, %v1597_v27, %v1598_v39  ;;  %v1215_v0 = vsel %vm12723_vm4, %v1174_v38, %v1175_v49  ;;  %v1214_v10 = vsel %vm12723_vm4, %v1175_v49, %v1176_v57  ;;  %v1605_v38 = vrot.slane %v9547_v60, 3 }
  0x6a   : > { %8398 = vmatprep.mubr.msk.f32.mxu0 %vm513_vm1, %v1222_v58  ;;  %8449 = vmatmul.mubr.msk.f32.gmra.mxu1 %vm513_vm1, %v1644_v62  ;;  %v1600_v58 = vrot.slane %v9508_v47, 3  ;;  %v1637_v62 = vsel %vm12720_vm3, %v1598_v39, %v1599_v45  ;;  %v1182_v49 = vrot.slane %v9547_v60, 2 }
  0x6b   : > { %8451 = vmatprep.mubr.msk.f32.mxu1 %vm513_vm1, %v1643_v4  ;;  %v1177_v4 = vrot.slane %v9508_v47, 2 }
  0x6d   : > { %8399 = vmatmul.mubr.msk.f32.gmra.mxu0 %vm513_vm1, %v1221_v11  ;;  %v1636_v11 = vsel %vm12720_vm3, %v1599_v45, %v1600_v58  ;;  %v1213_v21 = vsel %vm12723_vm4, %v1176_v57, %v1177_v4  ;;  %v1212_v27 = vsel %vm12723_vm4, %v1177_v4, %v1178_v17  ;;  %v1607_v57 = vrot.slane %v9565_v2, 3 }
  0x6e   : > { %8401 = vmatprep.mubr.msk.f32.mxu0 %vm513_vm1, %v1220_v23  ;;  %8452 = vmatmul.mubr.msk.f32.gmra.mxu1 %vm513_vm1, %v1642_v18  ;;  %v1602_v23 = vrot.slane %v9526_v53, 3  ;;  %v1635_v18 = vsel %vm12720_vm3, %v1600_v58, %v1601_v63  ;;  %v1184_v4 = vrot.slane %v9565_v2, 2 }
  0x6f   : > { %8454 = vmatprep.mubr.msk.f32.mxu1 %vm513_vm1, %v1641_v26  ;;  %v1179_v26 = vrot.slane %v9526_v53, 2 }
  0x71   : > { %8402 = vmatmul.mubr.msk.f32.gmra.mxu0 %vm513_vm1, %v1219_v30  ;;  %v1634_v30 = vsel %vm12720_vm3, %v1601_v63, %v1602_v23  ;;  %v1211_v39 = vsel %vm12723_vm4, %v1178_v17, %v1179_v26  ;;  %v1210_v45 = vsel %vm12723_vm4, %v1179_v26, %v1180_v9  ;;  %v1609_v17 = vrot.slane %v9583_v16, 3 }
  0x72   : > { %8404 = vmatprep.mubr.msk.f32.mxu0 %vm513_vm1, %v1218_v31  ;;  %8455 = vmatmul.mubr.msk.f32.gmra.mxu1 %vm513_vm1, %v1640_v37  ;;  %v1604_v31 = vrot.slane %v9544_v59, 3  ;;  %v1633_v37 = vsel %vm12720_vm3, %v1602_v23, %v1603_v19  ;;  %v1186_v26 = vrot.slane %v9583_v16, 2 }
  0x73   : > { %8457 = vmatprep.mubr.msk.f32.mxu1 %vm513_vm1, %v1639_v40  ;;  %v1181_v40 = vrot.slane %v9544_v59, 2 }
  0x75   : > { %8405 = vmatmul.mubr.msk.f32.gmra.mxu0 %vm513_vm1, %v1217_v46  ;;  %v1632_v46 = vsel %vm12720_vm3, %v1603_v19, %v1604_v31  ;;  %v1209_v58 = vsel %vm12723_vm4, %v1180_v9, %v1181_v40  ;;  %v1208_v63 = vsel %vm12723_vm4, %v1181_v40, %v1182_v49  ;;  %v1611_v9 = vrot.slane %v9601_v25, 3 }
  0x76   : > { %8407 = vmatprep.mubr.msk.f32.mxu0 %vm513_vm1, %v1216_v50  ;;  %8458 = vmatmul.mubr.msk.f32.gmra.mxu1 %vm513_vm1, %v1638_v35  ;;  %v1606_v50 = vrot.slane %v9562_v1, 3  ;;  %v1631_v35 = vsel %vm12720_vm3, %v1604_v31, %v1605_v38  ;;  %v1188_v40 = vrot.slane %v9601_v25, 2 }
  0x77   : > { %8460 = vmatprep.mubr.msk.f32.mxu1 %vm513_vm1, %v1637_v62  ;;  %v1183_v62 = vrot.slane %v9562_v1, 2 }
  0x79   : > { %8408 = vmatmul.mubr.msk.f32.gmra.mxu0 %vm513_vm1, %v1215_v0  ;;  %v1630_v0 = vsel %vm12720_vm3, %v1605_v38, %v1606_v50  ;;  %v1207_v23 = vsel %vm12723_vm4, %v1182_v49, %v1183_v62  ;;  %v1206_v19 = vsel %vm12723_vm4, %v1183_v62, %v1184_v4  ;;  %v1613_v49 = vrot.slane %v9619_v33, 3 }
  0x7a   : > { %8410 = vmatprep.mubr.msk.f32.mxu0 %vm513_vm1, %v1214_v10  ;;  %8461 = vmatmul.mubr.msk.f32.gmra.mxu1 %vm513_vm1, %v1636_v11  ;;  %v1608_v10 = vrot.slane %v9580_v15, 3  ;;  %v1629_v11 = vsel %vm12720_vm3, %v1606_v50, %v1607_v57  ;;  %v1190_v62 = vrot.slane %v9619_v33, 2 }
  0x7b   : > { %8463 = vmatprep.mubr.msk.f32.mxu1 %vm513_vm1, %v1635_v18  ;;  %v1185_v18 = vrot.slane %v9580_v15, 2 }
  0x7d   : > { %8411 = vmatmul.mubr.msk.f32.gmra.mxu0 %vm513_vm1, %v1213_v21  ;;  %v1628_v21 = vsel %vm12720_vm3, %v1607_v57, %v1608_v10  ;;  %v1205_v31 = vsel %vm12723_vm4, %v1184_v4, %v1185_v18  ;;  %v1204_v38 = vsel %vm12723_vm4, %v1185_v18, %v1186_v26  ;;  %v1615_v4 = vrot.slane %v9637_v44, 3 }
  0x7e   : > { %8413 = vmatprep.mubr.msk.f32.mxu0 %vm513_vm1, %v1212_v27  ;;  %8464 = vmatmul.mubr.msk.f32.gmra.mxu1 %vm513_vm1, %v1634_v30  ;;  %v1610_v27 = vrot.slane %v9598_v24, 3  ;;  %v1627_v30 = vsel %vm12720_vm3, %v1608_v10, %v1609_v17  ;;  %v1192_v18 = vrot.slane %v9637_v44, 2 }
  0x7f   : > { %8466 = vmatprep.mubr.msk.f32.mxu1 %vm513_vm1, %v1633_v37  ;;  %v1187_v37 = vrot.slane %v9598_v24, 2 }
  0x81   : > { %8414 = vmatmul.mubr.msk.f32.gmra.mxu0 %vm513_vm1, %v1211_v39  ;;  %v1626_v39 = vsel %vm12720_vm3, %v1609_v17, %v1610_v27  ;;  %v1203_v50 = vsel %vm12723_vm4, %v1186_v26, %v1187_v37  ;;  %v1202_v57 = vsel %vm12723_vm4, %v1187_v37, %v1188_v40  ;;  %v1617_v26 = vrot.slane %v9655_v52, 3 }
  0x82   : > { %8416 = vmatprep.mubr.msk.f32.mxu0 %vm513_vm1, %v1210_v45  ;;  %8467 = vmatmul.mubr.msk.f32.gmra.mxu1 %vm513_vm1, %v1632_v46  ;;  %v1612_v45 = vrot.slane %v9616_v32, 3  ;;  %v1625_v46 = vsel %vm12720_vm3, %v1610_v27, %v1611_v9  ;;  %v1194_v37 = vrot.slane %v9655_v52, 2 }
  0x83   : > { %8469 = vmatprep.mubr.msk.f32.mxu1 %vm513_vm1, %v1631_v35  ;;  %v1189_v35 = vrot.slane %v9616_v32, 2 }
  0x85   : > { %8417 = vmatmul.mubr.msk.f32.gmra.mxu0 %vm513_vm1, %v1209_v58  ;;  %v1624_v58 = vsel %vm12720_vm3, %v1611_v9, %v1612_v45  ;;  %v1201_v10 = vsel %vm12723_vm4, %v1188_v40, %v1189_v35  ;;  %v1200_v17 = vsel %vm12723_vm4, %v1189_v35, %v1190_v62  ;;  %v2433_v40 = vrot.slane %v9383_v7, 5 }
  0x86   : > { %8419 = vmatprep.mubr.msk.f32.mxu0 %vm513_vm1, %v1208_v63  ;;  %8470 = vmatmul.mubr.msk.f32.gmra.mxu1 %vm513_vm1, %v1630_v0  ;;  %v1614_v63 = vrot.slane %v9634_v43, 3  ;;  %v1623_v0 = vsel %vm12720_vm3, %v1612_v45, %v1613_v49  ;;  %v2010_v35 = vrot.slane %v9383_v7, 4  ;;  %v1227_v7 = vsel %vm12723_vm4, %v1194_v37, %v1163_v3 }
  0x87   : > { %8472 = vmatprep.mubr.msk.f32.mxu1 %vm513_vm1, %v1629_v11  ;;  %v1191_v11 = vrot.slane %v9634_v43, 2 }
  0x89   : > { %8420 = vmatmul.mubr.msk.f32.gmra.mxu0 %vm513_vm1, %v1207_v23  ;;  %v1622_v23 = vsel %vm12720_vm3, %v1613_v49, %v1614_v63  ;;  %v1199_v27 = vsel %vm12723_vm4, %v1190_v62, %v1191_v11  ;;  %v1198_v9 = vsel %vm12723_vm4, %v1191_v11, %v1192_v18  ;;  %v2435_v62 = vrot.slane %v9395_v12, 5 }
  0x8a   : > { %8422 = vmatprep.mubr.msk.f32.mxu0 %vm513_vm1, %v1206_v19  ;;  %8473 = vmatmul.mubr.msk.f32.gmra.mxu1 %vm513_vm1, %v1628_v21  ;;  %v1616_v19 = vrot.slane %v9652_v51, 3  ;;  %v1621_v21 = vsel %vm12720_vm3, %v1614_v63, %v1615_v4  ;;  %v2437_v11 = vrot.slane %v9401_v14, 5 }
  0x8b   : > { %8475 = vmatprep.mubr.msk.f32.mxu1 %vm513_vm1, %v1627_v30  ;;  %v1193_v30 = vrot.slane %v9652_v51, 2 }
  0x8d   : > { %8423 = vmatmul.mubr.msk.f32.gmra.mxu0 %vm513_vm1, %v1205_v31  ;;  %v1620_v31 = vsel %vm12720_vm3, %v1615_v4, %v1616_v19  ;;  %v1197_v45 = vsel %vm12723_vm4, %v1192_v18, %v1193_v30  ;;  %v1196_v49 = vsel %vm12723_vm4, %v1193_v30, %v1194_v37  ;;  %v2012_v4 = vrot.slane %v9395_v12, 4 }
  0x8e   : > { %8425 = vmatprep.mubr.msk.f32.mxu0 %vm513_vm1, %v1204_v38  ;;  %8476 = vmatmul.mubr.msk.f32.gmra.mxu1 %vm513_vm1, %v1626_v39  ;;  %v1619_v38 = vsel %vm12720_vm3, %v1616_v19, %v1617_v26  ;;  %v2432_v39 = vrot.slane %v9380_v6, 5  ;;  %v2014_v18 = vrot.slane %v9401_v14, 4  ;;  %v2438_v19 = vrot.slane %v9417_v20, 5 }
  0x8f   : > { %8478 = vmatprep.mubr.msk.f32.mxu1 %vm513_vm1, %v1625_v46  ;;  %v2009_v46 = vrot.slane %v9380_v6, 4  ;;  %v10282_v6 = vld [vmem:[%s9377_s18 + $0x20] sm:$0xff] }
  0x90   : > { %v2490_v30 = vsel %vm12718_vm5, %v2437_v11, %v2438_v19 }
  0x91   : > { %8426 = vmatmul.mubr.msk.f32.gmra.mxu0 %vm513_vm1, %v1203_v50  ;;  %v1650_v50 = vsel %vm12720_vm3, %v1617_v26, %v1586_v61  ;;  %v2011_v61 = vrot.slane %v9387_v8, 4  ;;  %v2072_v63 = vsel %vm12721_vm6, %v2009_v46, %v2010_v35  ;;  %v10018_v26 = vld [vmem:[%s12731_s1 + $0x20] sm:$0x7] }
  0x92   : > { %8428 = vmatprep.mubr.msk.f32.mxu0 %vm513_vm1, %v1202_v57  ;;  %8479 = vmatmul.mubr.msk.f32.gmra.mxu1 %vm513_vm1, %v1624_v58  ;;  %v2434_v57 = vrot.slane %v9387_v8, 5  ;;  %v2495_v58 = vsel %vm12718_vm5, %v2432_v39, %v2433_v40 }
  0x93   : > { %8481 = vmatprep.mubr.msk.f32.mxu1 %vm513_vm1, %v1623_v0  ;;  %v2071_v8 = vsel %vm12721_vm6, %v2010_v35, %v2011_v61  ;;  %v2070_v12 = vsel %vm12721_vm6, %v2011_v61, %v2012_v4  ;;  %v2443_v35 = vrot.slane %v9473_v36, 5 }
  0x94   : > { %v2494_v0 = vsel %vm12718_vm5, %v2433_v40, %v2434_v57  ;;  %v2493_v3 = vsel %vm12718_vm5, %v2434_v57, %v2435_v62  ;;  %v2019_v57 = vrot.slane %v9465_v34, 4 }
  0x95   : > { %8429 = vmatmul.mubr.msk.f32.gmra.mxu0 %vm513_vm1, %v1201_v10  ;;  %v2436_v10 = vrot.slane %v9398_v13, 5 }
  0x96   : > { %8431 = vmatprep.mubr.msk.f32.mxu0 %vm513_vm1, %v1200_v17  ;;  %8482 = vmatmul.mubr.msk.f32.gmra.mxu1 %vm513_vm1, %v1622_v23  ;;  %v2013_v17 = vrot.slane %v9398_v13, 4  ;;  %v2439_v13 = vrot.slane %v9424_v22, 5 }
  0x97   : > { %8484 = vmatprep.mubr.msk.f32.mxu1 %vm513_vm1, %v1621_v21  ;;  %v2492_v23 = vsel %vm12718_vm5, %v2435_v62, %v2436_v10  ;;  %v2491_v21 = vsel %vm12718_vm5, %v2436_v10, %v2437_v11  ;;  %v2020_v62 = vrot.slane %v9473_v36, 4  ;;  %v2022_v10 = vrot.slane %v9493_v42, 4 }
  0x98   : > { %v2069_v14 = vsel %vm12721_vm6, %v2012_v4, %v2013_v17  ;;  %v2489_v37 = vsel %vm12718_vm5, %v2438_v19, %v2439_v13 }
  0x99   : > { %8432 = vmatmul.mubr.msk.f32.gmra.mxu0 %vm513_vm1, %v1199_v27  ;;  %v2068_v27 = vsel %vm12721_vm6, %v2013_v17, %v2014_v18  ;;  %v2062_v36 = vsel %vm12721_vm6, %v2019_v57, %v2020_v62  ;;  %v2023_v17 = vrot.slane %v9508_v47, 4 }
  0x9a   : > { %8434 = vmatprep.mubr.msk.f32.mxu0 %vm513_vm1, %v1198_v9  ;;  %8485 = vmatmul.mubr.msk.f32.gmra.mxu1 %vm513_vm1, %v1620_v31  ;;  %v2016_v9 = vrot.slane %v9424_v22, 4  ;;  %v2440_v31 = vrot.slane %v9444_v28, 5 }
  0x9b   : > { %8487 = vmatprep.mubr.msk.f32.mxu1 %vm513_vm1, %v1619_v38  ;;  %v2017_v38 = vrot.slane %v9444_v28, 4 }
  0x9c   : > { %v2488_v40 = vsel %vm12718_vm5, %v2439_v13, %v2440_v31  ;;  %v2025_v13 = vrot.slane %v9526_v53, 4 }
  0x9d   : > { %8435 = vmatmul.mubr.msk.f32.gmra.mxu0 %vm513_vm1, %v1197_v45  ;;  %v2018_v45 = vrot.slane %v9448_v29, 4  ;;  %v2065_v28 = vsel %vm12721_vm6, %v2016_v9, %v2017_v38 }
  0x9e   : > { %8437 = vmatprep.mubr.msk.f32.mxu0 %vm513_vm1, %v1196_v49  ;;  %8488 = vmatmul.mubr.msk.f32.gmra.mxu1 %vm513_vm1, %v1650_v50  ;;  %v2442_v49 = vrot.slane %v9465_v34, 5 }
  0x9f   : > { %8542 = vmatprep.mubr.msk.f32.mxu1 %vm513_vm1, %v2495_v58  ;;  %v2063_v34 = vsel %vm12721_vm6, %v2018_v45, %v2019_v57  ;;  %v2031_v57 = vrot.slane %v9580_v15, 4 }
  0xa0   : > { %v2485_v61 = vsel %vm12718_vm5, %v2442_v49, %v2443_v35 }
  0xa1   : > { %8438 = vmatmul.mubr.msk.f32.gmra.mxu0 %vm513_vm1, %v1227_v7  ;;  %v2444_v7 = vrot.slane %v9490_v41, 5 }
  0xa2   : > { %8492 = vmatprep.mubr.msk.f32.mxu0 %vm513_vm1, %v2072_v63  ;;  %8543 = vmatmul.mubr.msk.f32.vlgmr.msra.gmra.mxu1 %vm513_vm1, %v2494_v0  ;;  %v2445_v63 = vrot.slane %v9493_v42, 5  ;;  %v2021_v0 = vrot.slane %v9490_v41, 4 }
  0xa3   : > { %8545 = vmatprep.mubr.msk.f32.mxu1 %vm513_vm1, %v2493_v3  ;;  %8641 = vmatpush3.msk.msra.mxu1 %vm610_vm0, %v9733_v55  ;;  %v2015_v55 = vrot.slane %v9417_v20, 4  ;;  %v2441_v20 = vrot.slane %v9448_v29, 5  ;;  %v2064_v29 = vsel %vm12721_vm6, %v2017_v38, %v2018_v45  ;;  %v2484_v4 = vsel %vm12718_vm5, %v2443_v35, %v2444_v7 }
  0xa4   : > { %v2446_v3 = vrot.slane %v9508_v47, 5  ;;  %v2483_v11 = vsel %vm12718_vm5, %v2444_v7, %v2445_v63  ;;  %v2061_v41 = vsel %vm12721_vm6, %v2020_v62, %v2021_v0  ;;  %v2060_v42 = vsel %vm12721_vm6, %v2021_v0, %v2022_v10 }
  0xa5   : > { %8493 = vmatmul.mubr.msk.f32.vlgmr.msra.gmra.mxu0 %vm513_vm1, %v2071_v8  ;;  %v2067_v22 = vsel %vm12721_vm6, %v2014_v18, %v2015_v55  ;;  %v2487_v50 = vsel %vm12718_vm5, %v2440_v31, %v2441_v20  ;;  %v2486_v58 = vsel %vm12718_vm5, %v2441_v20, %v2442_v49  ;;  %v2447_v8 = vrot.slane %v9511_v48, 5 }
  0xa6   : > { %8495 = vmatprep.mubr.msk.f32.mxu0 %vm513_vm1, %v2070_v12  ;;  %8546 = vmatmul.mubr.msk.f32.gmra.mxu1 %vm513_vm1, %v2492_v23  ;;  %v2482_v12 = vsel %vm12718_vm5, %v2445_v63, %v2446_v3  ;;  %v2024_v23 = vrot.slane %v9511_v48, 4  ;;  %v2448_v18 = vrot.slane %v9526_v53, 5  ;;  %v2059_v47 = vsel %vm12721_vm6, %v2022_v10, %v2023_v17 }
  0xa7   : > { %8548 = vmatprep.mubr.msk.f32.mxu1 %vm513_vm1, %v2491_v21  ;;  %8591 = vmatpush3.msk.msra.mxu0 %vm610_vm0, %v9739_v56  ;;  %v2066_v56 = vsel %vm12721_vm6, %v2015_v55, %v2016_v9  ;;  %v2481_v19 = vsel %vm12718_vm5, %v2446_v3, %v2447_v8  ;;  %v2449_v21 = vrot.slane %v9529_v54, 5  ;;  %v2026_v55 = vrot.slane %v9529_v54, 4 }
  0xa8   : > { %8690 = vmatprep.subr.msk.mxu0 %vm610_vm0, %v10018_v26  ;;  %v2058_v48 = vsel %vm12721_vm6, %v2023_v17, %v2024_v23  ;;  %v2451_v9 = vrot.slane %v9547_v60, 5  ;;  %v2057_v53 = vsel %vm12721_vm6, %v2024_v23, %v2025_v13  ;;  %v2027_v31 = vrot.slane %v9544_v59, 4 }
  0xa9   : > { %8496 = vmatmul.mubr.msk.f32.gmra.mxu0 %vm513_vm1, %v2069_v14  ;;  %v2480_v14 = vsel %vm12718_vm5, %v2447_v8, %v2448_v18  ;;  %v2056_v54 = vsel %vm12721_vm6, %v2025_v13, %v2026_v55  ;;  %v2028_v20 = vrot.slane %v9547_v60, 4  ;;  %v2030_v49 = vrot.slane %v9565_v2, 4 }
  0xaa   : > { %8498 = vmatprep.mubr.msk.f32.mxu0 %vm513_vm1, %v2068_v27  ;;  %8549 = vmatmul.mubr.msk.f32.gmra.mxu1 %vm513_vm1, %v2490_v30  ;;  %v2450_v27 = vrot.slane %v9544_v59, 5  ;;  %v2479_v30 = vsel %vm12718_vm5, %v2448_v18, %v2449_v21  ;;  %v2055_v59 = vsel %vm12721_vm6, %v2026_v55, %v2027_v31  ;;  %v2456_v62 = vrot.slane %v9598_v24, 5 }
  0xab   : > { %8551 = vmatprep.mubr.msk.f32.mxu1 %vm513_vm1, %v2489_v37  ;;  %v2054_v60 = vsel %vm12721_vm6, %v2027_v31, %v2028_v20  ;;  %v2033_v63 = vrot.slane %v9598_v24, 4  ;;  %v2034_v0 = vrot.slane %v9601_v25, 4  ;;  %v2459_v10 = vrot.slane %v9619_v33, 5 }
  0xac   : > { %v2478_v37 = vsel %vm12718_vm5, %v2449_v21, %v2450_v27  ;;  %v2477_v38 = vsel %vm12718_vm5, %v2450_v27, %v2451_v9  ;;  %v2035_v3 = vrot.slane %v9616_v32, 4  ;;  %v2036_v8 = vrot.slane %v9619_v33, 4  ;;  %v10230_v27 = vld [vmem:[%s9377_s18] sm:$0xff] }
  0xad   : > { %8499 = vmatmul.mubr.msk.f32.gmra.mxu0 %vm513_vm1, %v2067_v22  ;;  %v2452_v22 = vrot.slane %v9562_v1, 5  ;;  %v2038_v18 = vrot.slane %v9637_v44, 4  ;;  %v2039_v13 = vrot.slane %v9652_v51, 4 }
  0xae   : > { %8501 = vmatprep.mubr.msk.f32.mxu0 %vm513_vm1, %v2066_v56  ;;  %8552 = vmatmul.mubr.msk.f32.gmra.mxu1 %vm513_vm1, %v2488_v40  ;;  %v2453_v56 = vrot.slane %v9565_v2, 5  ;;  %v2029_v40 = vrot.slane %v9562_v1, 4  ;;  %v2046_v33 = vsel %vm12721_vm6, %v2035_v3, %v2036_v8 }
  0xaf   : > { %8554 = vmatprep.mubr.msk.f32.mxu1 %vm513_vm1, %v2487_v50  ;;  %v2476_v45 = vsel %vm12718_vm5, %v2451_v9, %v2452_v22  ;;  %v2454_v50 = vrot.slane %v9580_v15, 5  ;;  %v2051_v15 = vsel %vm12721_vm6, %v2030_v49, %v2031_v57  ;;  %v10234_v9 = vld [vmem:[%s9377_s18 + $0x8] sm:$0xff] }
  0xb0   : > { %v2475_v35 = vsel %vm12718_vm5, %v2452_v22, %v2453_v56  ;;  %v2053_v1 = vsel %vm12721_vm6, %v2028_v20, %v2029_v40  ;;  %v2052_v2 = vsel %vm12721_vm6, %v2029_v40, %v2030_v49  ;;  %v10253_v20 = vld [vmem:[%s9377_s18 + $0x10] sm:$0xff] }
  0xb1   : > { %8502 = vmatmul.mubr.msk.f32.gmra.mxu0 %vm513_vm1, %v2065_v28  ;;  %v2455_v28 = vrot.slane %v9583_v16, 5  ;;  %v3280_v22 = vrot.slane %v10253_v20, 7  ;;  %v2857_v40 = vrot.slane %v10253_v20, 6 }
  0xb2   : > { %8504 = vmatprep.mubr.msk.f32.mxu0 %vm513_vm1, %v2064_v29  ;;  %8555 = vmatmul.mubr.msk.f32.gmra.mxu1 %vm513_vm1, %v2486_v58  ;;  %v2474_v29 = vsel %vm12718_vm5, %v2453_v56, %v2454_v50  ;;  %v2032_v58 = vrot.slane %v9583_v16, 4  ;;  %v10262_v56 = vld [vmem:[%s9377_s18 + $0x18] sm:$0xff] }
  0xb3   : > { %8557 = vmatprep.mubr.msk.f32.mxu1 %vm513_vm1, %v2485_v61  ;;  %v2473_v7 = vsel %vm12718_vm5, %v2454_v50, %v2455_v28  ;;  %v2457_v61 = vrot.slane %v9601_v25, 5  ;;  %v2048_v25 = vsel %vm12721_vm6, %v2033_v63, %v2034_v0  ;;  %v2858_v49 = vrot.slane %v10262_v56, 6 }
  0xb4   : > { %v2050_v16 = vsel %vm12721_vm6, %v2031_v57, %v2032_v58  ;;  %v2049_v24 = vsel %vm12721_vm6, %v2032_v58, %v2033_v63 }
  0xb5   : > { %8505 = vmatmul.mubr.msk.f32.gmra.mxu0 %vm513_vm1, %v2063_v34  ;;  %v2472_v34 = vsel %vm12718_vm5, %v2455_v28, %v2456_v62 }
  0xb6   : > { %8507 = vmatprep.mubr.msk.f32.mxu0 %vm513_vm1, %v2062_v36  ;;  %8558 = vmatmul.mubr.msk.f32.gmra.mxu1 %vm513_vm1, %v2484_v4  ;;  %v2458_v36 = vrot.slane %v9616_v32, 5  ;;  %v2471_v4 = vsel %vm12718_vm5, %v2456_v62, %v2457_v61  ;;  %v2047_v32 = vsel %vm12721_vm6, %v2034_v0, %v2035_v3 }
  0xb7   : > { %8560 = vmatprep.mubr.msk.f32.mxu1 %vm513_vm1, %v2483_v11 }
  0xb8   : > { %v2470_v11 = vsel %vm12718_vm5, %v2457_v61, %v2458_v36  ;;  %v2469_v17 = vsel %vm12718_vm5, %v2458_v36, %v2459_v10 }
  0xb9   : > { %8508 = vmatmul.mubr.msk.f32.gmra.mxu0 %vm513_vm1, %v2061_v41  ;;  %v2460_v41 = vrot.slane %v9634_v43, 5 }
  0xba   : > { %8510 = vmatprep.mubr.msk.f32.mxu0 %vm513_vm1, %v2060_v42  ;;  %8561 = vmatmul.mubr.msk.f32.gmra.mxu1 %vm513_vm1, %v2482_v12  ;;  %v2461_v42 = vrot.slane %v9637_v44, 5  ;;  %v2037_v12 = vrot.slane %v9634_v43, 4 }
  0xbb   : > { %8563 = vmatprep.mubr.msk.f32.mxu1 %vm513_vm1, %v2481_v19  ;;  %v2468_v23 = vsel %vm12718_vm5, %v2459_v10, %v2460_v41  ;;  %v2462_v19 = vrot.slane %v9652_v51, 5  ;;  %v3279_v51 = vrot.slane %v10234_v9, 7 }
  0xbc   : > { %v2467_v21 = vsel %vm12718_vm5, %v2460_v41, %v2461_v42  ;;  %v2045_v43 = vsel %vm12721_vm6, %v2036_v8, %v2037_v12  ;;  %v2044_v44 = vsel %vm12721_vm6, %v2037_v12, %v2038_v18  ;;  %v10328_v41 = vld [vmem:[%s9377_s18 + $0x40] sm:$0xff] }
  0xbd   : > { %8511 = vmatmul.mubr.msk.f32.gmra.mxu0 %vm513_vm1, %v2059_v47  ;;  %v2463_v47 = vrot.slane %v9655_v52, 5 }
  0xbe   : > { %8513 = vmatprep.mubr.msk.f32.mxu0 %vm513_vm1, %v2058_v48  ;;  %8564 = vmatmul.mubr.msk.f32.gmra.mxu1 %vm513_vm1, %v2480_v14  ;;  %v2466_v48 = vsel %vm12718_vm5, %v2461_v42, %v2462_v19  ;;  %v2040_v14 = vrot.slane %v9655_v52, 4  ;;  %v2043_v52 = vsel %vm12721_vm6, %v2038_v18, %v2039_v13 }
  0xbf   : > { %8566 = vmatprep.mubr.msk.f32.mxu1 %vm513_vm1, %v2479_v30  ;;  %v2465_v55 = vsel %vm12718_vm5, %v2462_v19, %v2463_v47  ;;  %v12669_v30 = vrot.slane %v10230_v27, 7 }
  0xc0   : > { %v2042_v31 = vsel %vm12721_vm6, %v2039_v13, %v2040_v14 }
  0xc1   : > { %8514 = vmatmul.mubr.msk.f32.gmra.mxu0 %vm513_vm1, %v2057_v53  ;;  %v12668_v53 = vrot.slane %v10230_v27, 6 }
  0xc2   : > { %8516 = vmatprep.mubr.msk.f32.mxu0 %vm513_vm1, %v2056_v54  ;;  %8567 = vmatmul.mubr.msk.f32.gmra.mxu1 %vm513_vm1, %v2478_v37  ;;  %v2496_v54 = vsel %vm12718_vm5, %v2463_v47, %v2432_v39  ;;  %v2856_v37 = vrot.slane %v10234_v9, 6  ;;  %v2073_v39 = vsel %vm12721_vm6, %v2040_v14, %v2009_v46  ;;  %v3282_v46 = vrot.slane %v10282_v6, 7  ;;  %v10356_v14 = vld [vmem:[%s9377_s18 + $0x50] sm:$0xff] }
  0xc3   : > { %8569 = vmatprep.mubr.msk.f32.mxu1 %vm513_vm1, %v2477_v38  ;;  %v3341_v38 = vsel %vm12722_vm7, %v12669_v30, %v3279_v51  ;;  %v2863_v47 = vrot.slane %v10328_v41, 6 }
  0xc4   : > { %v2917_v57 = vsel %vm12719_vm8, %v2856_v37, %v2857_v40 }
  0xc5   : > { %8517 = vmatmul.mubr.msk.f32.gmra.mxu0 %vm513_vm1, %v2055_v59  ;;  %v3281_v59 = vrot.slane %v10262_v56, 7 }
  0xc6   : > { %8519 = vmatprep.mubr.msk.f32.mxu0 %vm513_vm1, %v2054_v60  ;;  %8570 = vmatmul.mubr.msk.f32.gmra.mxu1 %vm513_vm1, %v2476_v45  ;;  %v2918_v60 = vsel %vm12719_vm8, %v12668_v53, %v2856_v37  ;;  %v3340_v45 = vsel %vm12722_vm7, %v3279_v51, %v3280_v22 }
  0xc7   : > { %8572 = vmatprep.mubr.msk.f32.mxu1 %vm513_vm1, %v2475_v35  ;;  %v3339_v50 = vsel %vm12722_vm7, %v3280_v22, %v3281_v59  ;;  %v10288_v35 = vld [vmem:[%s9377_s18 + $0x28] sm:$0xff]  ;;  %v3338_v58 = vsel %vm12722_vm7, %v3281_v59, %v3282_v46 }
  0xc8   : > { %v3283_v28 = vrot.slane %v10288_v35, 7  ;;  %v2860_v62 = vrot.slane %v10288_v35, 6 }
  0xc9   : > { %8520 = vmatmul.mubr.msk.f32.gmra.mxu0 %vm513_vm1, %v2053_v1 }
  0xca   : > { %8522 = vmatprep.mubr.msk.f32.mxu0 %vm513_vm1, %v2052_v2  ;;  %8573 = vmatmul.mubr.msk.f32.gmra.mxu1 %vm513_vm1, %v2474_v29  ;;  %v2859_v2 = vrot.slane %v10282_v6, 6  ;;  %v2916_v29 = vsel %vm12719_vm8, %v2857_v40, %v2858_v49  ;;  %v3337_v63 = vsel %vm12722_vm7, %v3282_v46, %v3283_v28  ;;  %v2865_v40 = vrot.slane %v10356_v14, 6 }
  0xcb   : > { %8575 = vmatprep.mubr.msk.f32.mxu1 %vm513_vm1, %v2473_v7  ;;  %v10304_v7 = vld [vmem:[%s9377_s18 + $0x30] sm:$0xff] }
  0xcc   : > { %v3284_v61 = vrot.slane %v10304_v7, 7  ;;  %v2915_v10 = vsel %vm12719_vm8, %v2858_v49, %v2859_v2 }
  0xcd   : > { %8523 = vmatmul.mubr.msk.f32.gmra.mxu0 %vm513_vm1, %v2051_v15 }
  0xce   : > { %8525 = vmatprep.mubr.msk.f32.mxu0 %vm513_vm1, %v2050_v16  ;;  %8576 = vmatmul.mubr.msk.f32.gmra.mxu1 %vm513_vm1, %v2472_v34  ;;  %v10310_v16 = vld [vmem:[%s9377_s18 + $0x38] sm:$0xff] }
  0xcf   : > { %8578 = vmatprep.mubr.msk.f32.mxu1 %vm513_vm1, %v2471_v4  ;;  %v3285_v34 = vrot.slane %v10310_v16, 7  ;;  %v2862_v8 = vrot.slane %v10310_v16, 6 }
  0xd1   : > { %8526 = vmatmul.mubr.msk.f32.gmra.mxu0 %vm513_vm1, %v2049_v24  ;;  %v2861_v24 = vrot.slane %v10304_v7, 6  ;;  %v3335_v12 = vsel %vm12722_vm7, %v3284_v61, %v3285_v34 }
  0xd2   : > { %8528 = vmatprep.mubr.msk.f32.mxu0 %vm513_vm1, %v2048_v25  ;;  %8579 = vmatmul.mubr.msk.f32.gmra.mxu1 %vm513_vm1, %v2470_v11  ;;  %v2914_v25 = vsel %vm12719_vm8, %v2859_v2, %v2860_v62  ;;  %v3336_v11 = vsel %vm12722_vm7, %v3283_v28, %v3284_v61 }
  0xd3   : > { %8581 = vmatprep.mubr.msk.f32.mxu1 %vm513_vm1, %v2469_v17  ;;  %v3286_v17 = vrot.slane %v10328_v41, 7  ;;  %v2912_v13 = vsel %vm12719_vm8, %v2861_v24, %v2862_v8 }
  0xd5   : > { %8529 = vmatmul.mubr.msk.f32.gmra.mxu0 %vm513_vm1, %v2047_v32 }
  0xd6   : > { %8531 = vmatprep.mubr.msk.f32.mxu0 %vm513_vm1, %v2046_v33  ;;  %8582 = vmatmul.mubr.msk.f32.gmra.mxu1 %vm513_vm1, %v2468_v23  ;;  %v10338_v33 = vld [vmem:[%s9377_s18 + $0x48] sm:$0xff] }
  0xd7   : > { %8584 = vmatprep.mubr.msk.f32.mxu1 %vm513_vm1, %v2467_v21  ;;  %v3287_v23 = vrot.slane %v10338_v33, 7  ;;  %v2913_v21 = vsel %vm12719_vm8, %v2860_v62, %v2861_v24 }
  0xd9   : > { %8532 = vmatmul.mubr.msk.f32.gmra.mxu0 %vm513_vm1, %v2045_v43 }
  0xda   : > { %8534 = vmatprep.mubr.msk.f32.mxu0 %vm513_vm1, %v2044_v44  ;;  %8585 = vmatmul.mubr.msk.f32.gmra.mxu1 %vm513_vm1, %v2466_v48  ;;  %v3334_v44 = vsel %vm12722_vm7, %v3285_v34, %v3286_v17  ;;  %v2864_v48 = vrot.slane %v10338_v33, 6 }
  0xdb   : > { %8587 = vmatprep.mubr.msk.f32.mxu1 %vm513_vm1, %v2465_v55  ;;  %v3288_v55 = vrot.slane %v10356_v14, 7 }
  0xdd   : > { %8535 = vmatmul.mubr.msk.f32.gmra.mxu0 %vm513_vm1, %v2043_v52  ;;  %v3332_v49 = vsel %vm12722_vm7, %v3287_v23, %v3288_v55 }
  0xde   : > { %8537 = vmatprep.mubr.msk.f32.mxu0 %vm513_vm1, %v2042_v31  ;;  %8588 = vmatmul.mubr.msk.f32.gmra.mxu1 %vm513_vm1, %v2496_v54  ;;  %v3333_v31 = vsel %vm12722_vm7, %v3286_v17, %v3287_v23  ;;  %v10364_v54 = vld [vmem:[%s9377_s18 + $0x58] sm:$0xff] }
  0xdf   : > { %8642 = vmatprep.mubr.msk.f32.mxu1 %vm513_vm1, %v3341_v38  ;;  %v3289_v37 = vrot.slane %v10364_v54, 7  ;;  %v2866_v46 = vrot.slane %v10364_v54, 6 }
  0xe1   : > { %8538 = vmatmul.mubr.msk.f32.gmra.mxu0 %vm513_vm1, %v2073_v39  ;;  %v2911_v39 = vsel %vm12719_vm8, %v2862_v8, %v2863_v47  ;;  %v3331_v2 = vsel %vm12722_vm7, %v3288_v55, %v3289_v37  ;;  %v10434_v55 = vld [vmem:[%s9377_s18 + $0x80] sm:$0xff] }
  0xe2   : > { %8592 = vmatprep.mubr.msk.f32.mxu0 %vm513_vm1, %v2918_v60  ;;  %v8344_v1 = vpop.f32.mrf.mxu1  ;;  %8643 = vmatmul.mubr.msk.f32.vlgmr.msra.gmra.mxu1 %vm513_vm1, %v3340_v45  ;;  %v2910_v45 = vsel %vm12719_vm8, %v2863_v47, %v2864_v48 }
  0xe3   : > { %8645 = vmatprep.mubr.msk.f32.mxu1 %vm513_vm1, %v3339_v50  ;;  %v10382_v50 = vld [vmem:[%s9377_s18 + $0x60] sm:$0xff] }
  0xe4   : > { %v1004_v15 = vpop.f32.mrf.mxu1  ;;  %v3290_v28 = vrot.slane %v10382_v50, 7  ;;  %v2867_v34 = vrot.slane %v10382_v50, 6 }
  0xe5   : > { %v8294_v0 = vpop.f32.mrf.mxu0  ;;  %8593 = vmatmul.mubr.msk.f32.vlgmr.msra.gmra.mxu0 %vm513_vm1, %v2917_v57 }
  0xe6   : > { %v10314_v36 = vadd.f32 %v8344_v1, %v8294_v0  ;;  %8595 = vmatprep.mubr.msk.f32.mxu0 %vm513_vm1, %v2916_v29  ;;  %v8347_v4 = vpop.f32.mrf.mxu1  ;;  %8646 = vmatmul.mubr.msk.f32.gmra.mxu1 %vm513_vm1, %v3338_v58  ;;  %v10390_v29 = vld [vmem:[%s9377_s18 + $0x68] sm:$0xff] }
  0xe7   : > { %v680_v3 = vpop.f32.mrf.mxu0  ;;  %8648 = vmatprep.mubr.msk.f32.mxu1 %vm513_vm1, %v3337_v63  ;;  %8691 = vmatpush3.msk.msra.mxu0 %vm610_vm0, %v10018_v26  ;;  %v3291_v58 = vrot.slane %v10390_v29, 7  ;;  %v2909_v63 = vsel %vm12719_vm8, %v2864_v48, %v2865_v40  ;;  %v2868_v24 = vrot.slane %v10390_v29, 6 }
  0xe8   : > { %v10333_v42 = vadd.f32 %v1004_v15, %v680_v3  ;;  %v1014_v32 = vpop.f32.mrf.mxu1  ;;  %v10408_v3 = vld [vmem:[%s9377_s18 + $0x70] sm:$0xff] }
  0xe9   : > { %v8297_v18 = vpop.f32.mrf.mxu0  ;;  %8596 = vmatmul.mubr.msk.f32.gmra.mxu0 %vm513_vm1, %v2915_v10  ;;  %v3330_v10 = vsel %vm12722_vm7, %v3289_v37, %v3290_v28  ;;  %v3329_v17 = vsel %vm12722_vm7, %v3290_v28, %v3291_v58  ;;  %v2869_v47 = vrot.slane %v10408_v3, 6 }
  0xea   : > { %v10342_v19 = vadd.f32 %v8347_v4, %v8297_v18  ;;  %8598 = vmatprep.mubr.msk.f32.mxu0 %vm513_vm1, %v2914_v25  ;;  %v8350_v26 = vpop.f32.mrf.mxu1  ;;  %8649 = vmatmul.mubr.msk.f32.gmra.mxu1 %vm513_vm1, %v3336_v11  ;;  %v2908_v4 = vsel %vm12719_vm8, %v2865_v40, %v2866_v46  ;;  %v3292_v25 = vrot.slane %v10408_v3, 7 }
  0xeb   : > { %v690_v43 = vpop.f32.mrf.mxu0  ;;  %8651 = vmatprep.mubr.msk.f32.mxu1 %vm513_vm1, %v3335_v12 }
  0xec   : > { %v10359_v51 = vadd.f32 %v1014_v32, %v690_v43  ;;  %v1024_v52 = vpop.f32.mrf.mxu1  ;;  %v10416_v32 = vld [vmem:[%s9377_s18 + $0x78] sm:$0xff] }
  0xed   : > { %v8300_v22 = vpop.f32.mrf.mxu0  ;;  %8599 = vmatmul.mubr.msk.f32.gmra.mxu0 %vm513_vm1, %v2913_v21  ;;  %v3293_v12 = vrot.slane %v10416_v32, 7  ;;  %v2907_v21 = vsel %vm12719_vm8, %v2866_v46, %v2867_v34  ;;  %v2870_v48 = vrot.slane %v10416_v32, 6  ;;  %v2871_v46 = vrot.slane %v10434_v55, 6 }
  0xee   : > { %v10368_v38 = vadd.f32 %v8350_v26, %v8300_v22  ;;  %8601 = vmatprep.mubr.msk.f32.mxu0 %vm513_vm1, %v2912_v13  ;;  %v8353_v59 = vpop.f32.mrf.mxu1  ;;  %8652 = vmatmul.mubr.msk.f32.gmra.mxu1 %vm513_vm1, %v3334_v44  ;;  %v2906_v13 = vsel %vm12719_vm8, %v2867_v34, %v2868_v24  ;;  %v3328_v44 = vsel %vm12722_vm7, %v3291_v58, %v3292_v25 }
  0xef   : > { %v700_v60 = vpop.f32.mrf.mxu0  ;;  %8654 = vmatprep.mubr.msk.f32.mxu1 %vm513_vm1, %v3333_v31  ;;  %v3327_v22 = vsel %vm12722_vm7, %v3292_v25, %v3293_v12 }
  0xf0   : > { %v10385_v1 = vadd.f32 %v1024_v52, %v700_v60  ;;  %v1034_v57 = vpop.f32.mrf.mxu1  ;;  %v3294_v52 = vrot.slane %v10434_v55, 7 }
  0xf1   : > { %v8303_v62 = vpop.f32.mrf.mxu0  ;;  %8602 = vmatmul.mubr.msk.f32.gmra.mxu0 %vm513_vm1, %v2911_v39 }
  0xf2   : > { %v10394_v61 = vadd.f32 %v8353_v59, %v8303_v62  ;;  %8604 = vmatprep.mubr.msk.f32.mxu0 %vm513_vm1, %v2910_v45  ;;  %v8356_v15 = vpop.f32.mrf.mxu1  ;;  %8655 = vmatmul.mubr.msk.f32.gmra.mxu1 %vm513_vm1, %v3332_v49  ;;  %v10442_v59 = vld [vmem:[%s9377_s18 + $0x88] sm:$0xff]  ;;  %v2905_v49 = vsel %vm12719_vm8, %v2868_v24, %v2869_v47  ;;  %v10460_v62 = vld [vmem:[%s9377_s18 + $0x90] sm:$0xff] }
  0xf3   : > { %v710_v0 = vpop.f32.mrf.mxu0  ;;  %8657 = vmatprep.mubr.msk.f32.mxu1 %vm513_vm1, %v3331_v2  ;;  %v3295_v39 = vrot.slane %v10442_v59, 7  ;;  %v3326_v2 = vsel %vm12722_vm7, %v3293_v12, %v3294_v52  ;;  %v2872_v58 = vrot.slane %v10442_v59, 6  ;;  %v2873_v12 = vrot.slane %v10460_v62, 6 }
  0xf4   : > { %v10411_v11 = vadd.f32 %v1034_v57, %v710_v0  ;;  %v1044_v8 = vpop.f32.mrf.mxu1  ;;  %v2904_v57 = vsel %vm12719_vm8, %v2869_v47, %v2870_v48 }
  0xf5   : > { %v8306_v23 = vpop.f32.mrf.mxu0  ;;  %8605 = vmatmul.mubr.msk.f32.gmra.mxu0 %vm513_vm1, %v2909_v63  ;;  %v3325_v0 = vsel %vm12722_vm7, %v3294_v52, %v3295_v39 }
  0xf6   : > { %v10420_v18 = vadd.f32 %v8356_v15, %v8306_v23  ;;  %8607 = vmatprep.mubr.msk.f32.mxu0 %vm513_vm1, %v2908_v4  ;;  %v8359_v26 = vpop.f32.mrf.mxu1  ;;  %8658 = vmatmul.mubr.msk.f32.gmra.mxu1 %vm513_vm1, %v3330_v10  ;;  %v3296_v15 = vrot.slane %v10460_v62, 7  ;;  %v10468_v4 = vld [vmem:[%s9377_s18 + $0x98] sm:$0xff] }
  0xf7   : > { %v720_v43 = vpop.f32.mrf.mxu0  ;;  %8660 = vmatprep.mubr.msk.f32.mxu1 %vm513_vm1, %v3329_v17  ;;  %v3297_v10 = vrot.slane %v10468_v4, 7  ;;  %v2903_v17 = vsel %vm12719_vm8, %v2870_v48, %v2871_v46  ;;  %v2874_v47 = vrot.slane %v10468_v4, 6 }
  0xf8   : > { %v10437_v31 = vadd.f32 %v1044_v8, %v720_v43  ;;  %v1054_v37 = vpop.f32.mrf.mxu1  ;;  %v10486_v43 = vld [vmem:[%s9377_s18 + $0xa0] sm:$0xff] }
  0xf9   : > { %v8309_v40 = vpop.f32.mrf.mxu0  ;;  %8608 = vmatmul.mubr.msk.f32.gmra.mxu0 %vm513_vm1, %v2907_v21  ;;  %v3324_v21 = vsel %vm12722_vm7, %v3295_v39, %v3296_v15  ;;  %v3323_v52 = vsel %vm12722_vm7, %v3296_v15, %v3297_v10 }
  0xfa   : > { %v10446_v60 = vadd.f32 %v8359_v26, %v8309_v40  ;;  %8610 = vmatprep.mubr.msk.f32.mxu0 %vm513_vm1, %v2906_v13  ;;  %v8362_v45 = vpop.f32.mrf.mxu1  ;;  %8661 = vmatmul.mubr.msk.f32.gmra.mxu1 %vm513_vm1, %v3328_v44  ;;  %v2902_v26 = vsel %vm12719_vm8, %v2871_v46, %v2872_v58  ;;  %v3298_v13 = vrot.slane %v10486_v43, 7  ;;  %v2875_v46 = vrot.slane %v10486_v43, 6 }
  0xfb   : > { %v730_v28 = vpop.f32.mrf.mxu0  ;;  %8663 = vmatprep.mubr.msk.f32.mxu1 %vm513_vm1, %v3327_v22 }
  0xfc   : > { %v10463_v63 = vadd.f32 %v1054_v37, %v730_v28  ;;  %v1064_v34 = vpop.f32.mrf.mxu1  ;;  %v10494_v37 = vld [vmem:[%s9377_s18 + $0xa8] sm:$0xff] }
  0xfd   : > { %v8312_v24 = vpop.f32.mrf.mxu0  ;;  %8611 = vmatmul.mubr.msk.f32.gmra.mxu0 %vm513_vm1, %v2905_v49  ;;  %v3299_v22 = vrot.slane %v10494_v37, 7  ;;  %v2901_v49 = vsel %vm12719_vm8, %v2872_v58, %v2873_v12  ;;  %v2876_v15 = vrot.slane %v10494_v37, 6 }
  0xfe   : > { %v10472_v25 = vadd.f32 %v8362_v45, %v8312_v24  ;;  %8613 = vmatprep.mubr.msk.f32.mxu0 %vm513_vm1, %v2904_v57  ;;  %v8365_v8 = vpop.f32.mrf.mxu1  ;;  %8664 = vmatmul.mubr.msk.f32.gmra.mxu1 %vm513_vm1, %v3326_v2  ;;  %v2900_v57 = vsel %vm12719_vm8, %v2873_v12, %v2874_v47  ;;  %v3322_v2 = vsel %vm12722_vm7, %v3297_v10, %v3298_v13 }
  0xff   : > { %v740_v23 = vpop.f32.mrf.mxu0  ;;  %8666 = vmatprep.mubr.msk.f32.mxu1 %vm513_vm1, %v3325_v0 }
 0x100   : > { %v10489_v44 = vadd.f32 %v1064_v34, %v740_v23  ;;  %v1074_v48 = vpop.f32.mrf.mxu1  ;;  %v10512_v34 = vld [vmem:[%s9377_s18 + $0xb0] sm:$0xff] }
 0x101   : > { %v8315_v40 = vpop.f32.mrf.mxu0  ;;  %8614 = vmatmul.mubr.msk.f32.gmra.mxu0 %vm513_vm1, %v2903_v17  ;;  %v3300_v0 = vrot.slane %v10512_v34, 7  ;;  %v10522_v17 = vld [vmem:[%s9377_s18 + $0xb8] sm:$0xff] }
 0x102   : > { %v10498_v39 = vadd.f32 %v8365_v8, %v8315_v40  ;;  %8616 = vmatprep.mubr.msk.f32.mxu0 %vm513_vm1, %v2902_v26  ;;  %v8368_v45 = vpop.f32.mrf.mxu1  ;;  %8667 = vmatmul.mubr.msk.f32.gmra.mxu1 %vm513_vm1, %v3324_v21  ;;  %v3321_v8 = vsel %vm12722_vm7, %v3298_v13, %v3299_v22  ;;  %v3301_v12 = vrot.slane %v10522_v17, 7  ;;  %v2899_v21 = vsel %vm12719_vm8, %v2874_v47, %v2875_v46 }
 0x103   : > { %v750_v28 = vpop.f32.mrf.mxu0  ;;  %8669 = vmatprep.mubr.msk.f32.mxu1 %vm513_vm1, %v3323_v52  ;;  %v2877_v13 = vrot.slane %v10512_v34, 6  ;;  %v2898_v52 = vsel %vm12719_vm8, %v2875_v46, %v2876_v15  ;;  %v3320_v40 = vsel %vm12722_vm7, %v3299_v22, %v3300_v0 }
 0x104   : > { %v10515_v58 = vadd.f32 %v1074_v48, %v750_v28  ;;  %v10517_v24 = vpop.f32.mrf.mxu1 }
 0x105   : > { %12734 = vst [vmem:[#allocation6_spill] sm:$0xff] %v10517_v24  ;;  %v8318_v23 = vpop.f32.mrf.mxu0  ;;  %8617 = vmatmul.mubr.msk.f32.gmra.mxu0 %vm513_vm1, %v2901_v49  ;;  %v10542_v49 = vld [vmem:[%s9377_s18 + $0xc0] sm:$0xff]  ;;  %v2897_v53 = vsel %vm12719_vm8, %v2876_v15, %v2877_v13 }
 0x106   : > { %v10526_v10 = vadd.f32 %v8368_v45, %v8318_v23  ;;  %8619 = vmatprep.mubr.msk.f32.mxu0 %vm513_vm1, %v2900_v57  ;;  %v8371_v26 = vpop.f32.mrf.mxu1  ;;  %8670 = vmatmul.mubr.msk.f32.gmra.mxu1 %vm513_vm1, %v3322_v2  ;;  %v2878_v45 = vrot.slane %v10522_v17, 6  ;;  %12736 = vst [vmem:[#allocation8_spill] sm:$0xff] %v10542_v49  ;;  %v3302_v47 = vrot.slane %v10542_v49, 7  ;;  %v3319_v57 = vsel %vm12722_vm7, %v3300_v0, %v3301_v12  ;;  %v10550_v2 = vld [vmem:[%s9377_s18 + $0xc8] sm:$0xff] }
 0x107   : > { %v10533_v48 = vpop.f32.mrf.mxu0  ;;  %8672 = vmatprep.mubr.msk.f32.mxu1 %vm513_vm1, %v3321_v8  ;;  %12738 = vst [vmem:[#allocation10_spill] sm:$0xff] %v10550_v2  ;;  %v3303_v46 = vrot.slane %v10550_v2, 7  ;;  %v2879_v0 = vrot.slane %v10542_v49, 6 }
 0x108   : > { %12735 = vst [vmem:[#allocation7_spill] sm:$0xff] %v10533_v48  ;;  %v10545_v28 = vpop.f32.mrf.mxu1 }
 0x109   : > { %12737 = vst [vmem:[#allocation9_spill] sm:$0xff] %v10545_v28  ;;  %v8321_v8 = vpop.f32.mrf.mxu0  ;;  %8620 = vmatmul.mubr.msk.f32.gmra.mxu0 %vm513_vm1, %v2899_v21  ;;  %v2896_v28 = vsel %vm12719_vm8, %v2877_v13, %v2878_v45  ;;  %v2880_v21 = vrot.slane %v10550_v2, 6 }
 0x10a   : > { %v10554_v22 = vadd.f32 %v8371_v26, %v8321_v8  ;;  %8622 = vmatprep.mubr.msk.f32.mxu0 %vm513_vm1, %v2898_v52  ;;  %v8374_v23 = vpop.f32.mrf.mxu1  ;;  %8673 = vmatmul.mubr.msk.f32.gmra.mxu1 %vm513_vm1, %v3320_v40  ;;  %v3318_v26 = vsel %vm12722_vm7, %v3301_v12, %v3302_v47  ;;  %v10570_v52 = vld [vmem:[%s9377_s18 + $0xd0] sm:$0xff]  ;;  %v3317_v40 = vsel %vm12722_vm7, %v3302_v47, %v3303_v46 }
 0x10b   : > { %v10561_v30 = vpop.f32.mrf.mxu0  ;;  %8675 = vmatprep.mubr.msk.f32.mxu1 %vm513_vm1, %v3319_v57  ;;  %12740 = vst [vmem:[#allocation12_spill] sm:$0xff] %v10570_v52  ;;  %v3304_v15 = vrot.slane %v10570_v52, 7  ;;  %v2881_v47 = vrot.slane %v10570_v52, 6  ;;  %v2894_v2 = vsel %vm12719_vm8, %v2879_v0, %v2880_v21 }
 0x10c   : > { %12739 = vst [vmem:[#allocation11_spill] sm:$0xff] %v10561_v30  ;;  %v10573_v8 = vpop.f32.mrf.mxu1  ;;  %v10578_v30 = vld [vmem:[%s9377_s18 + $0xd8] sm:$0xff] }
 0x10d   : > { %12741 = vst [vmem:[#allocation13_spill] sm:$0xff] %v10573_v8  ;;  %12742 = vst [vmem:[#allocation14_spill] sm:$0xff] %v10578_v30  ;;  %v3305_v13 = vrot.slane %v10578_v30, 7  ;;  %v8324_v57 = vpop.f32.mrf.mxu0  ;;  %8623 = vmatmul.mubr.msk.f32.gmra.mxu0 %vm513_vm1, %v2897_v53  ;;  %v2895_v8 = vsel %vm12719_vm8, %v2878_v45, %v2879_v0  ;;  %v3316_v53 = vsel %vm12722_vm7, %v3303_v46, %v3304_v15 }
 0x10e   : > { %v10582_v12 = vadd.f32 %v8374_v23, %v8324_v57  ;;  %8625 = vmatprep.mubr.msk.f32.mxu0 %vm513_vm1, %v2896_v28  ;;  %v8377_v24 = vpop.f32.mrf.mxu1  ;;  %8676 = vmatmul.mubr.msk.f32.gmra.mxu1 %vm513_vm1, %v3318_v26  ;;  %v2882_v28 = vrot.slane %v10578_v30, 6  ;;  %v10598_v23 = vld [vmem:[%s9377_s18 + $0xe0] sm:$0xff] }
 0x10f   : > { %v10589_v48 = vpop.f32.mrf.mxu0  ;;  %8678 = vmatprep.mubr.msk.f32.mxu1 %vm513_vm1, %v3317_v40  ;;  %12744 = vst [vmem:[#allocation16_spill] sm:$0xff] %v10598_v23  ;;  %v3306_v45 = vrot.slane %v10598_v23, 7  ;;  %v3315_v26 = vsel %vm12722_vm7, %v3304_v15, %v3305_v13  ;;  %v2883_v15 = vrot.slane %v10598_v23, 6 }
 0x110   : > { %12743 = vst [vmem:[#allocation15_spill] sm:$0xff] %v10589_v48  ;;  %v10601_v57 = vpop.f32.mrf.mxu1  ;;  %v10606_v48 = vld [vmem:[%s9377_s18 + $0xe8] sm:$0xff]  ;;  %v2892_v49 = vsel %vm12719_vm8, %v2881_v47, %v2882_v28 }
 0x111   : > { %12745 = vst [vmem:[#allocation17_spill] sm:$0xff] %v10601_v57  ;;  %12746 = vst [vmem:[#allocation18_spill] sm:$0xff] %v10606_v48  ;;  %v3307_v0 = vrot.slane %v10606_v48, 7  ;;  %v8327_v40 = vpop.f32.mrf.mxu0  ;;  %8626 = vmatmul.mubr.msk.f32.gmra.mxu0 %vm513_vm1, %v2895_v8  ;;  %v2893_v57 = vsel %vm12719_vm8, %v2880_v21, %v2881_v47  ;;  %v10626_v8 = vld [vmem:[%s9377_s18 + $0xf0] sm:$0xff] }
 0x112   : > { %v10610_v46 = vadd.f32 %v8377_v24, %v8327_v40  ;;  %8628 = vmatprep.mubr.msk.f32.mxu0 %vm513_vm1, %v2894_v2  ;;  %v8380_v30 = vpop.f32.mrf.mxu1  ;;  %8679 = vmatmul.mubr.msk.f32.gmra.mxu1 %vm513_vm1, %v3316_v53  ;;  %v3314_v24 = vsel %vm12722_vm7, %v3305_v13, %v3306_v45  ;;  %v2884_v2 = vrot.slane %v10606_v48, 6  ;;  %v3308_v21 = vrot.slane %v10626_v8, 7 }
 0x113   : > { %v10617_v52 = vpop.f32.mrf.mxu0  ;;  %8681 = vmatprep.mubr.msk.f32.mxu1 %vm513_vm1, %v3315_v26  ;;  %v3313_v53 = vsel %vm12722_vm7, %v3306_v45, %v3307_v0  ;;  %v2891_v48 = vsel %vm12719_vm8, %v2882_v28, %v2883_v15 }
 0x114   : > { %12747 = vst [vmem:[#allocation19_spill] sm:$0xff] %v10610_v46  ;;  %12748 = vst [vmem:[#allocation20_spill] sm:$0xff] %v10617_v52  ;;  %v10629_v40 = vpop.f32.mrf.mxu1  ;;  %v10634_v52 = vld [vmem:[%s9377_s18 + $0xf8] sm:$0xff]  ;;  %v2890_v46 = vsel %vm12719_vm8, %v2883_v15, %v2884_v2  ;;  %s9178_s18 = sshll.u32 %s9238_s25, 4  ;;  %s9179_s18 = int_to_ptr.vmem [resolvable:$false] %s9178_s18 }
 0x115   : > { %12749 = vst [vmem:[#allocation21_spill] sm:$0xff] %v10629_v40  ;;  %v3309_v47 = vrot.slane %v10634_v52, 7  ;;  %v8330_v23 = vpop.f32.mrf.mxu0  ;;  %8629 = vmatmul.mubr.msk.f32.gmra.mxu0 %vm513_vm1, %v2893_v57  ;;  %v2885_v40 = vrot.slane %v10626_v8, 6  ;;  %s9180_s1 = scalar_lea.vmem %s9179_s18, 32  ;;  %p9181_p0 = scmp.lt.s32.totalorder %s7223_s15, %s9179_s18 }
 0x116   : > { %v10638_v26 = vadd.f32 %v8380_v30, %v8330_v23  ;;  %8631 = vmatprep.mubr.msk.f32.mxu0 %vm513_vm1, %v2892_v49  ;;  %v8383_v13 = vpop.f32.mrf.mxu1  ;;  %8682 = vmatmul.mubr.msk.f32.gmra.mxu1 %vm513_vm1, %v3314_v24  ;;  %v3312_v30 = vsel %vm12722_vm7, %v3307_v0, %v3308_v21  ;;  %v2886_v49 = vrot.slane %v10634_v52, 6  ;;  %p9182_p1 = scmp.lt.s32.totalorder %s9180_s1, %s9174_s20 }
 0x117   : > { %v10645_v45 = vpop.f32.mrf.mxu0  ;;  %8684 = vmatprep.mubr.msk.f32.mxu1 %vm513_vm1, %v3313_v53  ;;  %v3311_v28 = vsel %vm12722_vm7, %v3308_v21, %v3309_v47  ;;  %v2889_v53 = vsel %vm12719_vm8, %v2884_v2, %v2885_v40  ;;  %v12751_v21 = vrot.slane %v10230_v27, 7 }
 0x118   : > { %12750 = vst [vmem:[#allocation22_spill] sm:$0xff] %v10645_v45  ;;  %v10653_v23 = vpop.f32.mrf.mxu1  ;;  %v2888_v45 = vsel %vm12719_vm8, %v2885_v40, %v2886_v49  ;;  %p9183_p2 = por %p9182_p1, %p9181_p0 }
 0x119   : > { %v8333_v57 = vpop.f32.mrf.mxu0  ;;  %8632 = vmatmul.mubr.msk.f32.gmra.mxu0 %vm513_vm1, %v2891_v48  ;;  %v3342_v48 = vsel %vm12722_vm7, %v3309_v47, %v12751_v21 }
 0x11a   : > { %v10658_v24 = vadd.f32 %v8383_v13, %v8333_v57  ;;  %8634 = vmatprep.mubr.msk.f32.mxu0 %vm513_vm1, %v2890_v46  ;;  %v8386_v15 = vpop.f32.mrf.mxu1  ;;  %8685 = vmatmul.mubr.msk.f32.gmra.mxu1 %vm513_vm1, %v3312_v30  ;;  %v12752_v57 = vrot.slane %v10230_v27, 6  ;;  %p9184_p3 = pnand %p9183_p2, %p9177_p13 }
 0x11b   : > { %v10664_v0 = vpop.f32.mrf.mxu0  ;;  %8687 = vmatprep.mubr.msk.f32.mxu1 %vm513_vm1, %v3311_v28 }
 0x11c   : > { %v10673_v13 = vpop.f32.mrf.mxu1  ;;  %v2919_v40 = vsel %vm12719_vm8, %v2886_v49, %v12752_v57 }
 0x11d   : > { %v8336_v46 = vpop.f32.mrf.mxu0  ;;  %8635 = vmatmul.mubr.msk.f32.gmra.mxu0 %vm513_vm1, %v2889_v53 }
 0x11e   : > { %v10676_v2 = vadd.f32 %v8386_v15, %v8336_v46  ;;  %8637 = vmatprep.mubr.msk.f32.mxu0 %vm513_vm1, %v2888_v45  ;;  %v8389_v30 = vpop.f32.mrf.mxu1  ;;  %8688 = vmatmul.mubr.msk.f32.gmra.mxu1 %vm513_vm1, %v3342_v48 }
 0x11f   : > { %v10684_v28 = vpop.f32.mrf.mxu0 }
 0x120   : > { %v10686_v47 = vpop.f32.mrf.mxu1 }
 0x121   : > { %v8339_v21 = vpop.f32.mrf.mxu0  ;;  %8638 = vmatmul.mubr.msk.f32.gmra.mxu0 %vm513_vm1, %v2919_v40 }
 0x122   : > { %v10689_v53 = vadd.f32 %v8389_v30, %v8339_v21  ;;  %8692 = vmatprep.mubr.msk.f32.mxu0 %vm513_vm1, %v10234_v9  ;;  %v8444_v45 = vpop.f32.mrf.mxu1 }
 0x123   : > { %v10693_v15 = vpop.f32.mrf.mxu0 }
 0x124   : > { %v10695_v46 = vpop.f32.mrf.mxu1 }
 0x125   : > { %v8394_v49 = vpop.f32.mrf.mxu0  ;;  %8693 = vmatmul.mubr.msk.f32.vlgmr.msra.gmra.mxu0 %vm513_vm1, %v10253_v20 }
 0x126   : > { %v1555_v48 = vadd.f32 %v8394_v49, %v10314_v36  ;;  %8695 = vmatprep.mubr.msk.f32.mxu0 %vm513_vm1, %v10262_v56  ;;  %v8447_v57 = vpop.f32.mrf.mxu1 }
 0x127   : > { %v1395_v30 = vpop.f32.mrf.mxu0 }
 0x128   : > { %v10703_v40 = vadd.f32 %v1395_v30, %v10333_v42  ;;  %v10705_v9 = vadd.f32 %v8444_v45, %v1555_v48  ;;  %v10707_v21 = vpop.f32.mrf.mxu1 }
 0x129   : > { %v8397_v5 = vpop.f32.mrf.mxu0  ;;  %8696 = vmatmul.mubr.msk.f32.gmra.mxu0 %vm513_vm1, %v10282_v6 }
 0x12a   : > { %v1557_v20 = vadd.f32 %v8397_v5, %v10342_v19  ;;  %8698 = vmatprep.mubr.msk.f32.mxu0 %vm513_vm1, %v10288_v35  ;;  %v8450_v36 = vpop.f32.mrf.mxu1 }
 0x12b   : > { %v1405_v56 = vpop.f32.mrf.mxu0 }
 0x12c   : > { %v10715_v49 = vadd.f32 %v1405_v56, %v10359_v51  ;;  %v10717_v42 = vadd.f32 %v8447_v57, %v1557_v20  ;;  %v10719_v45 = vpop.f32.mrf.mxu1 }
 0x12d   : > { %v8400_v48 = vpop.f32.mrf.mxu0  ;;  %8699 = vmatmul.mubr.msk.f32.gmra.mxu0 %vm513_vm1, %v10304_v7 }
 0x12e   : > { %v1559_v6 = vadd.f32 %v8400_v48, %v10368_v38  ;;  %8701 = vmatprep.mubr.msk.f32.mxu0 %vm513_vm1, %v10310_v16  ;;  %v8453_v5 = vpop.f32.mrf.mxu1 }
 0x12f   : > { %v1415_v35 = vpop.f32.mrf.mxu0 }
 0x130   : > { %v10727_v19 = vadd.f32 %v1415_v35, %v10385_v1  ;;  %v10729_v51 = vadd.f32 %v8450_v36, %v1559_v6  ;;  %v10731_v57 = vpop.f32.mrf.mxu1 }
 0x131   : > { %v8403_v30 = vpop.f32.mrf.mxu0  ;;  %8702 = vmatmul.mubr.msk.f32.gmra.mxu0 %vm513_vm1, %v10328_v41 }
 0x132   : > { %v1561_v7 = vadd.f32 %v8403_v30, %v10394_v61  ;;  %8704 = vmatprep.mubr.msk.f32.mxu0 %vm513_vm1, %v10338_v33  ;;  %v8456_v38 = vpop.f32.mrf.mxu1 }
 0x133   : > { %v1425_v16 = vpop.f32.mrf.mxu0 }
 0x134   : > { %v10739_v20 = vadd.f32 %v1425_v16, %v10411_v11  ;;  %v10741_v1 = vadd.f32 %v8453_v5, %v1561_v7  ;;  %v10743_v36 = vpop.f32.mrf.mxu1 }
 0x135   : > { %v8406_v56 = vpop.f32.mrf.mxu0  ;;  %8705 = vmatmul.mubr.msk.f32.gmra.mxu0 %vm513_vm1, %v10356_v14 }
 0x136   : > { %v1563_v41 = vadd.f32 %v8406_v56, %v10420_v18  ;;  %8707 = vmatprep.mubr.msk.f32.mxu0 %vm513_vm1, %v10364_v54  ;;  %v8459_v61 = vpop.f32.mrf.mxu1 }
 0x137   : > { %v1435_v33 = vpop.f32.mrf.mxu0 }
 0x138   : > { %v10751_v48 = vadd.f32 %v1435_v33, %v10437_v31  ;;  %v10753_v11 = vadd.f32 %v8456_v38, %v1563_v41  ;;  %v10755_v6 = vpop.f32.mrf.mxu1 }
 0x139   : > { %v8409_v5 = vpop.f32.mrf.mxu0  ;;  %8708 = vmatmul.mubr.msk.f32.gmra.mxu0 %vm513_vm1, %v10382_v50 }
 0x13a   : > { %v1565_v14 = vadd.f32 %v8409_v5, %v10446_v60  ;;  %8710 = vmatprep.mubr.msk.f32.mxu0 %vm513_vm1, %v10390_v29  ;;  %v8462_v18 = vpop.f32.mrf.mxu1 }
 0x13b   : > { %v1445_v54 = vpop.f32.mrf.mxu0 }
 0x13c   : > { %v10763_v35 = vadd.f32 %v1445_v54, %v10463_v63  ;;  %v10765_v31 = vadd.f32 %v8459_v61, %v1565_v14  ;;  %v10767_v30 = vpop.f32.mrf.mxu1 }
 0x13d   : > { %12753 = vst [vmem:[#allocation23_spill] sm:$0xff] %v10767_v30  ;;  %v8412_v7 = vpop.f32.mrf.mxu0  ;;  %8711 = vmatmul.mubr.msk.f32.gmra.mxu0 %vm513_vm1, %v10408_v3 }
 0x13e   : > { %v1567_v50 = vadd.f32 %v8412_v7, %v10472_v25  ;;  %8713 = vmatprep.mubr.msk.f32.mxu0 %vm513_vm1, %v10416_v32  ;;  %v8465_v60 = vpop.f32.mrf.mxu1 }
 0x13f   : > { %v1455_v29 = vpop.f32.mrf.mxu0 }
 0x140   : > { %v10775_v38 = vadd.f32 %v1455_v29, %v10489_v44  ;;  %v10777_v63 = vadd.f32 %v8462_v18, %v1567_v50  ;;  %v10779_v16 = vpop.f32.mrf.mxu1 }
 0x141   : > { %12755 = vst [vmem:[#allocation25_spill] sm:$0xff] %v10779_v16  ;;  %v8415_v56 = vpop.f32.mrf.mxu0  ;;  %8714 = vmatmul.mubr.msk.f32.gmra.mxu0 %vm513_vm1, %v10434_v55 }
 0x142   : > { %12754 = vst [vmem:[#allocation24_spill] sm:$0xff] %v10775_v38  ;;  %v1569_v3 = vadd.f32 %v8415_v56, %v10498_v39  ;;  %8716 = vmatprep.mubr.msk.f32.mxu0 %vm513_vm1, %v10442_v59  ;;  %v8468_v25 = vpop.f32.mrf.mxu1  ;;  %v12764_v56 = vld [vmem:[#allocation8_spill] sm:$0xff] }
 0x143   : > { %v1465_v32 = vpop.f32.mrf.mxu0 }
 0x144   : > { %v10787_v41 = vadd.f32 %v1465_v32, %v10515_v58  ;;  %v10789_v44 = vadd.f32 %v8465_v60, %v1569_v3  ;;  %v10791_v61 = vpop.f32.mrf.mxu1  ;;  %v12765_v3 = vld [vmem:[#allocation19_spill] sm:$0xff]  ;;  %v12766_v32 = vld [vmem:[#allocation10_spill] sm:$0xff] }
 0x145   : > { %12757 = vst [vmem:[#allocation27_spill] sm:$0xff] %v10791_v61  ;;  %v8418_v33 = vpop.f32.mrf.mxu0  ;;  %8717 = vmatmul.mubr.msk.f32.gmra.mxu0 %vm513_vm1, %v10460_v62 }
 0x146   : > { %12756 = vst [vmem:[#allocation26_spill] sm:$0xff] %v10787_v41  ;;  %v1571_v55 = vadd.f32 %v8418_v33, %v10526_v10  ;;  %8719 = vmatprep.mubr.msk.f32.mxu0 %vm513_vm1, %v10468_v4  ;;  %v8471_v39 = vpop.f32.mrf.mxu1 }
 0x147   : > { %v10798_v59 = vpop.f32.mrf.mxu0 }
 0x148   : > { %12758 = vst [vmem:[#allocation28_spill] sm:$0xff] %v10798_v59  ;;  %v10800_v5 = vadd.f32 %v8468_v25, %v1571_v55  ;;  %v10802_v58 = vpop.f32.mrf.mxu1 }
 0x149   : > { %12759 = vst [vmem:[#allocation29_spill] sm:$0xff] %v10802_v58  ;;  %v8421_v14 = vpop.f32.mrf.mxu0  ;;  %8720 = vmatmul.mubr.msk.f32.gmra.mxu0 %vm513_vm1, %v10486_v43 }
 0x14a   : > { %v1573_v18 = vadd.f32 %v8421_v14, %v10554_v22  ;;  %8722 = vmatprep.mubr.msk.f32.mxu0 %vm513_vm1, %v10494_v37  ;;  %v8474_v62 = vpop.f32.mrf.mxu1 }
 0x14b   : > { %v10809_v10 = vpop.f32.mrf.mxu0 }
 0x14c   : > { %12760 = vst [vmem:[#allocation30_spill] sm:$0xff] %v10809_v10  ;;  %v10811_v4 = vadd.f32 %v8471_v39, %v1573_v18  ;;  %v10813_v54 = vpop.f32.mrf.mxu1  ;;  %v12769_v39 = vld [vmem:[#allocation12_spill] sm:$0xff]  ;;  %v12770_v18 = vld [vmem:[#allocation14_spill] sm:$0xff] }
 0x14d   : > { %12761 = vst [vmem:[#allocation31_spill] sm:$0xff] %v10813_v54  ;;  %v8424_v7 = vpop.f32.mrf.mxu0  ;;  %8723 = vmatmul.mubr.msk.f32.gmra.mxu0 %vm513_vm1, %v10512_v34 }
 0x14e   : > { %v1575_v50 = vadd.f32 %v8424_v7, %v10582_v12  ;;  %8725 = vmatprep.mubr.msk.f32.mxu0 %vm513_vm1, %v10522_v17  ;;  %v8477_v43 = vpop.f32.mrf.mxu1 }
 0x14f   : > { %v10820_v22 = vpop.f32.mrf.mxu0 }
 0x150   : > { %12762 = vst [vmem:[#allocation32_spill] sm:$0xff] %v10820_v22  ;;  %v10822_v37 = vadd.f32 %v8474_v62, %v1575_v50  ;;  %v10824_v60 = vpop.f32.mrf.mxu1 }
 0x151   : > { %12763 = vst [vmem:[#allocation33_spill] sm:$0xff] %v10824_v60  ;;  %v8427_v29 = vpop.f32.mrf.mxu0  ;;  %8726 = vmatmul.mubr.msk.f32.gmra.mxu0 %vm513_vm1, %v12764_v56  ;;  %v12772_v56 = vld [vmem:[#allocation16_spill] sm:$0xff] }
 0x152   : > { %v1577_v25 = vadd.f32 %v8427_v29, %v12765_v3  ;;  %8728 = vmatprep.mubr.msk.f32.mxu0 %vm513_vm1, %v12766_v32  ;;  %v8480_v34 = vpop.f32.mrf.mxu1 }
 0x153   : > { %v10831_v12 = vpop.f32.mrf.mxu0 }
 0x154   : > { %12767 = vst [vmem:[#allocation8_spill] sm:$0xff] %v10831_v12  ;;  %v10833_v17 = vadd.f32 %v8477_v43, %v1577_v25  ;;  %v10835_v33 = vpop.f32.mrf.mxu1  ;;  %v12773_v25 = vld [vmem:[#allocation18_spill] sm:$0xff] }
 0x155   : > { %12768 = vst [vmem:[#allocation19_spill] sm:$0xff] %v10835_v33  ;;  %v8430_v55 = vpop.f32.mrf.mxu0  ;;  %8729 = vmatmul.mubr.msk.f32.gmra.mxu0 %vm513_vm1, %v12769_v39 }
 0x156   : > { %v1579_v14 = vadd.f32 %v8430_v55, %v10638_v26  ;;  %8731 = vmatprep.mubr.msk.f32.mxu0 %vm513_vm1, %v12770_v18  ;;  %v8483_v62 = vpop.f32.mrf.mxu1 }
 0x157   : > { %v10842_v7 = vpop.f32.mrf.mxu0 }
 0x158   : > { %12771 = vst [vmem:[#allocation10_spill] sm:$0xff] %v10842_v7  ;;  %v10844_v50 = vadd.f32 %v8480_v34, %v1579_v14  ;;  %v10846_v29 = vpop.f32.mrf.mxu1 }
 0x159   : > { %v8433_v43 = vpop.f32.mrf.mxu0  ;;  %8732 = vmatmul.mubr.msk.f32.gmra.mxu0 %vm513_vm1, %v12772_v56 }
 0x15a   : > { %v1581_v3 = vadd.f32 %v8433_v43, %v10658_v24  ;;  %8734 = vmatprep.mubr.msk.f32.mxu0 %vm513_vm1, %v12773_v25  ;;  %v8486_v26 = vpop.f32.mrf.mxu1 }
 0x15b   : > { %v10853_v32 = vpop.f32.mrf.mxu0 }
 0x15c   : > { %v10855_v55 = vadd.f32 %v8483_v62, %v1581_v3  ;;  %v10857_v39 = vpop.f32.mrf.mxu1 }
 0x15d   : > { %v8436_v34 = vpop.f32.mrf.mxu0  ;;  %8735 = vmatmul.mubr.msk.f32.gmra.mxu0 %vm513_vm1, %v10626_v8 }
 0x15e   : > { %v1583_v14 = vadd.f32 %v8436_v34, %v10676_v2  ;;  %8737 = vmatprep.mubr.msk.f32.mxu0 %vm513_vm1, %v10634_v52  ;;  %v8489_v24 = vpop.f32.mrf.mxu1 }
 0x15f   : > { %v10864_v18 = vpop.f32.mrf.mxu0 }
 0x160   : > { %v10866_v43 = vadd.f32 %v8486_v26, %v1583_v14  ;;  %v10868_v56 = vpop.f32.mrf.mxu1 }
 0x161   : > { %v8439_v62 = vpop.f32.mrf.mxu0  ;;  %8738 = vmatmul.mubr.msk.f32.gmra.mxu0 %vm513_vm1, %v10230_v27 }
 0x162   : > { %v1585_v3 = vadd.f32 %v8439_v62, %v10689_v53  ;;  %v8544_v25 = vpop.f32.mrf.mxu1 }
 0x163   : > { %v10873_v8 = vpop.f32.mrf.mxu0 }
 0x164   : > { %v10875_v2 = vadd.f32 %v8489_v24, %v1585_v3  ;;  %v10877_v34 = vpop.f32.mrf.mxu1 }
 0x165   : > { %v8494_v52 = vpop.f32.mrf.mxu0 }
 0x166   : > { %v2401_v33 = vadd.f32 %v8494_v52, %v10705_v9  ;;  %v8547_v26 = vpop.f32.mrf.mxu1 }
 0x167   : > { %v10880_v14 = vpop.f32.mrf.mxu0 }
 0x168   : > { %v10882_v7 = vadd.f32 %v8544_v25, %v2401_v33  ;;  %v10884_v60 = vpop.f32.mrf.mxu1 }
 0x169   : > { %v8497_v27 = vpop.f32.mrf.mxu0 }
 0x16a   : > { %v2403_v53 = vadd.f32 %v8497_v27, %v10717_v42  ;;  %v8550_v62 = vpop.f32.mrf.mxu1 }
 0x16b   : > { %v10887_v12 = vpop.f32.mrf.mxu0 }
 0x16c   : > { %v10889_v24 = vadd.f32 %v8547_v26, %v2403_v53  ;;  %v10891_v3 = vpop.f32.mrf.mxu1 }
 0x16d   : > { %v8500_v54 = vpop.f32.mrf.mxu0 }
 0x16e   : > { %v2405_v9 = vadd.f32 %v8500_v54, %v10729_v51  ;;  %v8553_v52 = vpop.f32.mrf.mxu1 }
 0x16f   : > { %v10894_v22 = vpop.f32.mrf.mxu0 }
 0x170   : > { %v10896_v33 = vadd.f32 %v8550_v62, %v2405_v9  ;;  %v10898_v25 = vpop.f32.mrf.mxu1 }
 0x171   : > { %v8503_v58 = vpop.f32.mrf.mxu0 }
 0x172   : > { %v2407_v42 = vadd.f32 %v8503_v58, %v10741_v1  ;;  %v8556_v27 = vpop.f32.mrf.mxu1 }
 0x173   : > { %v10901_v10 = vpop.f32.mrf.mxu0 }
 0x174   : > { %v10903_v26 = vadd.f32 %v8553_v52, %v2407_v42  ;;  %v10905_v53 = vpop.f32.mrf.mxu1 }
 0x175   : > { %v8506_v61 = vpop.f32.mrf.mxu0 }
 0x176   : > { %v2409_v51 = vadd.f32 %v8506_v61, %v10753_v11  ;;  %v8559_v54 = vpop.f32.mrf.mxu1 }
 0x177   : > { %v10908_v59 = vpop.f32.mrf.mxu0 }
 0x178   : > { %v10910_v62 = vadd.f32 %v8556_v27, %v2409_v51  ;;  %v10912_v9 = vpop.f32.mrf.mxu1 }
 0x179   : > { %12775 = vst [vmem:[#allocation14_spill] sm:$0xff] %v10912_v9  ;;  %v8509_v16 = vpop.f32.mrf.mxu0 }
 0x17a   : > { %12774 = vst [vmem:[#allocation12_spill] sm:$0xff] %v10910_v62  ;;  %v2411_v1 = vadd.f32 %v8509_v16, %v10765_v31  ;;  %v8562_v58 = vpop.f32.mrf.mxu1 }
 0x17b   : > { %v10915_v41 = vpop.f32.mrf.mxu0 }
 0x17c   : > { %v10917_v52 = vadd.f32 %v8559_v54, %v2411_v1  ;;  %v10919_v42 = vpop.f32.mrf.mxu1 }
 0x17d   : > { %12777 = vst [vmem:[#allocation18_spill] sm:$0xff] %v10919_v42  ;;  %v8512_v30 = vpop.f32.mrf.mxu0 }
 0x17e   : > { %12776 = vst [vmem:[#allocation16_spill] sm:$0xff] %v10917_v52  ;;  %v2413_v11 = vadd.f32 %v8512_v30, %v10777_v63  ;;  %v8565_v61 = vpop.f32.mrf.mxu1 }
 0x17f   : > { %v10922_v38 = vpop.f32.mrf.mxu0 }
 0x180   : > { %v10924_v27 = vadd.f32 %v8562_v58, %v2413_v11  ;;  %v10926_v51 = vpop.f32.mrf.mxu1 }
 0x181   : > { %12779 = vst [vmem:[#allocation35_spill] sm:$0xff] %v10926_v51  ;;  %v8515_v9 = vpop.f32.mrf.mxu0 }
 0x182   : > { %12778 = vst [vmem:[#allocation34_spill] sm:$0xff] %v10924_v27  ;;  %v2415_v31 = vadd.f32 %v8515_v9, %v10789_v44  ;;  %v8568_v16 = vpop.f32.mrf.mxu1 }
 0x183   : > { %v10929_v62 = vpop.f32.mrf.mxu0 }
 0x184   : > { %v10931_v54 = vadd.f32 %v8565_v61, %v2415_v31  ;;  %v10933_v1 = vpop.f32.mrf.mxu1 }
 0x185   : > { %12781 = vst [vmem:[#allocation37_spill] sm:$0xff] %v10933_v1  ;;  %v8518_v42 = vpop.f32.mrf.mxu0 }
 0x186   : > { %12780 = vst [vmem:[#allocation36_spill] sm:$0xff] %v10931_v54  ;;  %v2417_v30 = vadd.f32 %v8518_v42, %v10800_v5  ;;  %v8571_v63 = vpop.f32.mrf.mxu1 }
 0x187   : > { %v10936_v52 = vpop.f32.mrf.mxu0 }
 0x188   : > { %v10938_v58 = vadd.f32 %v8568_v16, %v2417_v30  ;;  %v10940_v11 = vpop.f32.mrf.mxu1 }
 0x189   : > { %12783 = vst [vmem:[#allocation39_spill] sm:$0xff] %v10940_v11  ;;  %v8521_v51 = vpop.f32.mrf.mxu0 }
 0x18a   : > { %12782 = vst [vmem:[#allocation38_spill] sm:$0xff] %v10938_v58  ;;  %v2419_v44 = vadd.f32 %v8521_v51, %v10811_v4  ;;  %v8574_v9 = vpop.f32.mrf.mxu1 }
 0x18b   : > { %v10943_v27 = vpop.f32.mrf.mxu0 }
 0x18c   : > { %v10945_v61 = vadd.f32 %v8571_v63, %v2419_v44  ;;  %v10947_v31 = vpop.f32.mrf.mxu1  ;;  %v1135_v63 = vadd.f32 %v10653_v23, %v10664_v0 }
 0x18d   : > { %12784 = vst [vmem:[#allocation40_spill] sm:$0xff] %v10947_v31  ;;  %v8524_v1 = vpop.f32.mrf.mxu0 }
 0x18e   : > { %v2421_v5 = vadd.f32 %v8524_v1, %v10822_v37  ;;  %v8577_v42 = vpop.f32.mrf.mxu1  ;;  %v1580_v1 = vadd.f32 %v10853_v32, %v1135_v63 }
 0x18f   : > { %v10950_v54 = vpop.f32.mrf.mxu0 }
 0x190   : > { %v10952_v16 = vadd.f32 %v8574_v9, %v2421_v5  ;;  %v10954_v30 = vpop.f32.mrf.mxu1  ;;  %v2003_v23 = vadd.f32 %v10846_v29, %v1580_v1 }
 0x191   : > { %12786 = vst [vmem:[#allocation42_spill] sm:$0xff] %v10954_v30  ;;  %v8527_v11 = vpop.f32.mrf.mxu0 }
 0x192   : > { %12785 = vst [vmem:[#allocation41_spill] sm:$0xff] %v10952_v16  ;;  %v2423_v4 = vadd.f32 %v8527_v11, %v10833_v17  ;;  %v8580_v51 = vpop.f32.mrf.mxu1  ;;  %v1145_v17 = vadd.f32 %v10673_v13, %v10684_v28 }
 0x193   : > { %v10957_v58 = vpop.f32.mrf.mxu0 }
 0x194   : > { %12787 = vst [vmem:[#allocation43_spill] sm:$0xff] %v10957_v58  ;;  %v10961_v44 = vadd.f32 %v8577_v42, %v2423_v4  ;;  %v10963_v31 = vpop.f32.mrf.mxu1  ;;  %v1582_v0 = vadd.f32 %v10864_v18, %v1145_v17 }
 0x195   : > { %12788 = vst [vmem:[#allocation44_spill] sm:$0xff] %v10963_v31  ;;  %v8530_v37 = vpop.f32.mrf.mxu0 }
 0x196   : > { %v2425_v9 = vadd.f32 %v8530_v37, %v10844_v50  ;;  %v8583_v5 = vpop.f32.mrf.mxu1  ;;  %v1155_v50 = vadd.f32 %v10686_v47, %v10693_v15  ;;  %v2005_v28 = vadd.f32 %v10857_v39, %v1582_v0 }
 0x197   : > { %v10967_v30 = vpop.f32.mrf.mxu0 }
 0x198   : > { %v10971_v11 = vadd.f32 %v8580_v51, %v2425_v9  ;;  %v2794_v16 = vpop.f32.mrf.mxu1  ;;  %v1584_v51 = vadd.f32 %v10873_v8, %v1155_v50 }
 0x199   : > { %v8533_v58 = vpop.f32.mrf.mxu0 }
 0x19a   : > { %v2427_v42 = vadd.f32 %v8533_v58, %v10855_v55  ;;  %v8586_v4 = vpop.f32.mrf.mxu1  ;;  %v1977_v58 = vadd.f32 %v10695_v46, %v10703_v40  ;;  %v2007_v39 = vadd.f32 %v10868_v56, %v1584_v51  ;;  %v1979_v46 = vadd.f32 %v10707_v21, %v10715_v49 }
 0x19b   : > { %v2371_v32 = vpop.f32.mrf.mxu0 }
 0x19c   : > { %v2426_v63 = vadd.f32 %v2371_v32, %v2003_v23  ;;  %v10978_v37 = vadd.f32 %v8583_v5, %v2427_v42  ;;  %v2804_v31 = vpop.f32.mrf.mxu1  ;;  %v2400_v8 = vadd.f32 %v10880_v14, %v1977_v58  ;;  %v2402_v56 = vadd.f32 %v10887_v12, %v1979_v46 }
 0x19d   : > { %v8536_v13 = vpop.f32.mrf.mxu0 }
 0x19e   : > { %v2429_v29 = vadd.f32 %v8536_v13, %v10866_v43  ;;  %v10983_v1 = vadd.f32 %v2794_v16, %v2426_v63  ;;  %v10985_v18 = vpop.f32.mrf.mxu1  ;;  %v2825_v49 = vadd.f32 %v10884_v60, %v2402_v56 }
 0x19f   : > { %v2381_v55 = vpop.f32.mrf.mxu0 }
 0x1a0   : > { %v2428_v47 = vadd.f32 %v2381_v55, %v2005_v28  ;;  %v10989_v15 = vadd.f32 %v8586_v4, %v2429_v29  ;;  %v10991_v9 = vpop.f32.mrf.mxu1  ;;  %v2823_v4 = vadd.f32 %v10877_v34, %v2400_v8  ;;  %v1983_v29 = vadd.f32 %v10731_v57, %v10739_v20 }
 0x1a1   : > { %v8539_v5 = vpop.f32.mrf.mxu0  ;;  %v1985_v8 = vadd.f32 %v10743_v36, %v10751_v48 }
 0x1a2   : > { %v10996_v43 = vadd.f32 %v8539_v5, %v10875_v2  ;;  %v10998_v16 = vadd.f32 %v2804_v31, %v2428_v47  ;;  %v8644_v17 = vpop.f32.mrf.mxu1  ;;  %v1981_v31 = vadd.f32 %v10719_v45, %v10727_v19  ;;  %v2406_v60 = vadd.f32 %v10901_v10, %v1983_v29 }
 0x1a3   : > { %v2391_v23 = vpop.f32.mrf.mxu0 }
 0x1a4   : > { %v11002_v40 = vadd.f32 %v2391_v23, %v2007_v39  ;;  %v3510_v0 = vpop.f32.mrf.mxu1  ;;  %v2404_v28 = vadd.f32 %v10894_v22, %v1981_v31  ;;  %v2829_v46 = vadd.f32 %v10898_v25, %v2406_v60  ;;  %v12796_v60 = vld [vmem:[#allocation26_spill] sm:$0xff] }
 0x1a5   : > { %v8594_v42 = vpop.f32.mrf.mxu0 }
 0x1a6   : > { %v3247_v14 = vadd.f32 %v8594_v42, %v10882_v7  ;;  %v8647_v32 = vpop.f32.mrf.mxu1  ;;  %v2827_v47 = vadd.f32 %v10891_v3, %v2404_v28  ;;  %v2408_v3 = vadd.f32 %v10908_v59, %v1985_v8 }
 0x1a7   : > { %v3087_v2 = vpop.f32.mrf.mxu0 }
 0x1a8   : > { %v3246_v50 = vadd.f32 %v3087_v2, %v2823_v4  ;;  %v11009_v63 = vadd.f32 %v8644_v17, %v3247_v14  ;;  %v3520_v13 = vpop.f32.mrf.mxu1  ;;  %v1987_v4 = vadd.f32 %v10755_v6, %v10763_v35  ;;  %v2831_v25 = vadd.f32 %v10905_v53, %v2408_v3  ;;  %v12791_v6 = vld [vmem:[#allocation23_spill] sm:$0xff]  ;;  %v12793_v53 = vld [vmem:[#allocation6_spill] sm:$0xff]  ;;  %v12800_v3 = vld [vmem:[#allocation9_spill] sm:$0xff] }
 0x1a9   : > { %v8597_v21 = vpop.f32.mrf.mxu0 }
 0x1aa   : > { %v3249_v34 = vadd.f32 %v8597_v21, %v10889_v24  ;;  %v11014_v51 = vadd.f32 %v3510_v0, %v3246_v50  ;;  %v8650_v12 = vpop.f32.mrf.mxu1  ;;  %v2410_v59 = vadd.f32 %v10915_v41, %v1987_v4  ;;  %v12794_v41 = vld [vmem:[#allocation14_spill] sm:$0xff] }
 0x1ab   : > { %v3097_v7 = vpop.f32.mrf.mxu0 }
 0x1ac   : > { %v3248_v55 = vadd.f32 %v3097_v7, %v2825_v49  ;;  %v11018_v45 = vadd.f32 %v8647_v32, %v3249_v34  ;;  %v3530_v19 = vpop.f32.mrf.mxu1  ;;  %v12789_v32 = vld [vmem:[#allocation12_spill] sm:$0xff]  ;;  %v12792_v34 = vld [vmem:[#allocation7_spill] sm:$0xff]  ;;  %v2833_v7 = vadd.f32 %v12794_v41, %v2410_v59 }
 0x1ad   : > { %v8600_v58 = vpop.f32.mrf.mxu0  ;;  %v12807_v41 = vld [vmem:[#allocation35_spill] sm:$0xff] }
 0x1ae   : > { %v3251_v22 = vadd.f32 %v8600_v58, %v10896_v33  ;;  %v11023_v5 = vadd.f32 %v3520_v13, %v3248_v55  ;;  %v8653_v24 = vpop.f32.mrf.mxu1  ;;  %v12790_v13 = vld [vmem:[#allocation24_spill] sm:$0xff] }
 0x1af   : > { %v3107_v39 = vpop.f32.mrf.mxu0  ;;  %v1989_v35 = vadd.f32 %v12791_v6, %v12790_v13  ;;  %v12795_v55 = vld [vmem:[#allocation16_spill] sm:$0xff]  ;;  %v12804_v13 = vld [vmem:[#allocation30_spill] sm:$0xff] }
 0x1b0   : > { %v3250_v17 = vadd.f32 %v3107_v39, %v2827_v47  ;;  %v11027_v57 = vadd.f32 %v8650_v12, %v3251_v22  ;;  %v3540_v20 = vpop.f32.mrf.mxu1  ;;  %v1085_v12 = vadd.f32 %v12793_v53, %v12792_v34  ;;  %v12797_v22 = vld [vmem:[#allocation25_spill] sm:$0xff]  ;;  %v12798_v39 = vld [vmem:[#allocation28_spill] sm:$0xff]  ;;  %v12805_v34 = vld [vmem:[#allocation15_spill] sm:$0xff] }
 0x1b1   : > { %v8603_v23 = vpop.f32.mrf.mxu0  ;;  %v2412_v29 = vadd.f32 %v10922_v38, %v1989_v35  ;;  %v12801_v38 = vld [vmem:[#allocation18_spill] sm:$0xff]  ;;  %v12806_v53 = vld [vmem:[#allocation13_spill] sm:$0xff] }
 0x1b2   : > { %v3253_v10 = vadd.f32 %v8603_v23, %v10903_v26  ;;  %v11032_v0 = vadd.f32 %v3530_v19, %v3250_v17  ;;  %v11034_v33 = vpop.f32.mrf.mxu1  ;;  %v1570_v8 = vadd.f32 %v12798_v39, %v1085_v12  ;;  %v1105_v12 = vadd.f32 %v12806_v53, %v12805_v34  ;;  %v12810_v39 = vld [vmem:[#allocation32_spill] sm:$0xff] }
 0x1b3   : > { %v3117_v42 = vpop.f32.mrf.mxu0 }
 0x1b4   : > { %v3252_v36 = vadd.f32 %v3117_v42, %v2829_v46  ;;  %v11038_v48 = vadd.f32 %v8653_v24, %v3253_v10  ;;  %v11040_v56 = vpop.f32.mrf.mxu1  ;;  %v1991_v24 = vadd.f32 %v12797_v22, %v12796_v60  ;;  %v12799_v46 = vld [vmem:[#allocation11_spill] sm:$0xff]  ;;  %v2835_v42 = vadd.f32 %v12801_v38, %v2412_v29  ;;  %v12808_v29 = vld [vmem:[#allocation36_spill] sm:$0xff]  ;;  %v12809_v22 = vld [vmem:[#allocation29_spill] sm:$0xff] }
 0x1b5   : > { %v8606_v14 = vpop.f32.mrf.mxu0  ;;  %v1095_v10 = vadd.f32 %v12800_v3, %v12799_v46  ;;  %v12811_v3 = vld [vmem:[#allocation20_spill] sm:$0xff] }
 0x1b6   : > { %v11045_v26 = vadd.f32 %v8606_v14, %v12789_v32  ;;  %v11047_v2 = vadd.f32 %v3540_v20, %v3252_v36  ;;  %v11049_v31 = vpop.f32.mrf.mxu1  ;;  %v2414_v4 = vadd.f32 %v10929_v62, %v1991_v24  ;;  %v12802_v36 = vld [vmem:[#allocation34_spill] sm:$0xff]  ;;  %v12803_v32 = vld [vmem:[#allocation27_spill] sm:$0xff] }
 0x1b7   : > { %v3127_v50 = vpop.f32.mrf.mxu0  ;;  %v1572_v6 = vadd.f32 %v12804_v13, %v1095_v10  ;;  %v12812_v10 = vld [vmem:[#allocation17_spill] sm:$0xff]  ;;  %v12815_v13 = vld [vmem:[#allocation31_spill] sm:$0xff] }
 0x1b8   : > { %v11053_v21 = vadd.f32 %v3127_v50, %v2831_v25  ;;  %v11055_v49 = vpop.f32.mrf.mxu1  ;;  %v1993_v50 = vadd.f32 %v12803_v32, %v1570_v8  ;;  %v1574_v8 = vadd.f32 %v12810_v39, %v1105_v12  ;;  %v1115_v38 = vadd.f32 %v12812_v10, %v12811_v3  ;;  %v12821_v3 = vld [vmem:[#allocation10_spill] sm:$0xff] }
 0x1b9   : > { %v8609_v28 = vpop.f32.mrf.mxu0  ;;  %v1995_v24 = vadd.f32 %v12809_v22, %v1572_v6 }
 0x1ba   : > { %v11062_v19 = vadd.f32 %v8609_v28, %v12795_v55  ;;  %v11064_v58 = vpop.f32.mrf.mxu1  ;;  %v2416_v62 = vadd.f32 %v10936_v52, %v1993_v50  ;;  %v1997_v6 = vadd.f32 %v12815_v13, %v1574_v8 }
 0x1bb   : > { %v3137_v47 = vpop.f32.mrf.mxu0  ;;  %v2418_v52 = vadd.f32 %v10943_v27, %v1995_v24 }
 0x1bc   : > { %v11069_v17 = vadd.f32 %v3137_v47, %v2833_v7  ;;  %v11071_v20 = vpop.f32.mrf.mxu1  ;;  %v2837_v7 = vadd.f32 %v12807_v41, %v2414_v4  ;;  %v12817_v41 = vld [vmem:[#allocation22_spill] sm:$0xff]  ;;  %v2420_v27 = vadd.f32 %v10950_v54, %v1997_v6  ;;  %v12824_v54 = vld [vmem:[#allocation41_spill] sm:$0xff] }
 0x1bd   : > { %v8612_v23 = vpop.f32.mrf.mxu0 }
 0x1be   : > { %v11078_v14 = vadd.f32 %v8612_v23, %v12802_v36  ;;  %v11080_v25 = vpop.f32.mrf.mxu1  ;;  %v12814_v36 = vld [vmem:[#allocation38_spill] sm:$0xff] }
 0x1bf   : > { %v3147_v59 = vpop.f32.mrf.mxu0 }
 0x1c0   : > { %v11084_v35 = vadd.f32 %v3147_v59, %v2835_v42  ;;  %v11093_v47 = vpop.f32.mrf.mxu1  ;;  %v12813_v42 = vld [vmem:[#allocation37_spill] sm:$0xff] }
 0x1c1   : > { %v8615_v28 = vpop.f32.mrf.mxu0  ;;  %v2839_v4 = vadd.f32 %v12813_v42, %v2416_v62 }
 0x1c2   : > { %v11091_v55 = vadd.f32 %v8615_v28, %v12808_v29  ;;  %v11106_v32 = vpop.f32.mrf.mxu1  ;;  %v12816_v28 = vld [vmem:[#allocation8_spill] sm:$0xff] }
 0x1c3   : > { %v3157_v60 = vpop.f32.mrf.mxu0  ;;  %v1576_v34 = vadd.f32 %v12816_v28, %v1115_v38  ;;  %v12825_v28 = vld [vmem:[#allocation19_spill] sm:$0xff] }
 0x1c4   : > { %v11097_v23 = vadd.f32 %v3157_v60, %v2837_v7  ;;  %v12818_v7 = vld [vmem:[#allocation21_spill] sm:$0xff]  ;;  %v12819_v60 = vld [vmem:[#allocation39_spill] sm:$0xff]  ;;  %v11119_v24 = vpop.f32.mrf.mxu1 }
 0x1c5   : > { %v8618_v46 = vpop.f32.mrf.mxu0  ;;  %v1125_v29 = vadd.f32 %v12818_v7, %v12817_v41  ;;  %v2841_v62 = vadd.f32 %v12819_v60, %v2418_v52  ;;  %v12826_v7 = vld [vmem:[#allocation42_spill] sm:$0xff] }
 0x1c6   : > { %v11104_v59 = vadd.f32 %v8618_v46, %v12814_v36  ;;  %v12820_v46 = vld [vmem:[#allocation33_spill] sm:$0xff]  ;;  %v11127_v52 = vpop.f32.mrf.mxu1 }
 0x1c7   : > { %v3167_v50 = vpop.f32.mrf.mxu0  ;;  %v1999_v8 = vadd.f32 %v12820_v46, %v1576_v34  ;;  %v1578_v10 = vadd.f32 %v12821_v3, %v1125_v29  ;;  %v12827_v3 = vld [vmem:[#allocation44_spill] sm:$0xff] }
 0x1c8   : > { %v11110_v53 = vadd.f32 %v3167_v50, %v2839_v4  ;;  %v12822_v4 = vld [vmem:[#allocation40_spill] sm:$0xff]  ;;  %v12823_v50 = vld [vmem:[#allocation43_spill] sm:$0xff] }
 0x1c9   : > { %v8621_v12 = vpop.f32.mrf.mxu0  ;;  %v2843_v36 = vadd.f32 %v12822_v4, %v2420_v27  ;;  %v2422_v13 = vadd.f32 %v12823_v50, %v1999_v8 }
 0x1ca   : > { %v11117_v22 = vadd.f32 %v8621_v12, %v10945_v61  ;;  %v2001_v12 = vadd.f32 %v12825_v28, %v1578_v10 }
 0x1cb   : > { %v3177_v39 = vpop.f32.mrf.mxu0  ;;  %v2845_v29 = vadd.f32 %v12826_v7, %v2422_v13 }
 0x1cc   : > { %v11123_v38 = vadd.f32 %v3177_v39, %v2841_v62  ;;  %v2424_v60 = vadd.f32 %v10967_v30, %v2001_v12  ;;  %v11137_v62 = vpop.f32.mrf.mxu1 }
 0x1cd   : > { %v8624_v42 = vpop.f32.mrf.mxu0 }
 0x1ce   : > { %v11130_v6 = vadd.f32 %v8624_v42, %v12824_v54  ;;  %v2847_v42 = vadd.f32 %v12827_v3, %v2424_v60  ;;  %v11145_v4 = vpop.f32.mrf.mxu1  ;;  %v4355_v60 = vld [vmem:[%s12658_s3 + $0x8] sm:$0xff] }
 0x1cf   : > { %v3187_v61 = vpop.f32.mrf.mxu0  ;;  %4434 = vmatprep.mubr.f32.mxu1 %v4355_v60 }
 0x1d0   : > { %v11133_v41 = vadd.f32 %v3187_v61, %v2843_v36  ;;  %v11152_v13 = vpop.f32.mrf.mxu1 }
 0x1d1   : > { %v8627_v34 = vpop.f32.mrf.mxu0 }
 0x1d2   : > { %v11140_v27 = vadd.f32 %v8627_v34, %v10961_v44  ;;  %v8677_v12 = vpop.f32.mrf.mxu1 }
 0x1d3   : > { %v3197_v39 = vpop.f32.mrf.mxu0 }
 0x1d4   : > { %v11142_v46 = vadd.f32 %v3197_v39, %v2845_v29 }
 0x1d5   : > { %v8630_v8 = vpop.f32.mrf.mxu0 }
 0x1d6   : > { %v11148_v10 = vadd.f32 %v8630_v8, %v10971_v11 }
 0x1d7   : > { %v3207_v36 = vpop.f32.mrf.mxu0 }
 0x1d8   : > { %v11150_v50 = vadd.f32 %v3207_v36, %v2847_v42 }
 0x1d9   : > { %v8633_v30 = vpop.f32.mrf.mxu0 }
 0x1da   : > { %v11155_v44 = vadd.f32 %v8633_v30, %v10978_v37  ;;  %v3620_v37 = vpop.f32.mrf.mxu1 }
 0x1db   : > { %v3217_v54 = vpop.f32.mrf.mxu0 }
 0x1dc   : > { %12828 = vst [vmem:[#allocation12_spill] sm:$0xff] %v11155_v44  ;;  %v11158_v61 = vadd.f32 %v3217_v54, %v10983_v1  ;;  %v8680_v1 = vpop.f32.mrf.mxu1 }
 0x1dd   : > { %v8636_v28 = vpop.f32.mrf.mxu0 }
 0x1de   : > { %12829 = vst [vmem:[#allocation24_spill] sm:$0xff] %v11158_v61  ;;  %v11161_v34 = vadd.f32 %v8636_v28, %v10989_v15  ;;  %v3630_v30 = vpop.f32.mrf.mxu1 }
 0x1df   : > { %v3227_v11 = vpop.f32.mrf.mxu0 }
 0x1e0   : > { %12830 = vst [vmem:[#allocation23_spill] sm:$0xff] %v11161_v34  ;;  %v11164_v7 = vadd.f32 %v3227_v11, %v10998_v16 }
 0x1e1   : > { %v8639_v29 = vpop.f32.mrf.mxu0 }
 0x1e2   : > { %12831 = vst [vmem:[#allocation7_spill] sm:$0xff] %v11164_v7  ;;  %v8683_v7 = vpop.f32.mrf.mxu1 }
 0x1e3   : > { %v3237_v39 = vpop.f32.mrf.mxu0 }
 0x1e5   : > { %v8694_v8 = vpop.f32.mrf.mxu0 }
 0x1e6   : > { %v3932_v3 = vadd.f32 %v8694_v8, %v11009_v63  ;;  %v3640_v63 = vpop.f32.mrf.mxu1 }
 0x1e7   : > { %v3772_v42 = vpop.f32.mrf.mxu0 }
 0x1e8   : > { %v3931_v15 = vadd.f32 %v3772_v42, %v11014_v51 }
 0x1e9   : > { %v8697_v36 = vpop.f32.mrf.mxu0 }
 0x1ea   : > { %v3934_v16 = vadd.f32 %v8697_v36, %v11018_v45  ;;  %v8686_v36 = vpop.f32.mrf.mxu1 }
 0x1eb   : > { %v3782_v54 = vpop.f32.mrf.mxu0 }
 0x1ec   : > { %v3933_v28 = vadd.f32 %v3782_v54, %v11023_v5  ;;  %v11184_v5 = vld [vmem:[%s12833_s2] ss:$0 sm:$0xff] }
 0x1ed   : > { %v8700_v11 = vpop.f32.mrf.mxu0 }
 0x1ee   : > { %v3936_v34 = vadd.f32 %v8700_v11, %v11027_v57 }
 0x1ef   : > { %v3792_v60 = vpop.f32.mrf.mxu0 }
 0x1f0   : > { %v11175_v61 = vadd.f32 %v3792_v60, %v11032_v0  ;;  %v3678_v0 = vadd.f32 %v11034_v33, %v11045_v26  ;;  %v2853_v60 = vadd.f32 %v10991_v9, %v11002_v40  ;;  %v11203_v33 = vadd.f32 %v11055_v49, %v11069_v17 }
 0x1f1   : > { %v8703_v44 = vpop.f32.mrf.mxu0  ;;  %v3684_v9 = vadd.f32 %v11080_v25, %v11091_v55  ;;  %v3683_v40 = vadd.f32 %v11093_v47, %v11097_v23  ;;  %v11232_v17 = vadd.f32 %v11137_v62, %v11123_v38  ;;  %v11246_v55 = vadd.f32 %v11152_v13, %v11133_v41 }
 0x1f2   : > { %v3938_v8 = vadd.f32 %v8703_v44, %v11038_v48  ;;  %v2854_v48 = vadd.f32 %v10985_v18, %v10996_v43  ;;  %v3650_v44 = vpop.f32.mrf.mxu1  ;;  %v3682_v18 = vadd.f32 %v11064_v58, %v11078_v14  ;;  %v3681_v43 = vadd.f32 %v11071_v20, %v11084_v35 }
 0x1f3   : > { %v3802_v51 = vpop.f32.mrf.mxu0  ;;  %v11228_v58 = vadd.f32 %v11127_v52, %v11117_v22  ;;  %v11242_v35 = vadd.f32 %v11145_v4, %v11130_v6  ;;  %v11249_v47 = vadd.f32 %v8677_v12, %v11140_v27  ;;  %v11252_v23 = vadd.f32 %v11184_v5, %v3931_v15  ;;  %v12840_v27 = vld [vmem:[#allocation12_spill] sm:$0xff]  ;;  %v12845_v15 = vld [vmem:[#allocation7_spill] sm:$0xff] }
 0x1f4   : > { %v11179_v42 = vadd.f32 %v3802_v51, %v11047_v2  ;;  %v11193_v2 = vadd.f32 %v11184_v5, %v3932_v3  ;;  %v3677_v51 = vadd.f32 %v11040_v56, %v11053_v21  ;;  %v11217_v56 = vadd.f32 %v11106_v32, %v11104_v59  ;;  %v8689_v20 = vpop.f32.mrf.mxu1  ;;  %v12841_v12 = vld [vmem:[#allocation24_spill] sm:$0xff] }
 0x1f5   : > { %v8706_v45 = vpop.f32.mrf.mxu0  ;;  %v11224_v21 = vadd.f32 %v11184_v5, %v3934_v16  ;;  %12837 = vst [vmem:[#allocation25_spill] sm:$0xff] %v11252_v23  ;;  %v11255_v32 = vadd.f32 %v3620_v37, %v11142_v46  ;;  %v11261_v22 = vadd.f32 %v3630_v30, %v11150_v50  ;;  %v3276_v38 = vadd.f32 %v3237_v39, %v2853_v60 }
 0x1f6   : > { %12832 = vst [vmem:[#allocation6_spill] sm:$0xff] %v11179_v42  ;;  %12834 = vst [vmem:[#allocation14_spill] sm:$0xff] %v11193_v2  ;;  %v3940_v11 = vadd.f32 %v8706_v45, %v3678_v0  ;;  %v3680_v42 = vadd.f32 %v11049_v31, %v11062_v19  ;;  %v11221_v31 = vadd.f32 %v11119_v24, %v11110_v53  ;;  %v11235_v14 = vmin.f32 %v11193_v2, 0.0  ;;  %v3660_v4 = vpop.f32.mrf.mxu1 }
 0x1f7   : > { %v11186_v57 = vpop.f32.mrf.mxu0  ;;  %12835 = vst [vmem:[#allocation16_spill] sm:$0xff] %v11224_v21  ;;  %v11258_v53 = vadd.f32 %v8680_v1, %v11148_v10  ;;  %v3277_v24 = vadd.f32 %v8639_v29, %v2854_v48  ;;  %v11264_v52 = vmin.f32 %v11224_v21, 0.0  ;;  %v11267_v6 = vadd.f32 %v11184_v5, %v3936_v34  ;;  %v12844_v1 = vld [vmem:[#allocation23_spill] sm:$0xff] }
 0x1f8   : > { %12836 = vst [vmem:[#allocation26_spill] sm:$0xff] %v11235_v14  ;;  %v11238_v25 = vadd.f32 %v11184_v5, %v3940_v11  ;;  %v11273_v46 = vadd.f32 %v8683_v7, %v12840_v27  ;;  %v4067_v50 = vmul.f32 0.5, %v11235_v14  ;;  %v4164_v13 = vmul.f32 1.442695, %v11235_v14 }
 0x1f9   : > { %v8709_v54 = vpop.f32.mrf.mxu0  ;;  %12838 = vst [vmem:[#allocation28_spill] sm:$0xff] %v11264_v52  ;;  %12839 = vst [vmem:[#allocation11_spill] sm:$0xff] %v11267_v6  ;;  %v11281_v29 = vadd.f32 %v3640_v63, %v12841_v12  ;;  %v11284_v34 = vmin.f32 %v11252_v23, 0.0  ;;  %v11287_v37 = vadd.f32 %v11184_v5, %v3933_v28  ;;  %v11290_v7 = vadd.f32 %v11184_v5, %v3938_v8 }
 0x1fa   : > { %v3942_v49 = vadd.f32 %v8709_v54, %v3680_v42  ;;  %v11276_v10 = vmin.f32 %v11238_v25, 0.0  ;;  %v11293_v3 = vadd.f32 %v8686_v36, %v12844_v1  ;;  %v11296_v30 = vadd.f32 %v3650_v44, %v12845_v15 }
 0x1fb   : > { %v11205_v26 = vpop.f32.mrf.mxu0  ;;  %12842 = vst [vmem:[#allocation9_spill] sm:$0xff] %v11284_v34  ;;  %12843 = vst [vmem:[#allocation18_spill] sm:$0xff] %v11287_v37  ;;  %v11298_v16 = vadd.f32 %v8689_v20, %v3277_v24  ;;  %v11300_v42 = vadd.f32 %v3660_v4, %v3276_v38  ;;  %v11303_v45 = vmin.f32 %v11267_v6, 0.0  ;;  %v4168_v0 = vmul.f32 1.442695, %v11264_v52 }
 0x1fc   : > { %v11270_v41 = vadd.f32 %v11184_v5, %v3942_v49  ;;  %v4180_v36 = vmul.f32 1.442695, %v11276_v10  ;;  %v4069_v54 = vmul.f32 0.5, %v11264_v52  ;;  %v11311_v48 = vadd.f32 1.0, %v4067_v50 }
 0x1fd   : > { %v8712_v19 = vpop.f32.mrf.mxu0  ;;  %12846 = vst [vmem:[#allocation34_spill] sm:$0xff] %v11303_v45  ;;  %9058 = vpow2.f32 %v4164_v13  ;;  %v11314_v44 = vmin.f32 %v11287_v37, 0.0  ;;  %v11317_v11 = vmin.f32 %v11290_v7, 0.0  ;;  %v11320_v49 = vmul.f32 0.5, %v11284_v34 }
 0x1fe   : > { %v3944_v63 = vadd.f32 %v8712_v19, %v3682_v18  ;;  %v11306_v28 = vmin.f32 %v11270_v41, 0.0  ;;  %12847 = vst [vmem:[#allocation27_spill] sm:$0xff] %v11311_v48  ;;  %v11324_v19 = vadd.f32 %v11184_v5, %v11175_v61  ;;  %v3939_v20 = vadd.f32 %v11186_v57, %v3677_v51 }
 0x1ff   : > { %v3832_v59 = vpop.f32.mrf.mxu0  ;;  %12848 = vst [vmem:[#allocation30_spill] sm:$0xff] %v11314_v44  ;;  %12849 = vst [vmem:[#allocation15_spill] sm:$0xff] %v11320_v49  ;;  %9060 = vpow2.f32 %v4168_v0  ;;  %v3941_v61 = vadd.f32 %v11205_v26, %v11203_v33  ;;  %v4101_v57 = vadd.f32 1.0, %v4069_v54  ;;  %v11344_v12 = vmul.f32 0.5, %v11314_v44 }
 0x200   : > { %12850 = vst [vmem:[#allocation13_spill] sm:$0xff] %v11324_v19  ;;  %v11328_v24 = vadd.f32 %v11184_v5, %v3944_v63  ;;  %v3943_v38 = vadd.f32 %v3832_v59, %v3681_v43  ;;  %v4184_v50 = vmul.f32 1.442695, %v11306_v28  ;;  %9062 = vpow2.f32 %v4180_v36 }
 0x201   : > { %v8715_v62 = vpop.f32.mrf.mxu0  ;;  %v4172_v59 = vmul.f32 1.442695, %v11303_v45  ;;  %12853 = vst [vmem:[#allocation36_spill] sm:$0xff] %v11344_v12  ;;  %v11350_v1 = vadd.f32 %v11184_v5, %v3939_v20  ;;  %v4075_v0 = vmul.f32 0.5, %v11276_v10  ;;  %v4176_v20 = vmul.f32 1.442695, %v11317_v11 }
 0x202   : > { %v3946_v60 = vadd.f32 %v8715_v62, %v3684_v9  ;;  %v4071_v9 = vmul.f32 0.5, %v11303_v45  ;;  %v12851_v62 = vld [vmem:[#allocation6_spill] sm:$0xff]  ;;  %v11353_v33 = vmin.f32 %v11328_v24, 0.0  ;;  %v11356_v26 = vadd.f32 %v11184_v5, %v3943_v38 }
 0x203   : > { %v3842_v39 = vpop.f32.mrf.mxu0  ;;  %v11334_v13 = vadd.f32 %v11184_v5, %v12851_v62  ;;  %9064 = vpow2.f32 %v4184_v50  ;;  %v11370_v62 = vmul.f32 %v4101_v57, %v11264_v52  ;;  %v4077_v50 = vmul.f32 0.5, %v11306_v28 }
 0x204   : > { %v3945_v27 = vadd.f32 %v3842_v39, %v3683_v40  ;;  %v11339_v51 = vadd.f32 %v11184_v5, %v3946_v60  ;;  %v4073_v40 = vmul.f32 0.5, %v11317_v11  ;;  %v11347_v39 = vmin.f32 %v11324_v19, 0.0 }
 0x205   : > { %v8718_v8 = vpop.f32.mrf.mxu0  ;;  %12852 = vst [vmem:[#allocation35_spill] sm:$0xff] %v11334_v13  ;;  %v4103_v36 = vadd.f32 1.0, %v4071_v9  ;;  %v11363_v54 = vmin.f32 %v11334_v13, 0.0  ;;  %v11366_v60 = vadd.f32 %v11184_v5, %v3941_v61  ;;  %12855 = vst [vmem:[#allocation32_spill] sm:$0xff] %v11370_v62  ;;  %9066 = vpow2.f32 %v4172_v59 }
 0x206   : > { %12854 = vst [vmem:[#allocation29_spill] sm:$0xff] %v11347_v39  ;;  %v11359_v15 = vadd.f32 %v11184_v5, %v3945_v27  ;;  %v11373_v38 = vmin.f32 %v11339_v51, 0.0  ;;  %v4105_v23 = vadd.f32 1.0, %v4073_v40  ;;  %v11379_v9 = vmin.f32 %v11350_v1, 0.0 }
 0x207   : > { %v3852_v18 = vpop.f32.mrf.mxu0  ;;  %v11382_v61 = vmin.f32 %v11356_v26, 0.0  ;;  %v4079_v2 = vmul.f32 0.5, %v11353_v33  ;;  %v11386_v57 = vmul.f32 0.5, %v11347_v39  ;;  %v3948_v48 = vadd.f32 %v8718_v8, %v11217_v56 }
 0x208   : > { %v11389_v49 = vmin.f32 %v11359_v15, 0.0  ;;  %v4107_v37 = vadd.f32 1.0, %v4075_v0  ;;  %v11393_v40 = vmul.f32 %v4103_v36, %v11303_v45  ;;  %v11396_v59 = vmin.f32 %v11366_v60, 0.0 }
 0x209   : > { %v8721_v4 = vpop.f32.mrf.mxu0  ;;  %12856 = vst [vmem:[#allocation20_spill] sm:$0xff] %v11386_v57  ;;  %v4188_v62 = vmul.f32 1.442695, %v11353_v33  ;;  %9068 = vpow2.f32 %v4176_v20  ;;  %v11400_v12 = vmul.f32 0.5, %v11363_v54  ;;  %v3947_v21 = vadd.f32 %v3852_v18, %v11221_v31 }
 0x20a   : > { %12857 = vst [vmem:[#allocation17_spill] sm:$0xff] %v11393_v40  ;;  %v11402_v34 = vpop.eup %9058  ;;  %v4081_v56 = vmul.f32 0.5, %v11373_v38  ;;  %v4109_v8 = vadd.f32 1.0, %v4077_v50  ;;  %v11409_v0 = vmul.f32 %v4105_v23, %v11317_v11  ;;  %v3950_v36 = vadd.f32 %v8721_v4, %v11228_v58 }
 0x20b   : > { %v3862_v43 = vpop.f32.mrf.mxu0  ;;  %12858 = vst [vmem:[#allocation37_spill] sm:$0xff] %v11402_v34  ;;  %v4111_v40 = vadd.f32 1.0, %v4079_v2  ;;  %v4078_v20 = vmul.f32 0.5, %v11382_v61  ;;  %v4074_v52 = vmul.f32 0.5, %v11379_v9  ;;  %v11415_v57 = vadd.f32 %v11184_v5, %v3948_v48 }
 0x20c   : > { %v4192_v31 = vmul.f32 1.442695, %v11373_v38  ;;  %v4080_v18 = vmul.f32 0.5, %v11389_v49  ;;  %vm4043_vm9 = vcmp.gt.f32.partialorder %v11276_v10, -0.001  ;;  %v4139_v23 = vmul.f32 %v4107_v37, %v11276_v10  ;;  %v11423_v50 = vpop.eup %9060 }
 0x20d   : > { %v8724_v63 = vpop.f32.mrf.mxu0  ;;  %12859 = vst [vmem:[#allocation38_spill] sm:$0xff] %v11415_v57  ;;  %12860 = vst [vmem:[#allocation31_spill] sm:$0xff] %v11423_v50  ;;  %v3949_v2 = vadd.f32 %v3862_v43, %v11232_v17  ;;  %v4190_v58 = vmul.f32 1.442695, %v11389_v49  ;;  %9070 = vpow2.f32 %v4188_v62  ;;  %v4076_v48 = vmul.f32 0.5, %v11396_v59  ;;  %v9063_v4 = vpop.eup %9062 }
 0x20e   : > { %v11429_v6 = vadd.f32 %v11184_v5, %v3947_v21  ;;  %v4113_v45 = vadd.f32 1.0, %v4081_v56  ;;  %v4141_v39 = vmul.f32 %v4109_v8, %v11306_v28  ;;  %v11434_v37 = vadd.f32 %v11184_v5, %v3950_v36 }
 0x20f   : > { %v11375_v27 = vpop.f32.mrf.mxu0  ;;  %v3952_v17 = vadd.f32 %v8724_v63, %v11242_v35  ;;  %v11438_v43 = vmul.f32 %v4111_v40, %v11353_v33  ;;  %v4110_v62 = vadd.f32 1.0, %v4078_v20  ;;  %vm4045_vm10 = vcmp.gt.f32.partialorder %v11306_v28, -0.001 }
 0x210   : > { %12861 = vst [vmem:[#allocation8_spill] sm:$0xff] %v11429_v6  ;;  %12862 = vst [vmem:[#allocation22_spill] sm:$0xff] %v11434_v37  ;;  %vm4299_vm11 = vcmp.gt.f32.partialorder %v11238_v25, 0.0  ;;  %v11443_v21 = vmin.f32 %v11415_v57, 0.0  ;;  %9072 = vpow2.f32 %v4192_v31  ;;  %v4186_v56 = vmul.f32 1.442695, %v11382_v61  ;;  %v9065_v8 = vpop.eup %9064 }
 0x211   : > { %v8727_v14 = vpop.f32.mrf.mxu0  ;;  %v11447_v36 = vadd.f32 %v11184_v5, %v3949_v2  ;;  %9074 = vpow2.f32 %v4190_v58  ;;  %v4108_v35 = vadd.f32 1.0, %v4076_v48  ;;  %v7598_v63 = vadd.f32 -1.0, %v9063_v4 }
 0x212   : > { %v3954_v13 = vadd.f32 %v8727_v14, %v11249_v47  ;;  %12863 = vst [vmem:[#allocation21_spill] sm:$0xff] %v11443_v21  ;;  %v4112_v47 = vadd.f32 1.0, %v4080_v18  ;;  %v11450_v40 = vmin.f32 %v11429_v6, 0.0  ;;  %v11456_v50 = vmul.f32 %v4113_v45, %v11373_v38  ;;  %v11459_v18 = vpop.eup %9066 }
 0x213   : > { %v11405_v19 = vpop.f32.mrf.mxu0  ;;  %12864 = vst [vmem:[#allocation39_spill] sm:$0xff] %v11447_v36  ;;  %v4182_v31 = vmul.f32 1.442695, %v11396_v59  ;;  %12866 = vst [vmem:[#allocation10_spill] sm:$0xff] %v11459_v18  ;;  %v11462_v2 = vmin.f32 %v11434_v37, 0.0  ;;  %v11465_v58 = vadd.f32 %v11184_v5, %v3952_v17  ;;  %v11469_v4 = vmul.f32 %v4110_v62, %v11382_v61 }
 0x214   : > { %12865 = vst [vmem:[#allocation33_spill] sm:$0xff] %v11450_v40  ;;  %v11453_v20 = vadd.f32 %v11184_v5, %v3954_v13  ;;  %v3951_v13 = vadd.f32 %v11375_v27, %v11246_v55  ;;  %v11474_v6 = vmul.f32 %v4112_v47, %v11389_v49  ;;  %9076 = vpow2.f32 %v4186_v56 }
 0x215   : > { %v11417_v34 = vpop.f32.mrf.mxu0  ;;  %12867 = vst [vmem:[#allocation40_spill] sm:$0xff] %v11465_v58  ;;  %v7600_v40 = vadd.f32 -1.0, %v9065_v8  ;;  %v11477_v37 = vmin.f32 %v11447_v36, 0.0  ;;  %v11481_v21 = vmul.f32 %v4108_v35, %v11396_v59  ;;  %9078 = vpow2.f32 %v4182_v31 }
 0x216   : > { %v9069_v62 = vpop.eup %9068  ;;  %v11486_v55 = vmin.f32 %v11453_v20, 0.0  ;;  %v4106_v47 = vadd.f32 1.0, %v4074_v52  ;;  %v11490_v56 = vmin.f32 %v11465_v58, 0.0  ;;  %vm4301_vm12 = vcmp.gt.f32.partialorder %v11270_v41, 0.0 }
 0x217   : > { %v3892_v44 = vpop.f32.mrf.mxu0  ;;  %vm4047_vm13 = vcmp.gt.f32.partialorder %v11353_v33, -0.001  ;;  %vm4041_vm14 = vcmp.gt.f32.partialorder %v11317_v11, -0.001  ;;  %vm4049_vm15 = vcmp.gt.f32.partialorder %v11373_v38, -0.001 }
 0x218   : > { %vm4048_vm0 = vcmp.gt.f32.partialorder %v11389_v49, -0.001  ;;  %vm4303_vm1 = vcmp.gt.f32.partialorder %v11328_v24, 0.0  ;;  %vm4302_vm5 = vcmp.gt.f32.partialorder %v11356_v26, 0.0  ;;  %vm4057_vm8 = vcmp.gt.f32.partialorder %v11486_v55, -0.001 }
 0x219   : > { %v8733_v14 = vpop.f32.mrf.mxu0  ;;  %vm4297_vm6 = vcmp.gt.f32.partialorder %v11290_v7, 0.0  ;;  %vm4298_vm4 = vcmp.gt.f32.partialorder %v11350_v1, 0.0  ;;  %vm4313_vm7 = vcmp.gt.f32.partialorder %v11453_v20, 0.0 }
 0x21a   : > { %v3958_v48 = vadd.f32 %v8733_v14, %v11273_v46  ;;  %v4267_v46 = vsel %vm4043_vm9, %v4139_v23, %v7598_v63  ;;  %v11501_v23 = vadd.f32 %v11184_v5, %v3951_v13  ;;  %vm4046_vm9 = vcmp.gt.f32.partialorder %v11382_v61, -0.001 }
 0x21b   : > { %v3902_v57 = vpop.f32.mrf.mxu0  ;;  %v11510_v35 = vsel %vm4299_vm11, %v11238_v25, %v4267_v46  ;;  %v11526_v25 = vmul.f32 %v4106_v47, %v11379_v9  ;;  %vm4304_vm11 = vcmp.gt.f32.partialorder %v11359_v15, 0.0 }
 0x21c   : > { %v3957_v27 = vadd.f32 %v3902_v57, %v11281_v29  ;;  %12868 = vst [vmem:[#allocation43_spill] sm:$0xff] %v11501_v23  ;;  %v3956_v29 = vadd.f32 %v11417_v34, %v11258_v53  ;;  %v4269_v57 = vsel %vm4045_vm10, %v4141_v39, %v7600_v40  ;;  %12869 = vst [vmem:[#allocation41_spill] sm:$0xff] %v11510_v35  ;;  %v9071_v53 = vpop.eup %9070  ;;  %v4208_v40 = vmul.f32 1.442695, %v11486_v55 }
 0x21d   : > { %v8736_v45 = vpop.f32.mrf.mxu0  ;;  %v3955_v34 = vadd.f32 %v3892_v44, %v11261_v22  ;;  %vm4305_vm10 = vcmp.gt.f32.partialorder %v11339_v51, 0.0 }
 0x21e   : > { %v3960_v17 = vadd.f32 %v8736_v45, %v11293_v3  ;;  %v11493_v3 = vadd.f32 %v11184_v5, %v3958_v48  ;;  %v4178_v48 = vmul.f32 1.442695, %v11379_v9  ;;  %v11522_v28 = vadd.f32 %v11184_v5, %v3957_v27 }
 0x21f   : > { %v3912_v14 = vpop.f32.mrf.mxu0  ;;  %v11541_v45 = vmin.f32 %v11501_v23, 0.0  ;;  %v11546_v46 = vadd.f32 %v11184_v5, %v3956_v29 }
 0x220   : > { %v11496_v8 = vadd.f32 %v11184_v5, %v3960_v17  ;;  %v3959_v10 = vadd.f32 %v3912_v14, %v11296_v30  ;;  %v3953_v17 = vadd.f32 %v11405_v19, %v11255_v32  ;;  %v9073_v14 = vpop.eup %9072  ;;  %9080 = vpow2.f32 %v4178_v48 }
 0x221   : > { %v8739_v52 = vpop.f32.mrf.mxu0  ;;  %v11558_v32 = vadd.f32 %v11184_v5, %v3955_v34  ;;  %v11561_v19 = vmin.f32 %v11522_v28, 0.0  ;;  %9082 = vpow2.f32 %v4208_v40  ;;  %v4104_v34 = vadd.f32 1.0, %v11400_v12 }
 0x222   : > { %v11513_v63 = vmin.f32 %v11496_v8, 0.0  ;;  %v11516_v30 = vadd.f32 %v11184_v5, %v3959_v10  ;;  %v3962_v31 = vadd.f32 %v8739_v52, %v11298_v16  ;;  %v11531_v16 = vmin.f32 %v11493_v3, 0.0  ;;  %v9075_v52 = vpop.eup %9074 }
 0x223   : > { %v3922_v39 = vpop.f32.mrf.mxu0  ;;  %v9077_v36 = vpop.eup %9076  ;;  %v11583_v23 = vadd.f32 %v11184_v5, %v3953_v17  ;;  %v7604_v40 = vadd.f32 -1.0, %v9073_v14  ;;  %v7603_v35 = vadd.f32 -1.0, %v9075_v52  ;;  %v11586_v58 = vmin.f32 %v11558_v32, 0.0 }
 0x224   : > { %v11534_v13 = vmin.f32 %v11516_v30, 0.0  ;;  %v11537_v22 = vadd.f32 %v11184_v5, %v3962_v31  ;;  %v3961_v44 = vadd.f32 %v3922_v39, %v11300_v42  ;;  %v4220_v27 = vmul.f32 1.442695, %v11513_v63 }
 0x225   : > { %v7602_v42 = vadd.f32 -1.0, %v9071_v53  ;;  %v7596_v31 = vadd.f32 -1.0, %v9069_v62  ;;  %v4216_v48 = vmul.f32 1.442695, %v11531_v16  ;;  %v11572_v53 = vmin.f32 %v11546_v46, 0.0 }
 0x226   : > { %v11551_v47 = vmin.f32 %v11537_v22, 0.0  ;;  %v11554_v10 = vadd.f32 %v11184_v5, %v3961_v44  ;;  %v4218_v29 = vmul.f32 1.442695, %v11534_v13  ;;  %9084 = vpow2.f32 %v4220_v27 }
 0x227   : > { %v11579_v62 = vsel %vm4301_vm12, %v11270_v41, %v4269_v57  ;;  %v4214_v41 = vmul.f32 1.442695, %v11561_v19  ;;  %v9079_v57 = vpop.eup %9078  ;;  %v4271_v12 = vsel %vm4047_vm13, %v11438_v43, %v7602_v42  ;;  %v4089_v5 = vmul.f32 0.5, %v11486_v55 }
 0x228   : > { %v11566_v39 = vmin.f32 %v11554_v10, 0.0  ;;  %v4224_v44 = vmul.f32 1.442695, %v11551_v47  ;;  %v11598_v17 = vsel %vm4041_vm14, %v11409_v0, %v7596_v31  ;;  %v7601_v27 = vadd.f32 -1.0, %v9077_v36 }
 0x229   : > { %v4093_v14 = vmul.f32 0.5, %v11531_v16  ;;  %v4212_v52 = vmul.f32 1.442695, %v11572_v53  ;;  %v4273_v33 = vsel %vm4049_vm15, %v11456_v50, %v7604_v40  ;;  %v4095_v43 = vmul.f32 0.5, %v11513_v63 }
 0x22a   : > { %9086 = vpow2.f32 %v4224_v44  ;;  %v4222_v18 = vmul.f32 1.442695, %v11566_v39  ;;  %v11610_v42 = vmul.f32 %v4104_v34, %v11363_v54  ;;  %v4272_v11 = vsel %vm4048_vm0, %v11474_v6, %v7603_v35 }
 0x22b   : > { %9088 = vpow2.f32 %v4218_v29  ;;  %v11603_v29 = vmin.f32 %v11583_v23, 0.0  ;;  %v4094_v0 = vmul.f32 0.5, %v11534_v13  ;;  %v4210_v36 = vmul.f32 1.442695, %v11586_v58 }
 0x22c   : > { %9090 = vpow2.f32 %v4216_v48  ;;  %v11621_v38 = vsel %vm4303_vm1, %v11328_v24, %v4271_v12  ;;  %vm4044_vm12 = vcmp.gt.f32.partialorder %v11396_v59, -0.001  ;;  %v4091_v50 = vmul.f32 0.5, %v11572_v53 }
 0x22d   : > { %9092 = vpow2.f32 %v4222_v18  ;;  %v4097_v18 = vmul.f32 0.5, %v11551_v47  ;;  %v4174_v31 = vmul.f32 1.442695, %v11363_v54  ;;  %v4270_v6 = vsel %vm4046_vm9, %v11469_v4, %v7601_v27  ;;  %v9081_v40 = vpop.eup %9080 }
 0x22e   : > { %9094 = vpow2.f32 %v4214_v41  ;;  %v4125_v49 = vadd.f32 1.0, %v4093_v14  ;;  %v11629_v35 = vadd.f32 1.0, %v4089_v5  ;;  %v11634_v44 = vsel %vm4305_vm10, %v11339_v51, %v4273_v33  ;;  %v9083_v14 = vpop.eup %9082 }
 0x22f   : > { %9096 = vpow2.f32 %v4212_v52  ;;  %v4096_v24 = vmul.f32 0.5, %v11566_v39  ;;  %v11640_v48 = vsel %vm4304_vm11, %v11359_v15, %v4272_v11  ;;  %v4127_v34 = vadd.f32 1.0, %v4095_v43 }
 0x230   : > { %v4126_v61 = vadd.f32 1.0, %v4094_v0  ;;  %v4092_v4 = vmul.f32 0.5, %v11561_v19  ;;  %9098 = vpow2.f32 %v4210_v36  ;;  %v4206_v41 = vmul.f32 1.442695, %v11603_v29 }
 0x231   : > { %v4129_v12 = vadd.f32 1.0, %v4097_v18  ;;  %v11647_v51 = vsel %vm4302_vm5, %v11356_v26, %v4270_v6  ;;  %v7599_v5 = vadd.f32 -1.0, %v9079_v57  ;;  %v4123_v27 = vadd.f32 1.0, %v4091_v50 }
 0x232   : > { %vm4321_vm13 = vcmp.gt.f32.partialorder %v11537_v22, 0.0  ;;  %vm4063_vm14 = vcmp.gt.f32.partialorder %v11513_v63, -0.001  ;;  %v11652_v15 = vmul.f32 %v4125_v49, %v11531_v16  ;;  %v4204_v52 = vmul.f32 1.442695, %v11490_v56 }
 0x233   : > { %v9085_v33 = vpop.eup %9084  ;;  %vm4065_vm15 = vcmp.gt.f32.partialorder %v11551_v47, -0.001  ;;  %v4128_v43 = vadd.f32 1.0, %v4096_v24  ;;  %vm4320_vm0 = vcmp.gt.f32.partialorder %v11554_v10, 0.0  ;;  %v4159_v26 = vmul.f32 %v4127_v34, %v11513_v63 }
 0x234   : > { %vm4062_vm5 = vcmp.gt.f32.partialorder %v11534_v13, -0.001  ;;  %vm4300_vm1 = vcmp.gt.f32.partialorder %v11366_v60, 0.0  ;;  %vm4042_vm9 = vcmp.gt.f32.partialorder %v11379_v9, -0.001  ;;  %vm4319_vm11 = vcmp.gt.f32.partialorder %v11496_v8, 0.0 }
 0x235   : > { %vm4064_vm10 = vcmp.gt.f32.partialorder %v11566_v39, -0.001  ;;  %v4158_v11 = vmul.f32 %v4126_v61, %v11534_v13  ;;  %v4124_v0 = vadd.f32 1.0, %v4092_v4  ;;  %9100 = vpow2.f32 %v4206_v41 }
 0x236   : > { %v4161_v18 = vmul.f32 %v4129_v12, %v11551_v47  ;;  %vm4061_vm3 = vcmp.gt.f32.partialorder %v11531_v16, -0.001  ;;  %v4090_v6 = vmul.f32 0.5, %v11586_v58  ;;  %9102 = vpow2.f32 %v4174_v31 }
 0x237   : > { %v9087_v57 = vpop.eup %9086  ;;  %v7618_v24 = vadd.f32 -1.0, %v9085_v33  ;;  %v4268_v34 = vsel %vm4044_vm12, %v11481_v21, %v7599_v5  ;;  %9104 = vpow2.f32 %v4204_v52  ;;  %v4202_v61 = vmul.f32 1.442695, %v11541_v45 }
 0x238   : > { %v9089_v36 = vpop.eup %9088  ;;  %v7620_v50 = vadd.f32 -1.0, %v9087_v57  ;;  %v4160_v12 = vmul.f32 %v4128_v43, %v11566_v39  ;;  %vm4060_vm2 = vcmp.gt.f32.partialorder %v11561_v19, -0.001  ;;  %v11680_v31 = vmul.f32 %v4123_v27, %v11572_v53 }
 0x239   : > { %v9091_v49 = vpop.eup %9090  ;;  %v7597_v33 = vadd.f32 -1.0, %v9081_v40  ;;  %v7617_v5 = vadd.f32 -1.0, %v9089_v36  ;;  %vm4317_vm12 = vcmp.gt.f32.partialorder %v11493_v3, 0.0  ;;  %9106 = vpow2.f32 %v4202_v61  ;;  %v12870_v40 = vld [vmem:[#allocation29_spill] sm:$0xff] }
 0x23a   : > { %v9093_v4 = vpop.eup %9092  ;;  %v4289_v41 = vsel %vm4065_vm15, %v4161_v18, %v7620_v50  ;;  %v4156_v52 = vmul.f32 %v4124_v0, %v11561_v19  ;;  %vm4059_vm15 = vcmp.gt.f32.partialorder %v11572_v53, -0.001  ;;  %v4122_v27 = vadd.f32 1.0, %v4090_v6  ;;  %v12873_v19 = vld [vmem:[#allocation30_spill] sm:$0xff] }
 0x23b   : > { %v4353_v59 = vsel %vm4321_vm13, %v11537_v22, %v4289_v41  ;;  %v7619_v21 = vadd.f32 -1.0, %v9093_v4  ;;  %v9095_v47 = vpop.eup %9094  ;;  %v7612_v43 = vadd.f32 -1.0, %v9083_v14  ;;  %v4170_v57 = vmul.f32 1.442695, %v12870_v40 }
 0x23c   : > { %8075 = vmatprep.subr.mxu1 %v4353_v59  ;;  %v4287_v36 = vsel %vm4063_vm14, %v4159_v26, %v7618_v24  ;;  %v7616_v18 = vadd.f32 -1.0, %v9091_v49  ;;  %vm4316_vm13 = vcmp.gt.f32.partialorder %v11522_v28, 0.0  ;;  %v4153_v0 = vmul.f32 %v11629_v35, %v11486_v55  ;;  %v9097_v50 = vpop.eup %9096  ;;  %v12875_v59 = vld [vmem:[#allocation10_spill] sm:$0xff] }
 0x23d   : > { %8076 = vmatpush3.msra.mxu1 %v11634_v44  ;;  %v4288_v22 = vsel %vm4064_vm10, %v4160_v12, %v7619_v21  ;;  %v4088_v6 = vmul.f32 0.5, %v11603_v29  ;;  %9108 = vpow2.f32 %v4170_v57  ;;  %v4200_v39 = vmul.f32 1.442695, %v11462_v2  ;;  %v9099_v35 = vpop.eup %9098 }
 0x23e   : > { %v4352_v14 = vsel %vm4320_vm0, %v11554_v10, %v4288_v22  ;;  %v4286_v63 = vsel %vm4062_vm5, %v4158_v11, %v7617_v5  ;;  %v7615_v44 = vadd.f32 -1.0, %v9095_v47  ;;  %v4332_v26 = vsel %vm4300_vm1, %v11366_v60, %v4268_v34  ;;  %v12876_v47 = vld [vmem:[#allocation40_spill] sm:$0xff] }
 0x23f   : > { %8077 = vmatprep.subr.mxu1 %v4352_v14  ;;  %vm4315_vm14 = vcmp.gt.f32.partialorder %v11546_v46, 0.0  ;;  %v4266_v10 = vsel %vm4042_vm9, %v11526_v25, %v7597_v33  ;;  %v4351_v49 = vsel %vm4319_vm11, %v11496_v8, %v4287_v36  ;;  %vm4058_vm0 = vcmp.gt.f32.partialorder %v11586_v58, -0.001  ;;  %v12874_v33 = vld [vmem:[#allocation35_spill] sm:$0xff]  ;;  %v12881_v14 = vld [vmem:[#allocation33_spill] sm:$0xff] }
 0x240   : > { %8078 = vmatpush3.msra.mxu1 %v11640_v48  ;;  %v4281_v13 = vsel %vm4057_vm8, %v4153_v0, %v7612_v43  ;;  %9110 = vpow2.f32 %v4200_v39  ;;  %v4285_v60 = vsel %vm4061_vm3, %v11652_v15, %v7616_v18  ;;  %v7614_v9 = vadd.f32 -1.0, %v9097_v50  ;;  %v12871_v48 = vld [vmem:[#allocation34_spill] sm:$0xff]  ;;  %v12880_v50 = vld [vmem:[#allocation28_spill] sm:$0xff]  ;;  %v12882_v39 = vld [vmem:[#allocation41_spill] sm:$0xff] }
 0x241   : > { %8079 = vmatprep.subr.mxu1 %v4351_v49  ;;  %v4154_v25 = vmul.f32 %v4122_v27, %v11586_v58  ;;  %vm4314_vm5 = vcmp.gt.f32.partialorder %v11558_v32, 0.0  ;;  %v11728_v8 = vsel %vm4297_vm6, %v11290_v7, %v11598_v17  ;;  %vm4039_vm1 = vcmp.gt.f32.partialorder %v12871_v48, -0.001  ;;  %v12879_v58 = vld [vmem:[#allocation20_spill] sm:$0xff] }
 0x242   : > { %8080 = vmatpush3.msra.mxu1 %v11621_v38  ;;  %vm12872_vm8 = vcmp.gt.f32.partialorder %v11516_v30, 0.0  ;;  %v4330_v16 = vsel %vm4298_vm4, %v11350_v1, %v4266_v10  ;;  %vm4056_vm3 = vcmp.gt.f32.partialorder %v11603_v29, -0.001  ;;  %v4120_v15 = vadd.f32 1.0, %v4088_v6  ;;  %v9101_v24 = vpop.eup %9100 }
 0x243   : > { %v4350_v55 = vsel %vm12872_vm8, %v11516_v30, %v4286_v63  ;;  %v4198_v11 = vmul.f32 1.442695, %v11477_v37  ;;  %v4284_v7 = vsel %vm4060_vm2, %v4156_v52, %v7615_v44  ;;  %v7613_v17 = vadd.f32 -1.0, %v9099_v35  ;;  %v9103_v4 = vpop.eup %9102  ;;  %v12883_v44 = vld [vmem:[#allocation17_spill] sm:$0xff] }
 0x244   : > { %8081 = vmatprep.subr.mxu1 %v4350_v55  ;;  %v4345_v38 = vsel %vm4313_vm7, %v11453_v20, %v4281_v13  ;;  %vm4040_vm6 = vcmp.gt.f32.partialorder %v11363_v54, -0.001  ;;  %v4087_v30 = vmul.f32 0.5, %v11490_v56  ;;  %v4349_v1 = vsel %vm4317_vm12, %v11493_v3, %v4285_v60  ;;  %v9105_v41 = vpop.eup %9104  ;;  %v12885_v55 = vld [vmem:[#allocation16_spill] sm:$0xff] }
 0x245   : > { %8082 = vmatpush3.msra.mxu1 %v11647_v51  ;;  %v4086_v34 = vmul.f32 0.5, %v11541_v45  ;;  %9112 = vpow2.f32 %v4198_v11  ;;  %v4166_v61 = vmul.f32 1.442695, %v12873_v19  ;;  %v4283_v20 = vsel %vm4059_vm15, %v11680_v31, %v7614_v9 }
 0x246   : > { %8083 = vmatprep.subr.mxu1 %v4349_v1  ;;  %vm4312_vm2 = vcmp.gt.f32.partialorder %v11583_v23, 0.0  ;;  %vm4055_vm4 = vcmp.gt.f32.partialorder %v11490_v56, -0.001  ;;  %v4085_v51 = vmul.f32 0.5, %v11462_v2  ;;  %v4348_v3 = vsel %vm4316_vm13, %v11522_v28, %v4284_v7  ;;  %v12878_v28 = vld [vmem:[#allocation21_spill] sm:$0xff]  ;;  %v9107_v27 = vpop.eup %9106  ;;  %v12886_v7 = vld [vmem:[#allocation31_spill] sm:$0xff] }
 0x247   : > { %8084 = vmatpush3.msra.mxu1 %v11579_v62  ;;  %v4152_v12 = vmul.f32 %v4120_v15, %v11603_v29  ;;  %vm4296_vm7 = vcmp.gt.f32.partialorder %v12874_v33, 0.0  ;;  %v7594_v53 = vadd.f32 -1.0, %v12875_v59  ;;  %9114 = vpow2.f32 %v4166_v61  ;;  %v12877_v62 = vld [vmem:[#allocation11_spill] sm:$0xff]  ;;  %v12888_v1 = vld [vmem:[#allocation36_spill] sm:$0xff] }
 0x248   : > { %8085 = vmatprep.subr.mxu1 %v4348_v3  ;;  %v4282_v31 = vsel %vm4058_vm0, %v4154_v25, %v7613_v17  ;;  %v7611_v21 = vadd.f32 -1.0, %v9101_v24  ;;  %v4119_v5 = vadd.f32 1.0, %v4087_v30  ;;  %vm4311_vm9 = vcmp.gt.f32.partialorder %v12876_v47, 0.0  ;;  %v12887_v17 = vld [vmem:[#allocation9_spill] sm:$0xff] }
 0x249   : > { %vm4295_vm10 = vcmp.gt.f32.partialorder %v12877_v62, 0.0  ;;  %vm4038_vm11 = vcmp.gt.f32.partialorder %v12870_v40, -0.001  ;;  %v4196_v52 = vmul.f32 1.442695, %v12878_v28  ;;  %8086 = vmatpush3.msra.mxu1 %v4332_v26  ;;  %v4347_v43 = vsel %vm4315_vm14, %v11546_v46, %v4283_v20  ;;  %v12884_v26 = vld [vmem:[#allocation13_spill] sm:$0xff] }
 0x24a   : > { %v7595_v57 = vadd.f32 -1.0, %v9103_v4  ;;  %v4118_v22 = vadd.f32 1.0, %v4086_v34  ;;  %v4102_v36 = vadd.f32 1.0, %v12879_v58  ;;  %8087 = vmatprep.subr.mxu1 %v4347_v43  ;;  %v7610_v18 = vadd.f32 -1.0, %v9105_v41  ;;  %v9109_v35 = vpop.eup %9108  ;;  %v12890_v41 = vld [vmem:[#allocation22_spill] sm:$0xff] }
 0x24b   : > { %v4117_v0 = vadd.f32 1.0, %v4085_v51  ;;  %vm4037_vm12 = vcmp.gt.f32.partialorder %v12880_v50, -0.001  ;;  %9116 = vpow2.f32 %v4196_v52  ;;  %v4194_v6 = vmul.f32 1.442695, %v12881_v14  ;;  %8088 = vmatpush3.msra.mxu1 %v12882_v39  ;;  %v12895_v50 = vld [vmem:[#allocation26_spill] sm:$0xff] }
 0x24c   : > { %v4346_v63 = vsel %vm4314_vm5, %v11558_v32, %v4282_v31  ;;  %v4263_v46 = vsel %vm4039_vm1, %v12883_v44, %v7594_v53  ;;  %vm4054_vm15 = vcmp.gt.f32.partialorder %v11541_v45, -0.001  ;;  %vm4294_vm13 = vcmp.gt.f32.partialorder %v12884_v26, 0.0 }
 0x24d   : > { %v4084_v10 = vmul.f32 0.5, %v11477_v37  ;;  %8089 = vmatprep.subr.mxu1 %v4346_v63  ;;  %v4280_v49 = vsel %vm4056_vm3, %v4152_v12, %v7611_v21  ;;  %v4151_v13 = vmul.f32 %v4119_v5, %v11490_v56  ;;  %v7609_v60 = vadd.f32 -1.0, %v9107_v27  ;;  %v9111_v15 = vpop.eup %9110  ;;  %v12892_v27 = vld [vmem:[#allocation37_spill] sm:$0xff] }
 0x24e   : > { %9118 = vpow2.f32 %v4194_v6  ;;  %8090 = vmatpush3.msra.mxu1 %v4330_v16  ;;  %v4264_v32 = vsel %vm4040_vm6, %v11610_v42, %v7595_v57  ;;  %v4150_v9 = vmul.f32 %v4118_v22, %v11541_v45  ;;  %v4134_v25 = vmul.f32 %v4102_v36, %v12870_v40  ;;  %v12889_v45 = vld [vmem:[#allocation43_spill] sm:$0xff] }
 0x24f   : > { %v7593_v48 = vadd.f32 -1.0, %v9109_v35  ;;  %vm4293_vm14 = vcmp.gt.f32.partialorder %v12885_v55, 0.0  ;;  %8091 = vmatprep.subr.mxu1 %v4345_v38  ;;  %v4279_v29 = vsel %vm4055_vm4, %v4151_v13, %v7610_v18  ;;  %v4149_v11 = vmul.f32 %v4117_v0, %v11462_v2  ;;  %v12893_v22 = vld [vmem:[#allocation39_spill] sm:$0xff]  ;;  %v12894_v0 = vld [vmem:[#allocation18_spill] sm:$0xff] }
 0x250   : > { %v7592_v16 = vadd.f32 -1.0, %v12886_v7  ;;  %v4162_v30 = vmul.f32 1.442695, %v12887_v17  ;;  %8092 = vmatpush3.msra.mxu1 %v11728_v8  ;;  %v4344_v54 = vsel %vm4312_vm2, %v11583_v23, %v4280_v49  ;;  %v7608_v42 = vadd.f32 -1.0, %v9111_v15  ;;  %v12896_v6 = vld [vmem:[#allocation27_spill] sm:$0xff] }
 0x251   : > { %v4116_v24 = vadd.f32 1.0, %v4084_v10  ;;  %v4100_v34 = vadd.f32 1.0, %v12888_v1  ;;  %8093 = vmatprep.subr.mxu1 %v4344_v54  ;;  %v4328_v56 = vsel %vm4296_vm7, %v12874_v33, %v4264_v32  ;;  %v4278_v38 = vsel %vm4054_vm15, %v4150_v9, %v7609_v60  ;;  %v12891_v33 = vld [vmem:[#allocation32_spill] sm:$0xff]  ;;  %v12898_v60 = vld [vmem:[#allocation15_spill] sm:$0xff] }
 0x252   : > { %v4083_v61 = vmul.f32 0.5, %v12878_v28  ;;  %9120 = vpow2.f32 %v4162_v30  ;;  %8094 = vmatpush3.msra.mxu1 %v4328_v56  ;;  %v4343_v23 = vsel %vm4311_vm9, %v12876_v47, %v4279_v29  ;;  %v4327_v8 = vsel %vm4295_vm10, %v12877_v62, %v4263_v46  ;;  %v9113_v20 = vpop.eup %9112  ;;  %v12901_v30 = vld [vmem:[#allocation25_spill] sm:$0xff]  ;;  %v4360_v56 = vld [vmem:[%s12658_s3 + $0x30] sm:$0xff] }
 0x253   : > { %v4262_v4 = vsel %vm4038_vm11, %v4134_v25, %v7593_v48  ;;  %vm4053_vm0 = vcmp.gt.f32.partialorder %v11462_v2, -0.001  ;;  %8095 = vmatprep.subr.mxu1 %v4343_v23  ;;  %vm4310_vm5 = vcmp.gt.f32.partialorder %v12889_v45, 0.0  ;;  %vm4309_vm1 = vcmp.gt.f32.partialorder %v12890_v41, 0.0  ;;  %v12899_v25 = vld [vmem:[#allocation14_spill] sm:$0xff]  ;;  %v4358_v1 = vld [vmem:[%s12658_s3 + $0x20] sm:$0xff] }
 0x254   : > { %v4277_v51 = vsel %vm4053_vm0, %v4149_v11, %v7608_v42  ;;  %v4082_v3 = vmul.f32 0.5, %v12881_v14  ;;  %8096 = vmatpush3.msra.mxu1 %v4327_v8  ;;  %v4342_v12 = vsel %vm4310_vm5, %v12889_v45, %v4278_v38  ;;  %v4261_v59 = vsel %vm4037_vm12, %v12891_v33, %v7592_v16  ;;  %v9115_v2 = vpop.eup %9114  ;;  %v4357_v42 = vld [vmem:[%s12658_s3 + $0x18] sm:$0xff]  ;;  %v4363_v38 = vld [vmem:[%s12658_s3 + $0x48] sm:$0xff]  ;;  %v4364_v8 = vld [vmem:[%s12658_s3 + $0x50] sm:$0xff] }
 0x255   : > { %v4148_v40 = vmul.f32 %v4116_v24, %v11477_v37  ;;  %v7607_v53 = vadd.f32 -1.0, %v9113_v20  ;;  %8097 = vmatprep.subr.mxu1 %v4342_v12  ;;  %v4326_v31 = vsel %vm4294_vm13, %v12884_v26, %v4262_v4  ;;  %vm4052_vm8 = vcmp.gt.f32.partialorder %v11477_v37, -0.001  ;;  %v12897_v26 = vld [vmem:[#allocation38_spill] sm:$0xff]  ;;  %v4365_v23 = vld [vmem:[%s12658_s3 + $0x58] sm:$0xff]  ;;  %v4366_v20 = vld [vmem:[%s12658_s3 + $0x60] sm:$0xff] }
 0x256   : > { %v4132_v21 = vmul.f32 %v4100_v34, %v12873_v19  ;;  %v4115_v5 = vadd.f32 1.0, %v4083_v61  ;;  %8098 = vmatpush3.msra.mxu1 %v4326_v31  ;;  %v4341_v47 = vsel %vm4309_vm1, %v12890_v41, %v4277_v51  ;;  %v7591_v52 = vadd.f32 -1.0, %v9115_v2  ;;  %v4359_v24 = vld [vmem:[%s12658_s3 + $0x28] sm:$0xff]  ;;  %v4361_v34 = vld [vmem:[%s12658_s3 + $0x38] sm:$0xff]  ;;  %v4362_v61 = vld [vmem:[%s12658_s3 + $0x40] sm:$0xff] }
 0x257   : > { %v4276_v62 = vsel %vm4052_vm8, %v4148_v40, %v7607_v53  ;;  %v7590_v43 = vadd.f32 -1.0, %v12892_v27  ;;  %8099 = vmatprep.subr.mxu1 %v4341_v47  ;;  %v4325_v57 = vsel %vm4293_vm14, %v12885_v55, %v4261_v59  ;;  %vm4308_vm3 = vcmp.gt.f32.partialorder %v12893_v22, 0.0  ;;  %v4367_v4 = vld [vmem:[%s12658_s3 + $0x68] sm:$0xff]  ;;  %v4369_v45 = vld [vmem:[%s12658_s3 + $0x78] sm:$0xff]  ;;  %v4368_v51 = vld [vmem:[%s12658_s3 + $0x70] sm:$0xff] }
 0x258   : > { %vm4036_vm6 = vcmp.gt.f32.partialorder %v12873_v19, -0.001  ;;  %v4114_v37 = vadd.f32 1.0, %v4082_v3  ;;  %v9117_v58 = vpop.eup %9116  ;;  %8100 = vmatpush3.msra.mxu1 %v4325_v57  ;;  %v4340_v36 = vsel %vm4308_vm3, %v12893_v22, %v4276_v62  ;;  %vm4292_vm2 = vcmp.gt.f32.partialorder %v12894_v0, 0.0  ;;  %v7640_v41 = vld [vmem:[%s12659_s4 + $0x28] sm:$0xff]  ;;  %v7622_v3 = vld [vmem:[%s12659_s4 + $0x18] sm:$0xff] }
 0x259   : > { %v4260_v18 = vsel %vm4036_vm6, %v4132_v21, %v7591_v52  ;;  %v4131_v39 = vmul.f32 %v12896_v6, %v12895_v50  ;;  %8101 = vmatprep.subr.mxu1 %v4340_v36  ;;  %v4147_v44 = vmul.f32 %v4115_v5, %v12878_v28  ;;  %v7606_v46 = vadd.f32 -1.0, %v9117_v58  ;;  %8772 = vmatprep.subr.mxu0 %v7640_v41  ;;  %v7621_v12 = vld [vmem:[%s12659_s4 + $0x10] sm:$0xff]  ;;  %v7639_v33 = vld [vmem:[%s12659_s4 + $0x20] sm:$0xff]  ;;  %v4476_v59 = vld [vmem:[%s12659_s4 + $0x8] sm:$0xff] }
 0x25a   : > { %v4324_v63 = vsel %vm4292_vm2, %v12894_v0, %v4260_v18  ;;  %vm4035_vm4 = vcmp.gt.f32.partialorder %v12895_v50, -0.001  ;;  %vm4051_vm7 = vcmp.gt.f32.partialorder %v12878_v28, -0.001  ;;  %vm4307_vm9 = vcmp.gt.f32.partialorder %v12897_v26, 0.0  ;;  %v12900_v28 = vld [vmem:[#allocation8_spill] sm:$0xff]  ;;  %8773 = vmatpush3.msra.mxu0 %v7640_v41 }
 0x25b   : > { %v9119_v19 = vpop.eup %9118  ;;  %8102 = vmatpush3.msra.mxu1 %v4324_v63  ;;  %v4259_v10 = vsel %vm4035_vm4, %v4131_v39, %v7590_v43  ;;  %v4275_v35 = vsel %vm4051_vm7, %v4147_v44, %v7606_v46  ;;  %v4146_v49 = vmul.f32 %v4114_v37, %v12881_v14  ;;  %v4098_v32 = vadd.f32 1.0, %v12898_v60  ;;  %8774 = vmatprep.subr.mxu0 %v7639_v33  ;;  %v7660_v40 = vld [vmem:[%s12659_s4 + $0x48] sm:$0xff] }
 0x25c   : > { %v7605_v13 = vadd.f32 -1.0, %v9119_v19  ;;  %v4339_v9 = vsel %vm4307_vm9, %v12897_v26, %v4275_v35  ;;  %vm4291_vm10 = vcmp.gt.f32.partialorder %v12899_v25, 0.0  ;;  %vm4050_vm11 = vcmp.gt.f32.partialorder %v12881_v14, -0.001  ;;  %v4354_v14 = vld [vmem:[%s12658_s3] sm:$0xff]  ;;  %8775 = vmatpush3.msra.mxu0 %v7639_v33 }
 0x25d   : > { %8103 = vmatprep.subr.mxu1 %v4339_v9  ;;  %v4323_v48 = vsel %vm4291_vm10, %v12899_v25, %v4259_v10  ;;  %vm4306_vm12 = vcmp.gt.f32.partialorder %v12900_v28, 0.0  ;;  %v4130_v11 = vmul.f32 %v4098_v32, %v12887_v17  ;;  %vm4034_vm15 = vcmp.gt.f32.partialorder %v12887_v17, -0.001  ;;  %v4356_v17 = vld [vmem:[%s12658_s3 + $0x10] sm:$0xff]  ;;  %8804 = vmatprep.subr.mxu0 %v7660_v40  ;;  %v12902_v58 = vld [vmem:[#allocation5_spill] sm:$0xff]  ;;  %v11969_v9 = vld [vmem:[%s12659_s4 + $0x38] sm:$0xff] }
 0x25e   : > { %v4274_v55 = vsel %vm4050_vm11, %v4146_v49, %v7605_v13  ;;  %8104 = vmatpush3.msra.mxu1 %v4323_v48  ;;  %vm4290_vm13 = vcmp.gt.f32.partialorder %v12901_v30, 0.0  ;;  %vm4496_vm14 = vcmask 130048   ;;  %vm12903_vm0 = vcmp.lt.s32.totalorder %v12902_v58, 7  ;;  %v4475_v26 = vld [vmem:[%s12659_s4] sm:$0xff]  ;;  %v11974_v25 = vld [vmem:[%s12659_s4 + $0x68] sm:$0xff] }
 0x25f   : > { %v9121_v15 = vpop.eup %9120  ;;  %v4338_v29 = vsel %vm4306_vm12, %v12900_v28, %v4274_v55  ;;  %vm12904_vm5 = vcmp.lt.s32.totalorder %v12902_v58, 6  ;;  %vm12905_vm1 = vmmov %vm12903_vm0  ;;  %v7659_v10 = vld [vmem:[%s12659_s4 + $0x40] sm:$0xff]  ;;  %vm12907_vm3 = vcmp.lt.s32.totalorder %v12902_v58, 1 }
 0x260   : > { %8105 = vmatprep.subr.mxu1 %v4338_v29  ;;  %v7589_v7 = vadd.f32 -1.0, %v9121_v15  ;;  %vm12906_vm8 = vmmov %vm12904_vm5 }
 0x261   : > { %vm12908_vm6 = vmmov %vm12903_vm0 }
 0x262   : > { %v4258_v16 = vsel %vm4034_vm15, %v4130_v11, %v7589_v7  ;;  %vm12909_vm2 = vmmov %vm12904_vm5 }
 0x263   : > { %v4322_v54 = vsel %vm4290_vm13, %v12901_v30, %v4258_v16  ;;  %vm12910_vm4 = vmmov %vm12907_vm3 }
 0x264   : > { %8106 = vmatpush3.msra.mxu1 %v4322_v54  ;;  %vm12911_vm7 = vmmov %vm12903_vm0 }
 0x265   : > { %4435 = vmatmul.mubr.f32.vlgmr.msra.gmra.mxu1 %v4354_v14  ;;  %8740 = vmatprep.subr.mxu1 %v7622_v3  ;;  %vm12912_vm9 = vmmov %vm12909_vm2 }
 0x266   : > { %4439 = vmatprep.mubr.f32.mxu1 %v4357_v42  ;;  %8741 = vmatpush3.msra.mxu1 %v7622_v3  ;;  %vm12913_vm10 = vmmov %vm12907_vm3 }
 0x267   : > { %8742 = vmatprep.subr.mxu1 %v7621_v12  ;;  %vm12914_vm11 = vmmov %vm12903_vm0 }
 0x268   : > { %8743 = vmatpush3.msra.mxu1 %v7621_v12  ;;  %vm12915_vm12 = vmmov %vm12909_vm2 }
 0x269   : > { %4440 = vmatmul.mubr.f32.gmra.mxu1 %v4356_v17  ;;  %8756 = vmatprep.subr.mxu1 %v4476_v59  ;;  %vm12916_vm15 = vmmov %vm12907_vm3 }
 0x26a   : > { %4444 = vmatprep.mubr.f32.mxu1 %v4359_v24  ;;  %vm12917_vm13 = vmmov %vm12903_vm0 }
 0x26d   : > { %4445 = vmatmul.mubr.f32.gmra.mxu1 %v4358_v1 }
 0x26e   : > { %4449 = vmatprep.mubr.f32.mxu1 %v4361_v34 }
 0x271   : > { %4450 = vmatmul.mubr.f32.gmra.mxu1 %v4360_v56 }
 0x272   : > { %4454 = vmatprep.mubr.f32.mxu1 %v4363_v38 }
 0x275   : > { %4455 = vmatmul.mubr.f32.gmra.mxu1 %v4362_v61 }
 0x276   : > { %4459 = vmatprep.mubr.f32.mxu1 %v4365_v23 }
 0x279   : > { %4460 = vmatmul.mubr.f32.gmra.mxu1 %v4364_v8 }
 0x27a   : > { %4464 = vmatprep.mubr.f32.mxu1 %v4367_v4 }
 0x27d   : > { %4465 = vmatmul.mubr.f32.gmra.mxu1 %v4366_v20 }
 0x27e   : > { %4469 = vmatprep.mubr.f32.mxu1 %v4369_v45 }
 0x281   : > { %4470 = vmatmul.mubr.f32.gmra.mxu1 %v4368_v51 }
 0x325   : > { %v8107_v53 = vpop.f32.mrf.mxu1 }
 0x327   : > { %v8108_v2 = vpop.f32.mrf.mxu1 }
 0x328   : > { %v11926_v21 = vadd.f32 %v8108_v2, %v8107_v53 }
 0x329   : > { %v8110_v31 = vpop.f32.mrf.mxu1 }
 0x32a   : > { %v4477_v52 = vrot.slane %v11926_v21, 1  ;;  %v4755_v43 = vrot.slane %v11926_v21, 2 }
 0x32b   : > { %v8111_v5 = vpop.f32.mrf.mxu1 }
 0x32c   : > { %v11928_v47 = vadd.f32 %v8111_v5, %v8110_v31 }
 0x32d   : > { %v8113_v62 = vpop.f32.mrf.mxu1 }
 0x32e   : > { %v4478_v27 = vrot.slane %v11928_v47, 1  ;;  %v4756_v57 = vrot.slane %v11928_v47, 2  ;;  %v5536_v49 = vrot.slane %v11928_v47, 7  ;;  %v5068_v5 = vrot.slane %v11928_v47, 4 }
 0x32f   : > { %v8114_v22 = vpop.f32.mrf.mxu1 }
 0x330   : > { %v11934_v37 = vadd.f32 %v8114_v22, %v8113_v62  ;;  %v4491_v36 = vsel %vm12903_vm0, %v4477_v52, %v4478_v27  ;;  %v4769_v18 = vsel %vm12904_vm5, %v4755_v43, %v4756_v57  ;;  %vm12918_vm0 = vmmov %vm12909_vm2  ;;  %v5067_v62 = vrot.slane %v11926_v21, 4 }
 0x331   : > { %v8116_v0 = vpop.f32.mrf.mxu1  ;;  %8744 = vmatprep.mubr.msk.f32.mxu1 %vm4496_vm14, %v4491_v36  ;;  %8776 = vmatprep.mubr.msk.f32.mxu0 %vm4496_vm14, %v4769_v18  ;;  %vm12919_vm5 = vmmov %vm12907_vm3 }
 0x332   : > { %v4479_v50 = vrot.slane %v11934_v37, 1  ;;  %v4757_v6 = vrot.slane %v11934_v37, 2  ;;  %v5537_v63 = vrot.slane %v11934_v37, 7 }
 0x333   : > { %v8117_v39 = vpop.f32.mrf.mxu1 }
 0x334   : > { %v11949_v44 = vadd.f32 %v8117_v39, %v8116_v0  ;;  %v4490_v46 = vsel %vm12905_vm1, %v4478_v27, %v4479_v50  ;;  %v4768_v19 = vsel %vm12906_vm8, %v4756_v57, %v4757_v6  ;;  %v11980_v48 = vsel %vm12907_vm3, %v5536_v49, %v5537_v63  ;;  %vm12920_vm8 = vmmov %vm12918_vm0 }
 0x335   : > { %v8119_v35 = vpop.f32.mrf.mxu1  ;;  %8745 = vmatmul.mubr.msk.f32.vlgmr.msra.gmra.mxu1 %vm4496_vm14, %v4490_v46  ;;  %8777 = vmatmul.mubr.msk.f32.vlgmr.msra.gmra.mxu0 %vm4496_vm14, %v4768_v19  ;;  %vm12921_vm3 = vmmov %vm12905_vm1  ;;  %v5069_v0 = vrot.slane %v11934_v37, 4  ;;  %v7649_v46 = vld [vmem:[%s12659_s4 + $0x30] sm:$0xff]  ;;  %v7679_v19 = vld [vmem:[%s12659_s4 + $0x60] sm:$0xff] }
 0x336   : > { %v4480_v13 = vrot.slane %v11949_v44, 1  ;;  %v4758_v60 = vrot.slane %v11949_v44, 2  ;;  %8757 = vmatpush3.msra.mxu1 %v4476_v59  ;;  %8805 = vmatpush3.msra.mxu0 %v7660_v40  ;;  %v5538_v55 = vrot.slane %v11949_v44, 7 }
 0x337   : > { %v8120_v32 = vpop.f32.mrf.mxu1  ;;  %8758 = vmatprep.subr.mxu1 %v4475_v26  ;;  %8806 = vmatprep.subr.mxu0 %v7659_v10 }
 0x338   : > { %v11983_v28 = vadd.f32 %v8120_v32, %v8119_v35  ;;  %v4489_v15 = vsel %vm12908_vm6, %v4479_v50, %v4480_v13  ;;  %v4767_v29 = vsel %vm12909_vm2, %v4757_v6, %v4758_v60  ;;  %8759 = vmatpush3.msra.mxu1 %v4475_v26  ;;  %8807 = vmatpush3.msra.mxu0 %v7659_v10  ;;  %vm12922_vm6 = vmmov %vm12918_vm0  ;;  %vm12923_vm2 = vcmp.lt.s32.totalorder %v12902_v58, 4  ;;  %v7700_v32 = vld [vmem:[%s12659_s4 + $0x88] sm:$0xff] }
 0x339   : > { %v8122_v11 = vpop.f32.mrf.mxu1  ;;  %8747 = vmatprep.mubr.msk.f32.mxu1 %vm4496_vm14, %v4489_v15  ;;  %8779 = vmatprep.mubr.msk.f32.mxu0 %vm4496_vm14, %v4767_v29  ;;  %v11997_v14 = vsel %vm12910_vm4, %v5537_v63, %v5538_v55  ;;  %v5081_v50 = vsel %vm12923_vm2, %v5067_v62, %v5068_v5  ;;  %vm12924_vm4 = vmmov %vm12923_vm2  ;;  %v5380_v15 = vrot.slane %v11928_v47, 6  ;;  %v4911_v29 = vrot.slane %v11926_v21, 3 }
 0x33a   : > { %v4481_v7 = vrot.slane %v11983_v28, 1  ;;  %v4759_v16 = vrot.slane %v11983_v28, 2  ;;  %8788 = vmatprep.subr.mxu1 %v11969_v9  ;;  %8836 = vmatprep.subr.mxu0 %v11974_v25  ;;  %v5539_v1 = vrot.slane %v11983_v28, 7  ;;  %v5071_v6 = vrot.slane %v11983_v28, 4 }
 0x33b   : > { %v8123_v30 = vpop.f32.mrf.mxu1 }
 0x33c   : > { %v11999_v54 = vadd.f32 %v8123_v30, %v8122_v11  ;;  %v4488_v42 = vsel %vm12911_vm7, %v4480_v13, %v4481_v7  ;;  %v4766_v17 = vsel %vm12912_vm9, %v4758_v60, %v4759_v16  ;;  %v12012_v61 = vsel %vm12913_vm10, %v5538_v55, %v5539_v1  ;;  %vm12925_vm7 = vmmov %vm12923_vm2  ;;  %v7670_v60 = vld [vmem:[%s12659_s4 + $0x58] sm:$0xff] }
 0x33d   : > { %v8125_v24 = vpop.f32.mrf.mxu1  ;;  %8748 = vmatmul.mubr.msk.f32.gmra.mxu1 %vm4496_vm14, %v4488_v42  ;;  %8780 = vmatmul.mubr.msk.f32.gmra.mxu0 %vm4496_vm14, %v4766_v17  ;;  %vm12926_vm9 = vmmov %vm12923_vm2  ;;  %v4912_v55 = vrot.slane %v11928_v47, 3  ;;  %v5379_v11 = vrot.slane %v11926_v21, 6  ;;  %v5381_v30 = vrot.slane %v11934_v37, 6 }
 0x33e   : > { %v4482_v34 = vrot.slane %v11999_v54, 1  ;;  %v4760_v56 = vrot.slane %v11999_v54, 2  ;;  %v5540_v23 = vrot.slane %v11999_v54, 7  ;;  %v5072_v63 = vrot.slane %v11999_v54, 4  ;;  %vm12927_vm10 = vmmov %vm12923_vm2 }
 0x33f   : > { %v8126_v38 = vpop.f32.mrf.mxu1 }
 0x340   : > { %v12015_v8 = vadd.f32 %v8126_v38, %v8125_v24  ;;  %v4487_v4 = vsel %vm12914_vm11, %v4481_v7, %v4482_v34  ;;  %v4765_v20 = vsel %vm12915_vm12, %v4759_v16, %v4760_v56  ;;  %v12027_v12 = vsel %vm12916_vm15, %v5539_v1, %v5540_v23  ;;  %vm12928_vm11 = vmmov %vm12923_vm2 }
 0x341   : > { %v8128_v45 = vpop.f32.mrf.mxu1  ;;  %8750 = vmatprep.mubr.msk.f32.mxu1 %vm4496_vm14, %v4487_v4  ;;  %8782 = vmatprep.mubr.msk.f32.mxu0 %vm4496_vm14, %v4765_v20  ;;  %v5077_v35 = vsel %vm12927_vm10, %v5071_v6, %v5072_v63  ;;  %vm12929_vm12 = vmmov %vm12923_vm2  ;;  %v4913_v16 = vrot.slane %v11934_v37, 3  ;;  %v4914_v24 = vrot.slane %v11949_v44, 3  ;;  %v5382_v1 = vrot.slane %v11949_v44, 6 }
 0x342   : > { %v4483_v51 = vrot.slane %v12015_v8, 1  ;;  %v4761_v41 = vrot.slane %v12015_v8, 2  ;;  %v5541_v33 = vrot.slane %v12015_v8, 7  ;;  %v5073_v10 = vrot.slane %v12015_v8, 4  ;;  %vm12930_vm15 = vmmov %vm12923_vm2 }
 0x343   : > { %v8129_v3 = vpop.f32.mrf.mxu1  ;;  %v4915_v38 = vrot.slane %v11983_v28, 3 }
 0x344   : > { %v12030_v59 = vadd.f32 %v8129_v3, %v8128_v45  ;;  %v4486_v40 = vsel %vm12917_vm13, %v4482_v34, %v4483_v51  ;;  %v4764_v53 = vsel %vm12918_vm0, %v4760_v56, %v4761_v41  ;;  %v12046_v27 = vsel %vm12919_vm5, %v5540_v23, %v5541_v33  ;;  %v7699_v3 = vld [vmem:[%s12659_s4 + $0x80] sm:$0xff] }
 0x345   : > { %8751 = vmatmul.mubr.msk.f32.gmra.mxu1 %vm4496_vm14, %v4486_v40  ;;  %8783 = vmatmul.mubr.msk.f32.gmra.mxu0 %vm4496_vm14, %v4764_v53  ;;  %vm12931_vm13 = vcmp.lt.s32.totalorder %v12902_v58, 5  ;;  %vm12932_vm0 = vcmp.lt.s32.totalorder %v12902_v58, 2  ;;  %v5383_v23 = vrot.slane %v11983_v28, 6  ;;  %v4916_v45 = vrot.slane %v11999_v54, 3 }
 0x346   : > { %v4484_v2 = vrot.slane %v12030_v59, 1  ;;  %v4762_v31 = vrot.slane %v12030_v59, 2  ;;  %v5074_v13 = vrot.slane %v12030_v59, 4  ;;  %v4925_v42 = vsel %vm12931_vm13, %v4911_v29, %v4912_v55  ;;  %vm12933_vm5 = vmmov %vm12931_vm13 }
 0x347   : > { %v5393_v17 = vsel %vm12932_vm0, %v5379_v11, %v5380_v15  ;;  %v4924_v34 = vsel %vm12933_vm5, %v4912_v55, %v4913_v16  ;;  %vm12938_vm2 = vmmov %vm12932_vm0  ;;  %v5230_v55 = vrot.slane %v12030_v59, 5 }
 0x348   : > { %v4485_v57 = vsel %vm12905_vm1, %v4483_v51, %v4484_v2  ;;  %v4763_v22 = vsel %vm12920_vm8, %v4761_v41, %v4762_v31  ;;  %v4492_v36 = vsel %vm12921_vm3, %v4484_v2, %v4477_v52  ;;  %v4770_v18 = vsel %vm12922_vm6, %v4762_v31, %v4755_v43  ;;  %vm12934_vm1 = vmmov %vm12932_vm0  ;;  %v7669_v41 = vld [vmem:[%s12659_s4 + $0x50] sm:$0xff] }
 0x349   : > { %8753 = vmatprep.mubr.msk.f32.mxu1 %vm4496_vm14, %v4485_v57  ;;  %8785 = vmatprep.mubr.msk.f32.mxu0 %vm4496_vm14, %v4763_v22  ;;  %v5070_v52 = vrot.slane %v11949_v44, 4  ;;  %v5080_v43 = vsel %vm12924_vm4, %v5068_v5, %v5069_v0  ;;  %v5082_v7 = vsel %vm12930_vm15, %v5074_v13, %v5067_v62  ;;  %v5392_v56 = vsel %vm12934_vm1, %v5380_v15, %v5381_v30  ;;  %vm12935_vm8 = vmmov %vm12933_vm5 }
 0x34a   : > { %8754 = vmatmul.mubr.msk.f32.gmra.mxu1 %vm4496_vm14, %v4492_v36  ;;  %8786 = vmatmul.mubr.msk.f32.gmra.mxu0 %vm4496_vm14, %v4770_v18  ;;  %v4923_v4 = vsel %vm12935_vm8, %v4913_v16, %v4914_v24  ;;  %vm12936_vm3 = vmmov %vm12932_vm0  ;;  %v5384_v51 = vrot.slane %v11999_v54, 6  ;;  %v5390_v53 = vsel %vm12938_vm2, %v5382_v1, %v5383_v23  ;;  %v4917_v2 = vrot.slane %v12015_v8, 3  ;;  %v7690_v36 = vld [vmem:[%s12659_s4 + $0x78] sm:$0xff] }
 0x34b   : > { %8760 = vmatprep.mubr.msk.f32.mxu1 %vm4496_vm14, %v11926_v21  ;;  %8808 = vmatprep.mubr.msk.f32.mxu0 %vm4496_vm14, %v5081_v50  ;;  %v5079_v39 = vsel %vm12925_vm7, %v5069_v0, %v5070_v52  ;;  %v5078_v26 = vsel %vm12926_vm9, %v5070_v52, %v5071_v6  ;;  %v5391_v20 = vsel %vm12936_vm3, %v5381_v30, %v5382_v1  ;;  %vm12937_vm6 = vmmov %vm12933_vm5  ;;  %v5385_v31 = vrot.slane %v12015_v8, 6 }
 0x34c   : > { %v4922_v40 = vsel %vm12937_vm6, %v4914_v24, %v4915_v38  ;;  %vm12939_vm4 = vmmov %vm12933_vm5  ;;  %v4918_v57 = vrot.slane %v12030_v59, 3  ;;  %v5386_v22 = vrot.slane %v12030_v59, 6  ;;  %v5223_v6 = vrot.slane %v11926_v21, 5 }
 0x34d   : > { %v4921_v5 = vsel %vm12939_vm4, %v4915_v38, %v4916_v45  ;;  %vm12940_vm7 = vmmov %vm12932_vm0  ;;  %v5535_v15 = vrot.slane %v11926_v21, 7 }
 0x34e   : > { %8761 = vmatmul.mubr.msk.f32.vlgmr.msra.gmra.mxu1 %vm4496_vm14, %v11928_v47  ;;  %8809 = vmatmul.mubr.msk.f32.vlgmr.msra.gmra.mxu0 %vm4496_vm14, %v5080_v43  ;;  %v5389_v62 = vsel %vm12940_vm7, %v5383_v23, %v5384_v51  ;;  %vm12941_vm9 = vmmov %vm12939_vm4  ;;  %v5224_v43 = vrot.slane %v11928_v47, 5  ;;  %vm12955_vm7 = vcmp.lt.s32.totalorder %v12902_v58, 1 }
 0x34f   : > { %8763 = vmatprep.mubr.msk.f32.mxu1 %vm4496_vm14, %v11934_v37  ;;  %8811 = vmatprep.mubr.msk.f32.mxu0 %vm4496_vm14, %v5079_v39  ;;  %v4920_v18 = vsel %vm12941_vm9, %v4916_v45, %v4917_v2  ;;  %vm12942_vm10 = vmmov %vm12932_vm0 }
 0x350   : > { %8789 = vmatpush3.msra.mxu1 %v11969_v9  ;;  %8837 = vmatpush3.msra.mxu0 %v11974_v25  ;;  %v5076_v9 = vsel %vm12928_vm11, %v5072_v63, %v5073_v10  ;;  %v5075_v25 = vsel %vm12929_vm12, %v5073_v10, %v5074_v13  ;;  %v5388_v0 = vsel %vm12942_vm10, %v5384_v51, %v5385_v31  ;;  %vm12943_vm11 = vmmov %vm12939_vm4 }
 0x351   : > { %8790 = vmatprep.subr.mxu1 %v7649_v46  ;;  %8838 = vmatprep.subr.mxu0 %v7679_v19  ;;  %v4919_v50 = vsel %vm12943_vm11, %v4917_v2, %v4918_v57  ;;  %vm12944_vm12 = vmmov %vm12932_vm0  ;;  %vm5912_vm11 = vcmask 523264  }
 0x352   : > { %8764 = vmatmul.mubr.msk.f32.gmra.mxu1 %vm4496_vm14, %v11949_v44  ;;  %8812 = vmatmul.mubr.msk.f32.gmra.mxu0 %vm4496_vm14, %v5078_v26  ;;  %v5387_v52 = vsel %vm12944_vm12, %v5385_v31, %v5386_v22  ;;  %vm12945_vm15 = vmmov %vm12939_vm4  ;;  %v5226_v26 = vrot.slane %v11949_v44, 5 }
 0x353   : > { %8766 = vmatprep.mubr.msk.f32.mxu1 %vm4496_vm14, %v11983_v28  ;;  %8814 = vmatprep.mubr.msk.f32.mxu0 %vm4496_vm14, %v5077_v35  ;;  %v4926_v39 = vsel %vm12945_vm15, %v4918_v57, %v4911_v29  ;;  %vm12946_vm13 = vmmov %vm12932_vm0  ;;  %vm12947_vm0 = vcmp.lt.s32.totalorder %v12902_v58, 3  ;;  %v5227_v35 = vrot.slane %v11983_v28, 5  ;;  %v5549_v29 = vsel %vm12955_vm7, %v5535_v15, %v5536_v49  ;;  %v5910_v49 = vld [vmem:[%s12661_s6] sm:$0xff] }
 0x354   : > { %8791 = vmatpush3.msra.mxu1 %v7649_v46  ;;  %8839 = vmatpush3.msra.mxu0 %v7679_v19  ;;  %v5394_v63 = vsel %vm12946_vm13, %v5386_v22, %v5379_v11  ;;  %v5225_v46 = vrot.slane %v11934_v37, 5  ;;  %v5237_v19 = vsel %vm12947_vm0, %v5223_v6, %v5224_v43  ;;  %vm12948_vm5 = vmmov %vm12947_vm0  ;;  %v5542_v11 = vrot.slane %v12030_v59, 7 }
 0x355   : > { %8820 = vmatprep.subr.mxu1 %v7670_v60  ;;  %8868 = vmatprep.subr.mxu0 %v7700_v32  ;;  %vm12949_vm1 = vmmov %vm12947_vm0 }
 0x356   : > { %8767 = vmatmul.mubr.msk.f32.gmra.mxu1 %vm4496_vm14, %v11999_v54  ;;  %8815 = vmatmul.mubr.msk.f32.gmra.mxu0 %vm4496_vm14, %v5076_v9  ;;  %v5236_v10 = vsel %vm12948_vm5, %v5224_v43, %v5225_v46  ;;  %v5235_v13 = vsel %vm12949_vm1, %v5225_v46, %v5226_v26  ;;  %vm12950_vm8 = vmmov %vm12947_vm0 }
 0x357   : > { %8769 = vmatprep.mubr.msk.f32.mxu1 %vm4496_vm14, %v12015_v8  ;;  %8817 = vmatprep.mubr.msk.f32.mxu0 %vm4496_vm14, %v5075_v25  ;;  %v5234_v9 = vsel %vm12950_vm8, %v5226_v26, %v5227_v35  ;;  %vm12951_vm3 = vmmov %vm12947_vm0 }
 0x358   : > { %vm12952_vm6 = vmmov %vm12947_vm0 }
 0x359   : > { %vm12953_vm2 = vmmov %vm12947_vm0 }
 0x35a   : > { %8770 = vmatmul.mubr.msk.f32.gmra.mxu1 %vm4496_vm14, %v12030_v59  ;;  %8818 = vmatmul.mubr.msk.f32.gmra.mxu0 %vm4496_vm14, %v5082_v7  ;;  %vm12954_vm4 = vmmov %vm12947_vm0 }
 0x35b   : > { %8792 = vmatprep.mubr.msk.f32.mxu1 %vm4496_vm14, %v4925_v42  ;;  %8840 = vmatprep.mubr.msk.f32.mxu0 %vm4496_vm14, %v5393_v17  ;;  %vm12956_vm9 = vmmov %vm12955_vm7 }
 0x35c   : > { %vm12957_vm10 = vmmov %vm12955_vm7 }
 0x35e   : > { %8793 = vmatmul.mubr.msk.f32.vlgmr.msra.gmra.mxu1 %vm4496_vm14, %v4924_v34  ;;  %8841 = vmatmul.mubr.msk.f32.vlgmr.msra.gmra.mxu0 %vm4496_vm14, %v5392_v56 }
 0x35f   : > { %8795 = vmatprep.mubr.msk.f32.mxu1 %vm4496_vm14, %v4923_v4  ;;  %8843 = vmatprep.mubr.msk.f32.mxu0 %vm4496_vm14, %v5391_v20 }
 0x360   : > { %8821 = vmatpush3.msra.mxu1 %v7670_v60  ;;  %8869 = vmatpush3.msra.mxu0 %v7700_v32  ;;  %v5228_v60 = vrot.slane %v11999_v54, 5  ;;  %v7689_v32 = vld [vmem:[%s12659_s4 + $0x70] sm:$0xff] }
 0x361   : > { %8822 = vmatprep.subr.mxu1 %v7669_v41  ;;  %8870 = vmatprep.subr.mxu0 %v7699_v3 }
 0x362   : > { %8796 = vmatmul.mubr.msk.f32.gmra.mxu1 %vm4496_vm14, %v4922_v40  ;;  %8844 = vmatmul.mubr.msk.f32.gmra.mxu0 %vm4496_vm14, %v5390_v53  ;;  %v5233_v25 = vsel %vm12951_vm3, %v5227_v35, %v5228_v60 }
 0x363   : > { %8798 = vmatprep.mubr.msk.f32.mxu1 %vm4496_vm14, %v4921_v5  ;;  %8846 = vmatprep.mubr.msk.f32.mxu0 %vm4496_vm14, %v5389_v62 }
 0x364   : > { %8823 = vmatpush3.msra.mxu1 %v7669_v41  ;;  %8871 = vmatpush3.msra.mxu0 %v7699_v3 }
 0x365   : > { %8852 = vmatprep.subr.mxu1 %v7690_v36 }
 0x366   : > { %8799 = vmatmul.mubr.msk.f32.gmra.mxu1 %vm4496_vm14, %v4920_v18  ;;  %8847 = vmatmul.mubr.msk.f32.gmra.mxu0 %vm4496_vm14, %v5388_v0 }
 0x367   : > { %8801 = vmatprep.mubr.msk.f32.mxu1 %vm4496_vm14, %v4919_v50  ;;  %8849 = vmatprep.mubr.msk.f32.mxu0 %vm4496_vm14, %v5387_v52 }
 0x36a   : > { %8802 = vmatmul.mubr.msk.f32.gmra.mxu1 %vm4496_vm14, %v4926_v39  ;;  %8850 = vmatmul.mubr.msk.f32.gmra.mxu0 %vm4496_vm14, %v5394_v63 }
 0x36b   : > { %8824 = vmatprep.mubr.msk.f32.mxu1 %vm4496_vm14, %v5237_v19  ;;  %8872 = vmatprep.mubr.msk.f32.mxu0 %vm4496_vm14, %v11928_v47  ;;  %v5550_v47 = vsel %vm12957_vm10, %v5542_v11, %v5535_v15 }
 0x36e   : > { %8825 = vmatmul.mubr.msk.f32.vlgmr.msra.gmra.mxu1 %vm4496_vm14, %v5236_v10  ;;  %8873 = vmatmul.mubr.msk.f32.vlgmr.msra.gmra.mxu0 %vm4496_vm14, %v11934_v37  ;;  %v5229_v37 = vrot.slane %v12015_v8, 5 }
 0x36f   : > { %8827 = vmatprep.mubr.msk.f32.mxu1 %vm4496_vm14, %v5235_v13  ;;  %8875 = vmatprep.mubr.msk.f32.mxu0 %vm4496_vm14, %v11949_v44 }
 0x370   : > { %8853 = vmatpush3.msra.mxu1 %v7690_v36  ;;  %v5232_v44 = vsel %vm12952_vm6, %v5228_v60, %v5229_v37 }
 0x371   : > { %8854 = vmatprep.subr.mxu1 %v7689_v32 }
 0x372   : > { %8828 = vmatmul.mubr.msk.f32.gmra.mxu1 %vm4496_vm14, %v5234_v9  ;;  %8876 = vmatmul.mubr.msk.f32.gmra.mxu0 %vm4496_vm14, %v11983_v28  ;;  %v5231_v28 = vsel %vm12953_vm2, %v5229_v37, %v5230_v55 }
 0x373   : > { %8830 = vmatprep.mubr.msk.f32.mxu1 %vm4496_vm14, %v5233_v25  ;;  %8878 = vmatprep.mubr.msk.f32.mxu0 %vm4496_vm14, %v11999_v54  ;;  %v5238_v54 = vsel %vm12954_vm4, %v5230_v55, %v5223_v6 }
 0x374   : > { %8855 = vmatpush3.msra.mxu1 %v7689_v32 }
 0x376   : > { %8831 = vmatmul.mubr.msk.f32.gmra.mxu1 %vm4496_vm14, %v5232_v44  ;;  %8879 = vmatmul.mubr.msk.f32.gmra.mxu0 %vm4496_vm14, %v12015_v8 }
 0x377   : > { %8833 = vmatprep.mubr.msk.f32.mxu1 %vm4496_vm14, %v5231_v28  ;;  %8881 = vmatprep.mubr.msk.f32.mxu0 %vm4496_vm14, %v12030_v59 }
 0x37a   : > { %8834 = vmatmul.mubr.msk.f32.gmra.mxu1 %vm4496_vm14, %v5238_v54  ;;  %8882 = vmatmul.mubr.msk.f32.gmra.mxu0 %vm4496_vm14, %v11926_v21  ;;  %v5543_v21 = vsel %vm12956_vm9, %v5541_v33, %v5542_v11 }
 0x37b   : > { %8856 = vmatprep.mubr.msk.f32.mxu1 %vm4496_vm14, %v5549_v29 }
 0x37e   : > { %8857 = vmatmul.mubr.msk.f32.vlgmr.msra.gmra.mxu1 %vm4496_vm14, %v11980_v48 }
 0x37f   : > { %8859 = vmatprep.mubr.msk.f32.mxu1 %vm4496_vm14, %v11997_v14 }
 0x382   : > { %8860 = vmatmul.mubr.msk.f32.gmra.mxu1 %vm4496_vm14, %v12012_v61 }
 0x383   : > { %8862 = vmatprep.mubr.msk.f32.mxu1 %vm4496_vm14, %v12027_v12 }
 0x386   : > { %8863 = vmatmul.mubr.msk.f32.gmra.mxu1 %vm4496_vm14, %v12046_v27 }
 0x387   : > { %8865 = vmatprep.mubr.msk.f32.mxu1 %vm4496_vm14, %v5543_v21 }
 0x38a   : > { %8866 = vmatmul.mubr.msk.f32.gmra.mxu1 %vm4496_vm14, %v5550_v47 }
 0x38b   : > { %8900 = vmatprep.mubr.msk.f32.mxu1 %vm5912_vm11, %v5910_v49 }
 0x3f5   : > { %v8746_v48 = vpop.f32.mrf.mxu1  ;;  %v12277_v14 = vpop.f32.mrf.mxu0 }
 0x3f7   : > { %v4587_v61 = vpop.f32.mrf.mxu1  ;;  %v12279_v8 = vpop.f32.mrf.mxu0 }
 0x3fd   : > { %v8749_v12 = vpop.f32.mrf.mxu1  ;;  %v8781_v33 = vpop.f32.mrf.mxu0 }
 0x3ff   : > { %v4597_v59 = vpop.f32.mrf.mxu1  ;;  %v4874_v27 = vpop.f32.mrf.mxu0 }
 0x405   : > { %v8752_v7 = vpop.f32.mrf.mxu1  ;;  %v8784_v16 = vpop.f32.mrf.mxu0 }
 0x407   : > { %v4607_v30 = vpop.f32.mrf.mxu1  ;;  %v4884_v42 = vpop.f32.mrf.mxu0 }
 0x40a   : > { %v8755_v17 = vpop.f32.mrf.mxu1  ;;  %v12281_v24 = vpop.f32.mrf.mxu0 }
 0x40c   : > { %v4617_v1 = vpop.f32.mrf.mxu1  ;;  %v12283_v34 = vpop.f32.mrf.mxu0 }
 0x40e   : > { %v8762_v56 = vpop.f32.mrf.mxu1  ;;  %v12285_v38 = vpop.f32.mrf.mxu0 }
 0x40f   : > { %v4722_v54 = vadd.f32 %v8762_v56, %v8746_v48 }
 0x410   : > { %v4716_v23 = vpop.f32.mrf.mxu1  ;;  %v12287_v4 = vpop.f32.mrf.mxu0 }
 0x411   : > { %v4717_v49 = vadd.f32 %v4716_v23, %v4587_v61 }
 0x412   : > { %v8765_v20 = vpop.f32.mrf.mxu1  ;;  %v8813_v45 = vpop.f32.mrf.mxu0 }
 0x413   : > { %v4732_v9 = vadd.f32 %v8765_v20, %v8749_v12  ;;  %v4904_v12 = vadd.f32 %v12277_v14, %v4722_v54  ;;  %v4903_v56 = vadd.f32 %v12279_v8, %v4717_v49 }
 0x414   : > { %v4726_v51 = vpop.f32.mrf.mxu1  ;;  %v5186_v41 = vpop.f32.mrf.mxu0 }
 0x415   : > { %v4727_v55 = vadd.f32 %v4726_v51, %v4597_v59  ;;  %v4906_v15 = vadd.f32 %v8781_v33, %v4732_v9 }
 0x416   : > { %v8768_v3 = vpop.f32.mrf.mxu1  ;;  %v8816_v40 = vpop.f32.mrf.mxu0 }
 0x417   : > { %v4742_v28 = vadd.f32 %v8768_v3, %v8752_v7  ;;  %v4905_v58 = vadd.f32 %v4874_v27, %v4727_v55 }
 0x418   : > { %v4736_v53 = vpop.f32.mrf.mxu1  ;;  %v12289_v2 = vpop.f32.mrf.mxu0 }
 0x419   : > { %v4737_v21 = vadd.f32 %v4736_v53, %v4607_v30 }
 0x41a   : > { %v8771_v31 = vpop.f32.mrf.mxu1  ;;  %v12291_v5 = vpop.f32.mrf.mxu0 }
 0x41b   : > { %v4907_v7 = vadd.f32 %v4884_v42, %v4737_v21 }
 0x41c   : > { %v4746_v62 = vpop.f32.mrf.mxu1  ;;  %v12293_v57 = vpop.f32.mrf.mxu0 }
 0x41e   : > { %v8794_v22 = vpop.f32.mrf.mxu1  ;;  %v12295_v36 = vpop.f32.mrf.mxu0 }
 0x41f   : > { %v5060_v48 = vadd.f32 %v8794_v22, %v4904_v12 }
 0x420   : > { %v5020_v18 = vpop.f32.mrf.mxu1  ;;  %v12297_v0 = vpop.f32.mrf.mxu0 }
 0x421   : > { %12958 = vst [vmem:[#allocation19_spill] sm:$0xff] %v12297_v0  ;;  %v4908_v0 = vadd.f32 %v8784_v16, %v4742_v28  ;;  %v5059_v23 = vadd.f32 %v5020_v18, %v4903_v56  ;;  %v5216_v42 = vadd.f32 %v12285_v38, %v5060_v48 }
 0x422   : > { %v8797_v50 = vpop.f32.mrf.mxu1  ;;  %v8845_v52 = vpop.f32.mrf.mxu0 }
 0x423   : > { %v5062_v47 = vadd.f32 %v8797_v50, %v4906_v15 }
 0x424   : > { %v5030_v43 = vpop.f32.mrf.mxu1  ;;  %v12299_v6 = vpop.f32.mrf.mxu0 }
 0x425   : > { %v5061_v20 = vadd.f32 %v5030_v43, %v4905_v58  ;;  %v5218_v33 = vadd.f32 %v8813_v45, %v5062_v47 }
 0x426   : > { %v8800_v39 = vpop.f32.mrf.mxu1  ;;  %v12301_v63 = vpop.f32.mrf.mxu0 }
 0x427   : > { %v5064_v51 = vadd.f32 %v8800_v39, %v4908_v0 }
 0x428   : > { %v5040_v46 = vpop.f32.mrf.mxu1  ;;  %v12303_v19 = vpop.f32.mrf.mxu0 }
 0x429   : > { %12959 = vst [vmem:[#allocation42_spill] sm:$0xff] %v12303_v19  ;;  %v4747_v19 = vadd.f32 %v4746_v62, %v4617_v1  ;;  %v5063_v30 = vadd.f32 %v5040_v46, %v4907_v7  ;;  %v5220_v53 = vadd.f32 %v8816_v40, %v5064_v51 }
 0x42a   : > { %v8803_v26 = vpop.f32.mrf.mxu1  ;;  %v12305_v10 = vpop.f32.mrf.mxu0 }
 0x42b   : > { %12960 = vst [vmem:[#allocation44_spill] sm:$0xff] %v12305_v10  ;;  %v4909_v16 = vadd.f32 %v12283_v34, %v4747_v19  ;;  %v5219_v8 = vadd.f32 %v12289_v2, %v5063_v30 }
 0x42c   : > { %v5050_v35 = vpop.f32.mrf.mxu1  ;;  %v12307_v13 = vpop.f32.mrf.mxu0 }
 0x42d   : > { %12961 = vst [vmem:[#allocation12_spill] sm:$0xff] %v12307_v13  ;;  %v4752_v13 = vadd.f32 %v8771_v31, %v8755_v17  ;;  %v5217_v17 = vadd.f32 %v5186_v41, %v5061_v20  ;;  %v5065_v31 = vadd.f32 %v5050_v35, %v4909_v16 }
 0x42e   : > { %v8826_v60 = vpop.f32.mrf.mxu1  ;;  %v12309_v37 = vpop.f32.mrf.mxu0 }
 0x42f   : > { %12962 = vst [vmem:[#allocation24_spill] sm:$0xff] %v12309_v37  ;;  %v4910_v61 = vadd.f32 %v12281_v24, %v4752_v13  ;;  %v5372_v50 = vadd.f32 %v8826_v60, %v5216_v42  ;;  %v5215_v24 = vadd.f32 %v12287_v4, %v5059_v23  ;;  %v5221_v40 = vadd.f32 %v12293_v57, %v5065_v31 }
 0x430   : > { %v5332_v32 = vpop.f32.mrf.mxu1  ;;  %v12311_v29 = vpop.f32.mrf.mxu0 }
 0x431   : > { %v5066_v58 = vadd.f32 %v8803_v26, %v4910_v61  ;;  %v5371_v46 = vadd.f32 %v5332_v32, %v5215_v24  ;;  %v5528_v13 = vadd.f32 %v12295_v36, %v5372_v50  ;;  %v12964_v32 = vld [vmem:[#allocation19_spill] sm:$0xff] }
 0x432   : > { %v8829_v25 = vpop.f32.mrf.mxu1  ;;  %v8877_v37 = vpop.f32.mrf.mxu0  ;;  %v12965_v15 = vld [vmem:[#allocation44_spill] sm:$0xff] }
 0x433   : > { %v5374_v27 = vadd.f32 %v8829_v25, %v5218_v33  ;;  %v5222_v41 = vadd.f32 %v12291_v5, %v5066_v58  ;;  %v12963_v25 = vld [vmem:[#allocation42_spill] sm:$0xff] }
 0x434   : > { %v5342_v44 = vpop.f32.mrf.mxu1  ;;  %v5770_v1 = vpop.f32.mrf.mxu0 }
 0x435   : > { %v5373_v45 = vadd.f32 %v5342_v44, %v5217_v17  ;;  %v5530_v0 = vadd.f32 %v8845_v52, %v5374_v27  ;;  %v5527_v44 = vadd.f32 %v12964_v32, %v5371_v46 }
 0x436   : > { %v8832_v11 = vpop.f32.mrf.mxu1  ;;  %v8880_v18 = vpop.f32.mrf.mxu0  ;;  %v12967_v7 = vld [vmem:[#allocation24_spill] sm:$0xff] }
 0x437   : > { %v5376_v22 = vadd.f32 %v8832_v11, %v5220_v53  ;;  %v5529_v38 = vadd.f32 %v12299_v6, %v5373_v45 }
 0x438   : > { %v5352_v10 = vpop.f32.mrf.mxu1  ;;  %v5780_v2 = vpop.f32.mrf.mxu0 }
 0x439   : > { %v5375_v34 = vadd.f32 %v5352_v10, %v5219_v8  ;;  %v5532_v35 = vadd.f32 %v12301_v63, %v5376_v22  ;;  %v7709_v63 = vld [vmem:[%s12660_s5] ss:$0 sm:$0xff] }
 0x43a   : > { %v8835_v59 = vpop.f32.mrf.mxu1  ;;  %v8883_v11 = vpop.f32.mrf.mxu0 }
 0x43b   : > { %v5378_v26 = vadd.f32 %v8835_v59, %v5222_v41  ;;  %v5531_v5 = vadd.f32 %v12963_v25, %v5375_v34 }
 0x43c   : > { %v5362_v3 = vpop.f32.mrf.mxu1  ;;  %v5790_v27 = vpop.f32.mrf.mxu0 }
 0x43d   : > { %v5377_v52 = vadd.f32 %v5362_v3, %v5221_v40  ;;  %v5534_v54 = vadd.f32 %v12965_v15, %v5378_v26 }
 0x43e   : > { %v8858_v14 = vpop.f32.mrf.mxu1 }
 0x43f   : > { %v5684_v55 = vadd.f32 %v8858_v14, %v5528_v13 }
 0x440   : > { %v5644_v62 = vpop.f32.mrf.mxu1 }
 0x441   : > { %v5683_v36 = vadd.f32 %v5644_v62, %v5527_v44  ;;  %v5800_v33 = vadd.f32 %v12967_v7, %v5684_v55 }
 0x442   : > { %v8861_v43 = vpop.f32.mrf.mxu1 }
 0x443   : > { %v5686_v39 = vadd.f32 %v8861_v43, %v5530_v0  ;;  %v5799_v23 = vadd.f32 %v12311_v29, %v5683_v36  ;;  %v12351_v53 = vadd.f32 %v7709_v63, %v5800_v33 }
 0x444   : > { %v5654_v19 = vpop.f32.mrf.mxu1 }
 0x445   : > { %v5685_v4 = vadd.f32 %v5654_v19, %v5529_v38  ;;  %v5802_v9 = vadd.f32 %v8877_v37, %v5686_v39  ;;  %v12966_v37 = vld [vmem:[#allocation12_spill] sm:$0xff]  ;;  %v12356_v62 = vadd.f32 %v7709_v63, %v5799_v23  ;;  %v12365_v24 = vmin.f32 %v12351_v53, 0.0 }
 0x446   : > { %v8864_v60 = vpop.f32.mrf.mxu1  ;;  %v5533_v49 = vadd.f32 %v12966_v37, %v5377_v52 }
 0x447   : > { %v5688_v10 = vadd.f32 %v8864_v60, %v5532_v35  ;;  %v5801_v21 = vadd.f32 %v5770_v1, %v5685_v4  ;;  %v12332_v12 = vadd.f32 %v7709_v63, %v5802_v9  ;;  %v5864_v41 = vmul.f32 1.442695, %v12365_v24 }
 0x448   : > { %v5664_v57 = vpop.f32.mrf.mxu1  ;;  %vm5831_vm7 = vcmp.gt.f32.partialorder %v12365_v24, -0.001 }
 0x449   : > { %v5804_v28 = vadd.f32 %v8880_v18, %v5688_v10  ;;  %v5687_v6 = vadd.f32 %v5664_v57, %v5531_v5  ;;  %v12343_v16 = vadd.f32 %v7709_v63, %v5801_v21  ;;  %v12346_v17 = vmin.f32 %v12332_v12, 0.0 }
 0x44a   : > { %v8867_v47 = vpop.f32.mrf.mxu1  ;;  %v12368_v18 = vmin.f32 %v12356_v62, 0.0  ;;  %v5839_v5 = vmul.f32 0.5, %v12365_v24  ;;  %vm5897_vm4 = vcmp.gt.f32.partialorder %v12332_v12, 0.0 }
 0x44b   : > { %v12334_v20 = vadd.f32 %v7709_v63, %v5804_v28  ;;  %v5803_v59 = vadd.f32 %v5780_v2, %v5687_v6  ;;  %v5690_v51 = vadd.f32 %v8867_v47, %v5534_v54  ;;  %v12359_v29 = vmin.f32 %v12343_v16, 0.0 }
 0x44c   : > { %v5674_v48 = vpop.f32.mrf.mxu1  ;;  %v5868_v50 = vmul.f32 1.442695, %v12346_v17  ;;  %v5862_v39 = vmul.f32 1.442695, %v12368_v18  ;;  %v5841_v35 = vmul.f32 0.5, %v12346_v17  ;;  %v5838_v37 = vmul.f32 0.5, %v12368_v18 }
 0x44d   : > { %v12338_v56 = vmin.f32 %v12334_v20, 0.0  ;;  %v12340_v3 = vadd.f32 %v7709_v63, %v5803_v59  ;;  %v5806_v30 = vadd.f32 %v8883_v11, %v5690_v51  ;;  %v5689_v61 = vadd.f32 %v5674_v48, %v5533_v49 }
 0x44e   : > { %v5866_v34 = vmul.f32 1.442695, %v12359_v29  ;;  %v5849_v44 = vadd.f32 1.0, %v5841_v35  ;;  %v5840_v57 = vmul.f32 0.5, %v12359_v29  ;;  %vm5899_vm8 = vcmp.gt.f32.partialorder %v12334_v20, 0.0  ;;  %v12968_v35 = vld [vmem:[#allocation5_spill] sm:$0xff] }
 0x44f   : > { %v12349_v1 = vmin.f32 %v12340_v3, 0.0  ;;  %v5821_v14 = vadd.f32 %v7709_v63, %v5806_v30  ;;  %v5805_v58 = vadd.f32 %v5790_v27, %v5689_v61  ;;  %v5872_v31 = vmul.f32 1.442695, %v12338_v56 }
 0x450   : > { %v5843_v40 = vmul.f32 0.5, %v12338_v56  ;;  %vm5835_vm13 = vcmp.gt.f32.partialorder %v12338_v56, -0.001  ;;  %v5848_v7 = vadd.f32 1.0, %v5840_v57  ;;  %v5857_v61 = vmul.f32 %v5849_v44, %v12346_v17  ;;  %v7735_v57 = vld [vmem:[%s12662_s7 + $0x48] sm:$0xff] }
 0x451   : > { %v5829_v42 = vmin.f32 %v5821_v14, 0.0  ;;  %v12354_v45 = vadd.f32 %v7709_v63, %v5805_v58  ;;  %v5870_v22 = vmul.f32 1.442695, %v12349_v1  ;;  %9122 = vpow2.f32 %v5872_v31 }
 0x452   : > { %v5842_v26 = vmul.f32 0.5, %v12349_v1  ;;  %v5851_v52 = vadd.f32 1.0, %v5843_v40  ;;  %vm5901_vm15 = vcmp.gt.f32.partialorder %v5821_v14, 0.0  ;;  %vm5834_vm1 = vcmp.gt.f32.partialorder %v12349_v1, -0.001 }
 0x453   : > { %v5828_v8 = vmin.f32 %v12354_v45, 0.0  ;;  %v5876_v0 = vmul.f32 1.442695, %v5829_v42  ;;  %v5845_v46 = vmul.f32 0.5, %v5829_v42  ;;  %vm5837_vm12 = vcmp.gt.f32.partialorder %v5829_v42, -0.001 }
 0x454   : > { %v5850_v25 = vadd.f32 1.0, %v5842_v26  ;;  %v5859_v15 = vmul.f32 %v5851_v52, %v12338_v56  ;;  %vm5900_vm5 = vcmp.gt.f32.partialorder %v12354_v45, 0.0  ;;  %v5847_v56 = vadd.f32 1.0, %v5839_v5  ;;  %v7726_v5 = vld [vmem:[%s12662_s7 + $0x20] sm:$0xff] }
 0x455   : > { %9124 = vpow2.f32 %v5876_v0  ;;  %v5874_v43 = vmul.f32 1.442695, %v5828_v8  ;;  %v5844_v38 = vmul.f32 0.5, %v5828_v8  ;;  %v5853_v19 = vadd.f32 1.0, %v5845_v46 }
 0x456   : > { %9126 = vpow2.f32 %v5870_v22  ;;  %vm5836_vm0 = vcmp.gt.f32.partialorder %v5828_v8, -0.001  ;;  %v5858_v47 = vmul.f32 %v5850_v25, %v12349_v1  ;;  %vm5898_vm3 = vcmp.gt.f32.partialorder %v12340_v3, 0.0 }
 0x457   : > { %9128 = vpow2.f32 %v5868_v50  ;;  %v5852_v4 = vadd.f32 1.0, %v5844_v38  ;;  %v5861_v9 = vmul.f32 %v5853_v19, %v5829_v42  ;;  %vm5833_vm6 = vcmp.gt.f32.partialorder %v12346_v17, -0.001 }
 0x458   : > { %9130 = vpow2.f32 %v5874_v43  ;;  %v5856_v1 = vmul.f32 %v5848_v7, %v12359_v29  ;;  %v5846_v42 = vadd.f32 1.0, %v5838_v37  ;;  %vm5832_vm2 = vcmp.gt.f32.partialorder %v12359_v29, -0.001  ;;  %v5911_v43 = vld [vmem:[%s12661_s6 + $0x8] sm:$0xff] }
 0x459   : > { %9132 = vpow2.f32 %v5866_v34  ;;  %v5860_v11 = vmul.f32 %v5852_v4, %v5828_v8  ;;  %vm5896_vm9 = vcmp.gt.f32.partialorder %v12343_v16, 0.0  ;;  %vm5830_vm10 = vcmp.gt.f32.partialorder %v12368_v18, -0.001  ;;  %v7730_v34 = vld [vmem:[%s12662_s7 + $0x30] sm:$0xff] }
 0x45a   : > { %9134 = vpow2.f32 %v5864_v41  ;;  %v7739_v41 = vld [vmem:[%s12662_s7 + $0x58] sm:$0xff] }
 0x45b   : > { %9136 = vpow2.f32 %v5862_v39 }
 0x45e   : > { %v9123_v2 = vpop.eup %9122 }
 0x45f   : > { %v7715_v32 = vadd.f32 -1.0, %v9123_v2 }
 0x461   : > { %v5891_v59 = vsel %vm5835_vm13, %v5859_v15, %v7715_v32 }
 0x462   : > { %v9125_v13 = vpop.eup %9124 }
 0x463   : > { %v9127_v60 = vpop.eup %9126  ;;  %v7717_v10 = vadd.f32 -1.0, %v9125_v13  ;;  %v5994_v13 = vld [vmem:[%s12662_s7] sm:$0xff] }
 0x464   : > { %v9129_v55 = vpop.eup %9128  ;;  %v7714_v36 = vadd.f32 -1.0, %v9127_v60 }
 0x465   : > { %v9131_v28 = vpop.eup %9130  ;;  %v5893_v6 = vsel %vm5837_vm12, %v5861_v9, %v7717_v10  ;;  %v7713_v51 = vadd.f32 -1.0, %v9129_v55  ;;  %vm5895_vm12 = vcmp.gt.f32.partialorder %v12351_v53, 0.0  ;;  %v7727_v10 = vld [vmem:[%s12662_s7 + $0x28] sm:$0xff]  ;;  %v7738_v55 = vld [vmem:[%s12662_s7 + $0x50] sm:$0xff] }
 0x466   : > { %v5909_v54 = vsel %vm5901_vm15, %v5821_v14, %v5893_v6  ;;  %v7716_v63 = vadd.f32 -1.0, %v9131_v28  ;;  %v9133_v21 = vpop.eup %9132  ;;  %v5890_v30 = vsel %vm5834_vm1, %v5858_v47, %v7714_v36  ;;  %v5907_v14 = vsel %vm5899_vm8, %v12334_v20, %v5891_v59  ;;  %v7743_v36 = vld [vmem:[%s12662_s7 + $0x68] sm:$0xff] }
 0x467   : > { %8884 = vmatprep.subr.mxu1 %v5909_v54  ;;  %v9135_v33 = vpop.eup %9134  ;;  %v7712_v27 = vadd.f32 -1.0, %v9133_v21  ;;  %v5889_v58 = vsel %vm5833_vm6, %v5857_v61, %v7713_v51  ;;  %v5855_v20 = vmul.f32 %v5847_v56, %v12365_v24  ;;  %vm5894_vm15 = vcmp.gt.f32.partialorder %v12356_v62, 0.0  ;;  %v7742_v51 = vld [vmem:[%s12662_s7 + $0x60] sm:$0xff] }
 0x468   : > { %8885 = vmatpush3.msra.mxu1 %v5909_v54  ;;  %v5892_v49 = vsel %vm5836_vm0, %v5860_v11, %v7716_v63  ;;  %v9137_v23 = vpop.eup %9136  ;;  %v7711_v31 = vadd.f32 -1.0, %v9135_v33  ;;  %v5905_v17 = vsel %vm5897_vm4, %v12332_v12, %v5889_v58  ;;  %vm12971_vm0 = vcmp.lt.s32.totalorder %v12968_v35, 5  ;;  %v7734_v54 = vld [vmem:[%s12662_s7 + $0x40] sm:$0xff] }
 0x469   : > { %v5908_v48 = vsel %vm5900_vm5, %v12354_v45, %v5892_v49  ;;  %v5906_v45 = vsel %vm5898_vm3, %v12340_v3, %v5890_v30  ;;  %v5888_v22 = vsel %vm5832_vm2, %v5856_v1, %v7712_v27  ;;  %v7710_v8 = vadd.f32 -1.0, %v9137_v23  ;;  %vm12972_vm5 = vmmov %vm12971_vm0  ;;  %v7747_v49 = vld [vmem:[%s12662_s7 + $0x78] sm:$0xff]  ;;  %v7751_v30 = vld [vmem:[%s12662_s7 + $0x88] sm:$0xff] }
 0x46a   : > { %8886 = vmatprep.subr.mxu1 %v5908_v48  ;;  %v5887_v0 = vsel %vm5831_vm7, %v5855_v20, %v7711_v31  ;;  %v5854_v3 = vmul.f32 %v5846_v42, %v12368_v18  ;;  %v5904_v29 = vsel %vm5896_vm9, %v12343_v16, %v5888_v22  ;;  %v7721_v16 = vld [vmem:[%s12662_s7 + $0x18] sm:$0xff]  ;;  %vm12973_vm1 = vcmp.lt.s32.totalorder %v12968_v35, 6  ;;  %v7750_v23 = vld [vmem:[%s12662_s7 + $0x80] sm:$0xff]  ;;  %v6893_v42 = vld [vmem:[%s12665_s10 + $0x10] sm:$0xff] }
 0x46b   : > { %8887 = vmatpush3.msra.mxu1 %v5908_v48  ;;  %v5903_v12 = vsel %vm5895_vm12, %v12351_v53, %v5887_v0  ;;  %v7720_v53 = vld [vmem:[%s12662_s7 + $0x10] sm:$0xff]  ;;  %v7731_v18 = vld [vmem:[%s12662_s7 + $0x38] sm:$0xff]  ;;  %vm12974_vm8 = vmmov %vm12973_vm1  ;;  %vm12975_vm3 = vcmp.lt.s32.totalorder %v12968_v35, 4  ;;  %vm12976_vm6 = vcmp.lt.s32.totalorder %v12968_v35, 3  ;;  %vm12979_vm7 = vcmp.lt.s32.totalorder %v12968_v35, 2 }
 0x46c   : > { %8888 = vmatprep.subr.mxu1 %v5907_v14  ;;  %v5886_v50 = vsel %vm5830_vm10, %v5854_v3, %v7710_v8  ;;  %8924 = vmatprep.subr.mxu0 %v7731_v18  ;;  %vm12977_vm2 = vmmov %vm12976_vm6  ;;  %v7746_v48 = vld [vmem:[%s12662_s7 + $0x70] sm:$0xff]  ;;  %vm12981_vm10 = vcmp.lt.s32.totalorder %v12968_v35, 1  ;;  %v9236_v1 = vmov 0.0   ;;  %v6894_v31 = vld [vmem:[%s12665_s10 + $0x18] sm:$0xff] }
 0x46d   : > { %8889 = vmatpush3.msra.mxu1 %v5907_v14  ;;  %v5902_v24 = vsel %vm5894_vm15, %v12356_v62, %v5886_v50  ;;  %v5995_v62 = vld [vmem:[%s12662_s7 + $0x8] sm:$0xff]  ;;  %8925 = vmatpush3.msra.mxu0 %v7731_v18  ;;  %vm12978_vm4 = vmmov %vm12975_vm3  ;;  %vm9237_vm15 = vmmov 0  }
 0x46e   : > { %8890 = vmatprep.subr.mxu1 %v5906_v45  ;;  %8926 = vmatprep.subr.mxu0 %v7730_v34  ;;  %vm12980_vm9 = vmmov %vm12979_vm7 }
 0x46f   : > { %8891 = vmatpush3.msra.mxu1 %v5906_v45  ;;  %8927 = vmatpush3.msra.mxu0 %v7730_v34  ;;  %vm12982_vm12 = vmmov %vm12981_vm10  ;;  %v6892_v45 = vld [vmem:[%s12665_s10 + $0x8] sm:$0xff] }
 0x470   : > { %8892 = vmatprep.subr.mxu1 %v5905_v17  ;;  %8938 = vmatprep.subr.mxu0 %v7739_v41 }
 0x471   : > { %8893 = vmatpush3.msra.mxu1 %v5905_v17 }
 0x472   : > { %8894 = vmatprep.subr.mxu1 %v5904_v29 }
 0x473   : > { %8895 = vmatpush3.msra.mxu1 %v5904_v29 }
 0x474   : > { %8896 = vmatprep.subr.mxu1 %v5903_v12 }
 0x475   : > { %8897 = vmatpush3.msra.mxu1 %v5903_v12 }
 0x476   : > { %8898 = vmatprep.subr.mxu1 %v5902_v24 }
 0x477   : > { %8899 = vmatpush3.msra.mxu1 %v5902_v24 }
 0x478   : > { %8901 = vmatmul.mubr.msk.f32.vlgmr.msra.gmra.mxu1 %vm5912_vm11, %v5911_v43  ;;  %8903 = vmatprep.subr.mxu1 %v7721_v16  ;;  %vm12969_vm11 = vcmp.lt.s32.totalorder %v12968_v35, 7 }
 0x479   : > { %8904 = vmatpush3.msra.mxu1 %v7721_v16  ;;  %vm12970_vm13 = vmmov %vm12969_vm11 }
 0x47a   : > { %8905 = vmatprep.subr.mxu1 %v7720_v53 }
 0x47b   : > { %8906 = vmatpush3.msra.mxu1 %v7720_v53 }
 0x47c   : > { %8910 = vmatprep.subr.mxu1 %v5995_v62 }
 0x538   : > { %v12427_v39 = vpop.f32.mrf.mxu1 }
 0x539   : > { %v5997_v38 = vrot.slane %v12427_v39, 1  ;;  %v6256_v26 = vrot.slane %v12427_v39, 3  ;;  %v6166_v25 = vrot.slane %v12427_v39, 2  ;;  %v6346_v6 = vrot.slane %v12427_v39, 4 }
 0x53a   : > { %v12429_v46 = vpop.f32.mrf.mxu1  ;;  %v6436_v11 = vrot.slane %v12427_v39, 5  ;;  %v6526_v7 = vrot.slane %v12427_v39, 6  ;;  %v6616_v27 = vrot.slane %v12427_v39, 7 }
 0x53b   : > { %v5996_v40 = vrot.slane %v12429_v46, 1  ;;  %v6255_v19 = vrot.slane %v12429_v46, 3  ;;  %v6165_v9 = vrot.slane %v12429_v46, 2  ;;  %v6345_v44 = vrot.slane %v12429_v46, 4 }
 0x53c   : > { %v6435_v28 = vrot.slane %v12429_v46, 5  ;;  %v6525_v47 = vrot.slane %v12429_v46, 6  ;;  %v6615_v56 = vrot.slane %v12429_v46, 7 }
 0x53d   : > { %v5998_v2 = vsel %vm12969_vm11, %v5996_v40, %v5997_v38  ;;  %v5999_v52 = vsel %vm12970_vm13, %v5997_v38, %v5996_v40  ;;  %v6257_v4 = vsel %vm12971_vm0, %v6255_v19, %v6256_v26  ;;  %v6258_v60 = vsel %vm12972_vm5, %v6256_v26, %v6255_v19 }
 0x53e   : > { %8907 = vmatprep.mubr.msk.f32.mxu1 %vm4496_vm14, %v5998_v2  ;;  %8928 = vmatprep.mubr.msk.f32.mxu0 %vm4496_vm14, %v6257_v4  ;;  %v6167_v32 = vsel %vm12973_vm1, %v6165_v9, %v6166_v25  ;;  %v6168_v15 = vsel %vm12974_vm8, %v6166_v25, %v6165_v9  ;;  %v6347_v63 = vsel %vm12975_vm3, %v6345_v44, %v6346_v6  ;;  %vm7207_vm1 = vcmask 57344  }
 0x53f   : > { %8908 = vmatmul.mubr.msk.f32.vlgmr.msra.gmra.mxu1 %vm4496_vm14, %v5999_v52  ;;  %8929 = vmatmul.mubr.msk.f32.vlgmr.msra.gmra.mxu0 %vm4496_vm14, %v6258_v60  ;;  %v6437_v21 = vsel %vm12976_vm6, %v6435_v28, %v6436_v11  ;;  %v6438_v37 = vsel %vm12977_vm2, %v6436_v11, %v6435_v28  ;;  %v6348_v59 = vsel %vm12978_vm4, %v6346_v6, %v6345_v44 }
 0x540   : > { %8911 = vmatpush3.msra.mxu1 %v5995_v62  ;;  %8914 = vmatprep.mubr.msk.f32.mxu1 %vm4496_vm14, %v12429_v46  ;;  %v6527_v33 = vsel %vm12979_vm7, %v6525_v47, %v6526_v7  ;;  %v6528_v61 = vsel %vm12980_vm9, %v6526_v7, %v6525_v47  ;;  %v6617_v14 = vsel %vm12981_vm10, %v6615_v56, %v6616_v27 }
 0x541   : > { %8912 = vmatprep.subr.mxu1 %v5994_v13  ;;  %8939 = vmatpush3.msra.mxu0 %v7739_v41  ;;  %v6618_v58 = vsel %vm12982_vm12, %v6616_v27, %v6615_v56  ;;  %v7762_v27 = vld [vmem:[%s12665_s10 + $0x38] sm:$0xff] }
 0x542   : > { %8913 = vmatpush3.msra.mxu1 %v5994_v13  ;;  %8940 = vmatprep.subr.mxu0 %v7738_v55 }
 0x543   : > { %8915 = vmatmul.mubr.msk.f32.vlgmr.msra.gmra.mxu1 %vm4496_vm14, %v12427_v39  ;;  %8917 = vmatprep.subr.mxu1 %v7727_v10 }
 0x544   : > { %8918 = vmatpush3.msra.mxu1 %v7727_v10  ;;  %8921 = vmatprep.mubr.msk.f32.mxu1 %vm4496_vm14, %v6167_v32  ;;  %v7754_v10 = vld [vmem:[%s12663_s8] ss:$0 sm:$0xff] }
 0x545   : > { %8919 = vmatprep.subr.mxu1 %v7726_v5  ;;  %8941 = vmatpush3.msra.mxu0 %v7738_v55 }
 0x546   : > { %8920 = vmatpush3.msra.mxu1 %v7726_v5  ;;  %8942 = vmatprep.mubr.msk.f32.mxu0 %vm4496_vm14, %v6437_v21 }
 0x547   : > { %8922 = vmatmul.mubr.msk.f32.vlgmr.msra.gmra.mxu1 %vm4496_vm14, %v6168_v15  ;;  %8931 = vmatprep.subr.mxu1 %v7735_v57 }
 0x548   : > { %8932 = vmatpush3.msra.mxu1 %v7735_v57  ;;  %8935 = vmatprep.mubr.msk.f32.mxu1 %vm4496_vm14, %v6347_v63 }
 0x549   : > { %8933 = vmatprep.subr.mxu1 %v7734_v54  ;;  %8943 = vmatmul.mubr.msk.f32.vlgmr.msra.gmra.mxu0 %vm4496_vm14, %v6438_v37 }
 0x54a   : > { %8934 = vmatpush3.msra.mxu1 %v7734_v54  ;;  %8952 = vmatprep.subr.mxu0 %v7747_v49 }
 0x54b   : > { %8936 = vmatmul.mubr.msk.f32.vlgmr.msra.gmra.mxu1 %vm4496_vm14, %v6348_v59  ;;  %8945 = vmatprep.subr.mxu1 %v7743_v36 }
 0x54c   : > { %8946 = vmatpush3.msra.mxu1 %v7743_v36  ;;  %8949 = vmatprep.mubr.msk.f32.mxu1 %vm4496_vm14, %v6527_v33 }
 0x54d   : > { %8947 = vmatprep.subr.mxu1 %v7742_v51  ;;  %8953 = vmatpush3.msra.mxu0 %v7747_v49 }
 0x54e   : > { %8948 = vmatpush3.msra.mxu1 %v7742_v51  ;;  %8954 = vmatprep.subr.mxu0 %v7746_v48 }
 0x54f   : > { %8950 = vmatmul.mubr.msk.f32.vlgmr.msra.gmra.mxu1 %vm4496_vm14, %v6528_v61  ;;  %8959 = vmatprep.subr.mxu1 %v7751_v30 }
 0x550   : > { %8955 = vmatpush3.msra.mxu0 %v7746_v48  ;;  %8956 = vmatprep.mubr.msk.f32.mxu0 %vm4496_vm14, %v6617_v14  ;;  %v7760_v14 = vld [vmem:[%s12665_s10 + $0x28] sm:$0xff] }
 0x551   : > { %8960 = vmatpush3.msra.mxu1 %v7751_v30  ;;  %8957 = vmatmul.mubr.msk.f32.vlgmr.msra.gmra.mxu0 %vm4496_vm14, %v6618_v58  ;;  %v6816_v30 = vld [vmem:[%s12664_s9] sm:$0xf] }
 0x552   : > { %8961 = vmatprep.subr.mxu1 %v7750_v23  ;;  %8963 = vmatprep.mubr.msk.f32.mxu1 %vm4496_vm14, %v12427_v39  ;;  %v6891_v58 = vld [vmem:[%s12665_s10] sm:$0xff] }
 0x553   : > { %8962 = vmatpush3.msra.mxu1 %v7750_v23  ;;  %8966 = vmatprep.subr.mxu0 %v9236_v1  ;;  %v7761_v23 = vld [vmem:[%s12665_s10 + $0x30] sm:$0xff] }
 0x554   : > { %8964 = vmatmul.mubr.msk.f32.vlgmr.msra.gmra.mxu1 %vm4496_vm14, %v12429_v46  ;;  %8973 = vmatprep.subr.mxu1 %v9236_v1 }
 0x555   : > { %8970 = vmatprep.mubr.msk.f32.mxu0 %vm9237_vm15, %v9236_v1  ;;  %8981 = vmatprep.mubr.msk.f32.mxu1 %vm9237_vm15, %v9236_v1 }
 0x556   : > { %8974 = vmatpush3.msra.mxu1 %v6894_v31  ;;  %v7759_v31 = vld [vmem:[%s12665_s10 + $0x20] sm:$0xff] }
 0x557   : > { %8975 = vmatprep.subr.mxu1 %v9236_v1 }
 0x558   : > { %8976 = vmatpush3.msra.mxu1 %v6893_v42  ;;  %v7767_v42 = vld [vmem:[%s12665_s10 + $0x58] sm:$0xff] }
 0x559   : > { %8977 = vmatprep.subr.mxu1 %v9236_v1 }
 0x55a   : > { %8978 = vmatpush3.msra.mxu1 %v6892_v45 }
 0x55b   : > { %8979 = vmatprep.subr.mxu1 %v9236_v1 }
 0x55c   : > { %8980 = vmatpush3.msra.mxu1 %v6891_v58 }
 0x55d   : > { %8995 = vmatprep.subr.mxu1 %v9236_v1 }
 0x5ff   : > { %v8909_v22 = vpop.f32.mrf.mxu1  ;;  %v8930_v8 = vpop.f32.mrf.mxu0 }
 0x601   : > { %v6075_v20 = vpop.f32.mrf.mxu1  ;;  %v6334_v29 = vpop.f32.mrf.mxu0 }
 0x603   : > { %v8916_v17 = vpop.f32.mrf.mxu1 }
 0x604   : > { %v6162_v3 = vadd.f32 %v8916_v17, %v8909_v22 }
 0x605   : > { %v6156_v0 = vpop.f32.mrf.mxu1 }
 0x606   : > { %v6157_v12 = vadd.f32 %v6156_v0, %v6075_v20  ;;  %v7772_v20 = vld [vmem:[%s12665_s10 + $0x78] sm:$0xff]  ;;  %v7771_v0 = vld [vmem:[%s12665_s10 + $0x70] sm:$0xff] }
 0x607   : > { %v8923_v50 = vpop.f32.mrf.mxu1 }
 0x608   : > { %v6254_v24 = vadd.f32 %v8923_v50, %v6162_v3  ;;  %v7765_v3 = vld [vmem:[%s12665_s10 + $0x48] sm:$0xff]  ;;  %v7764_v50 = vld [vmem:[%s12665_s10 + $0x40] sm:$0xff] }
 0x609   : > { %v6244_v43 = vpop.f32.mrf.mxu1  ;;  %v8944_v62 = vpop.f32.mrf.mxu0 }
 0x60a   : > { %v6253_v16 = vadd.f32 %v6244_v43, %v6157_v12  ;;  %v6344_v53 = vadd.f32 %v8930_v8, %v6254_v24  ;;  %v7766_v8 = vld [vmem:[%s12665_s10 + $0x50] sm:$0xff]  ;;  %v7769_v12 = vld [vmem:[%s12665_s10 + $0x60] sm:$0xff] }
 0x60b   : > { %v8937_v18 = vpop.f32.mrf.mxu1  ;;  %v6514_v38 = vpop.f32.mrf.mxu0 }
 0x60c   : > { %v6343_v34 = vadd.f32 %v6334_v29, %v6253_v16  ;;  %v6434_v41 = vadd.f32 %v8937_v18, %v6344_v53  ;;  %v7770_v29 = vld [vmem:[%s12665_s10 + $0x68] sm:$0xff]  ;;  %v6890_v53 = vld [vmem:[%s12666_s11] sm:$0x1] }
 0x60d   : > { %v6424_v39 = vpop.f32.mrf.mxu1 }
 0x60e   : > { %v6433_v46 = vadd.f32 %v6424_v39, %v6343_v34  ;;  %v6524_v40 = vadd.f32 %v8944_v62, %v6434_v41 }
 0x60f   : > { %v8951_v19 = vpop.f32.mrf.mxu1 }
 0x610   : > { %v6523_v26 = vadd.f32 %v6514_v38, %v6433_v46  ;;  %v6614_v35 = vadd.f32 %v8951_v19, %v6524_v40 }
 0x611   : > { %v6604_v2 = vpop.f32.mrf.mxu1  ;;  %v8958_v13 = vpop.f32.mrf.mxu0 }
 0x612   : > { %v6613_v52 = vadd.f32 %v6604_v2, %v6523_v26  ;;  %v6704_v4 = vadd.f32 %v8958_v13, %v6614_v35 }
 0x613   : > { %v6694_v60 = vpop.f32.mrf.mxu0 }
 0x614   : > { %v8965_v9 = vpop.f32.mrf.mxu1  ;;  %v6703_v25 = vadd.f32 %v6694_v60, %v6613_v52 }
 0x615   : > { %v6784_v5 = vadd.f32 %v8965_v9, %v6704_v4 }
 0x616   : > { %v6774_v55 = vpop.f32.mrf.mxu1 }
 0x617   : > { %v6793_v32 = vadd.f32 %v7754_v10, %v6784_v5  ;;  %v6783_v44 = vadd.f32 %v6774_v55, %v6703_v25 }
 0x619   : > { %v6795_v57 = vmin.f32 %v6793_v32, 0.0  ;;  %v6792_v28 = vadd.f32 %v7754_v10, %v6783_v44  ;;  %vm6813_vm13 = vcmp.gt.f32.partialorder %v6793_v32, 0.0 }
 0x61b   : > { %v6794_v6 = vmin.f32 %v6792_v28, 0.0  ;;  %v6806_v15 = vmul.f32 1.442695, %v6795_v57  ;;  %v6799_v11 = vmul.f32 0.5, %v6795_v57  ;;  %vm6797_vm11 = vcmp.gt.f32.partialorder %v6795_v57, -0.001 }
 0x61c   : > { %vm6812_vm5 = vcmp.gt.f32.partialorder %v6792_v28, 0.0 }
 0x61d   : > { %9138 = vpow2.f32 %v6806_v15  ;;  %v6804_v54 = vmul.f32 1.442695, %v6794_v6  ;;  %v6798_v63 = vmul.f32 0.5, %v6794_v6  ;;  %v6801_v36 = vadd.f32 1.0, %v6799_v11 }
 0x61e   : > { %vm6796_vm0 = vcmp.gt.f32.partialorder %v6794_v6, -0.001 }
 0x61f   : > { %9140 = vpow2.f32 %v6804_v54  ;;  %v6800_v47 = vadd.f32 1.0, %v6798_v63  ;;  %v6803_v37 = vmul.f32 %v6801_v36, %v6795_v57 }
 0x621   : > { %v6802_v33 = vmul.f32 %v6800_v47, %v6794_v6 }
 0x62a   : > { %v9139_v21 = vpop.eup %9138 }
 0x62b   : > { %v7756_v49 = vadd.f32 -1.0, %v9139_v21 }
 0x62c   : > { %v9141_v59 = vpop.eup %9140 }
 0x62d   : > { %v6811_v51 = vsel %vm6797_vm11, %v6803_v37, %v7756_v49  ;;  %v7755_v48 = vadd.f32 -1.0, %v9141_v59 }
 0x62e   : > { %v6815_v7 = vsel %vm6813_vm13, %v6793_v32, %v6811_v51 }
 0x62f   : > { %8967 = vmatpush3.msra.mxu0 %v6815_v7  ;;  %v6810_v56 = vsel %vm6796_vm0, %v6802_v33, %v7755_v48 }
 0x630   : > { %8968 = vmatprep.subr.mxu0 %v9236_v1  ;;  %v6814_v61 = vsel %vm6812_vm5, %v6792_v28, %v6810_v56 }
 0x631   : > { %8969 = vmatpush3.msra.mxu0 %v6814_v61 }
 0x632   : > { %8971 = vmatmul.mubr.msk.f32.vlgmr.msra.gmra.mxu0 %vm4496_vm14, %v6816_v30  ;;  %8984 = vmatprep.subr.mxu0 %v9236_v1  ;;  %vm6895_vm14 = vcmask 261120  }
 0x633   : > { %8985 = vmatpush3.msra.mxu0 %v7762_v27  ;;  %8992 = vmatprep.mubr.msk.f32.mxu0 %vm9237_vm15, %v9236_v1 }
 0x634   : > { %8986 = vmatprep.subr.mxu0 %v9236_v1 }
 0x635   : > { %8987 = vmatpush3.msra.mxu0 %v7761_v23 }
 0x636   : > { %8988 = vmatprep.subr.mxu0 %v9236_v1 }
 0x637   : > { %8989 = vmatpush3.msra.mxu0 %v7760_v14 }
 0x638   : > { %8990 = vmatprep.subr.mxu0 %v9236_v1 }
 0x639   : > { %8991 = vmatpush3.msra.mxu0 %v7759_v31 }
 0x63a   : > { %9006 = vmatprep.subr.mxu0 %v9236_v1 }
 0x6f2   : > { %v6886_v45 = vpop.f32.mrf.mxu0 }
 0x6f3   : > { %v6975_v22 = vrot.slane %v6886_v45, 1  ;;  %8982 = vmatmul.mubr.msk.f32.vlgmr.msra.gmra.mxu1 %vm6895_vm14, %v6886_v45  ;;  %v7054_v24 = vrot.slane %v6886_v45, 2  ;;  %v7133_v43 = vrot.slane %v6886_v45, 3 }
 0x6f4   : > { %8996 = vmatpush3.msra.mxu1 %v7767_v42  ;;  %v8972_v17 = vpop.f32.mrf.mxu0  ;;  %9003 = vmatprep.mubr.msk.f32.mxu1 %vm9237_vm15, %v9236_v1 }
 0x6f5   : > { %8993 = vmatmul.mubr.msk.f32.vlgmr.msra.gmra.mxu0 %vm6895_vm14, %v6975_v22  ;;  %8997 = vmatprep.subr.mxu1 %v9236_v1 }
 0x6f6   : > { %9007 = vmatpush3.msra.mxu0 %v7772_v20  ;;  %8998 = vmatpush3.msra.mxu1 %v7766_v8 }
 0x6f7   : > { %9008 = vmatprep.subr.mxu0 %v9236_v1  ;;  %8999 = vmatprep.subr.mxu1 %v9236_v1 }
 0x6f8   : > { %9009 = vmatpush3.msra.mxu0 %v7771_v0  ;;  %9000 = vmatpush3.msra.mxu1 %v7765_v3 }
 0x6f9   : > { %9010 = vmatprep.subr.mxu0 %v9236_v1  ;;  %9001 = vmatprep.subr.mxu1 %v9236_v1 }
 0x6fa   : > { %9011 = vmatpush3.msra.mxu0 %v7770_v29  ;;  %9002 = vmatpush3.msra.mxu1 %v7764_v50 }
 0x6fb   : > { %9012 = vmatprep.subr.mxu0 %v9236_v1  ;;  %9014 = vmatprep.mubr.msk.f32.mxu0 %vm9237_vm15, %v9236_v1 }
 0x6fc   : > { %9013 = vmatpush3.msra.mxu0 %v7769_v12  ;;  %9004 = vmatmul.mubr.msk.f32.vlgmr.msra.gmra.mxu1 %vm6895_vm14, %v7054_v24 }
 0x6fd   : > { %9015 = vmatmul.mubr.msk.f32.vlgmr.msra.gmra.mxu0 %vm6895_vm14, %v7133_v43 }
 0x7b3   : > { %v6965_v16 = vpop.f32.mrf.mxu1 }
 0x7b4   : > { %v6969_v34 = vadd.f32 %v6965_v16, %v6890_v53 }
 0x7b5   : > { %v7044_v62 = vpop.f32.mrf.mxu0  ;;  %v8983_v18 = vpop.f32.mrf.mxu1 }
 0x7b6   : > { %v7048_v39 = vadd.f32 %v7044_v62, %v6969_v34 }
 0x7b7   : > { %v8994_v41 = vpop.f32.mrf.mxu0 }
 0x7bc   : > { %v7123_v46 = vpop.f32.mrf.mxu1 }
 0x7bd   : > { %v7127_v1 = vadd.f32 %v7123_v46, %v7048_v39  ;;  %v7202_v40 = vpop.f32.mrf.mxu0 }
 0x7be   : > { %v9005_v38 = vpop.f32.mrf.mxu1 }
 0x7bf   : > { %v7206_v19 = vadd.f32 %v7202_v40, %v7127_v1  ;;  %v9016_v26 = vpop.f32.mrf.mxu0 }
 0x7c1   : > { %7208 = vst.msk [vmem:[%s405_s29] sm:$0x1] %vm7207_vm1, %v7206_v19 }
 0x7c2   : > { %9187 = shalt.err (!%p9184_p3)
}
 0x7c3   : > { %s9188_s2 = scalar_lea.hbm %s7220_s0, 16  ;;  %s9192_s29 = scalar_lea.hbm %s12667_s12, 32 }
 0x7c4   : > { %p9189_p4 = scmp.ne.s32.totalorder %s7220_s0, %s9188_s2  ;;  %p9193_p9 = scmp.lt.s32.totalorder %s7220_s0, %s12667_s12 }
 0x7c5   : > { %p9194_p10 = scmp.lt.s32.totalorder %s9192_s29, %s9188_s2 }
 0x7c6   : > { %p9190_p7 = pnand %p9189_p4, %p9342_p5 }
 0x7c7   : > { %p9195_p11 = por %p9194_p10, %p9193_p9 }
 0x7c8   : > { %p9191_p8 = pneg %p9190_p7 }
 0x7ca   : > { %p9196_p12 = pnand %p9195_p11, %p9191_p8 }
 0x7cc   : > { %9199 = shalt.err (!%p9196_p12)
}
 0x7cd   : > { %9017 = dma.vmem_to_hbm [thread:$0]  (%p9342_p5), %s7223_s15, 16, %s7220_s0, %s7210_s19  }
 0x7ce PF: > { %p9023_p13 = scmp.ge.s32.totalorder %s9234_s24, 2  ;;  %s7234_s1 = sand.u32 1, %s9222_s21  }
 0x7cf   : > { %s7235_s20 = scalar_lea.sflag [#allocation3], %s7234_s1 }
 0x7d0   : > { %p9020_p0 = pnand %p9023_p13, %p9346_p6 }
 0x7d2   : > { %p9021_p1 = pneg %p9020_p0 }
 0x7d4   : > { %9217 = dma.done.wait (%p9021_p1), %s7235_s20, 16  }
 0x7d5   : > { %9219 = vsyncadd (%p9021_p1), %s7235_s20, 4294967280  ;;  %p22_p2 = scmp.ge.s32.totalorder %s9329_s27, 4   ;;  %s12983_s21 = smov %s9226_s22 }
 0x7d6   : > { %s12984_s22 = smov %s9230_s23  ;;  %s12985_s23 = smov %s9340_s30 }
 0x7d7   : > { %s12986_s24 = smov %s9329_s27  ;;  %24 = sbr.rel (!%p22_p2) target bundleno = 7 (0x7), region = 130 }
 0x7dc   :  { %7239 = vsyncpa [#allocation3], 1 }
 0x7dd   :  { %7241 = vsyncpa [#allocation3 + $0x1], 1 }

</bundles_post_ra>
